<compile_context>
chip_gen: v7x
topology: tpu7x:2x2x1
jax: 0.10.0
libtpu: 0.0.40
codegen_flags: <defaults>
</compile_context>

<pallas_src>
import math
import functools

import jax
import jax.numpy as jnp
from jax.experimental import pallas as pl
from jax.experimental.pallas import tpu as pltpu


def _round_up(x, m):
    return (x + m - 1) // m * m


# --------------------- fused QKV projection: matmul + bias -------------------

def _matmul_bias_kernel(x_ref, w_ref, b_ref, o_ref):
    acc = jnp.dot(x_ref[...], w_ref[...], preferred_element_type=jnp.float32)
    o_ref[...] = (acc + b_ref[...]).astype(o_ref.dtype)


def matmul_bias(x, w, b, out_dtype=None, tm_target=512):
    """x: (M, K) @ w: (K, N) + b: (1, N).  K, N assumed small enough to keep
    whole (weight block resident); grid tiles M only."""
    # TODO(synk): add K/N tiling (with an f32 accumulator) for very large d_model.
    M, K = x.shape
    N = w.shape[1]
    out_dtype = out_dtype or x.dtype

    # Pick tm as a divisor of M (multiple of 8) so the wrapper never pads.
    if M <= tm_target:
        tm = M
    else:
        tm = None
        for d in range(tm_target, 7, -1):
            if M % d == 0 and d % 8 == 0:
                tm = d
                break
        if tm is None:
            tm = tm_target
    Mp = _round_up(M, tm)
    xp = x if Mp == M else jnp.pad(x, ((0, Mp - M), (0, 0)))

    out = pl.pallas_call(
        _matmul_bias_kernel,
        out_shape=jax.ShapeDtypeStruct((Mp, N), out_dtype),
        grid=(Mp // tm,),
        in_specs=[
            pl.BlockSpec((tm, K), lambda i: (i, 0)),
            pl.BlockSpec((K, N), lambda i: (0, 0)),
            pl.BlockSpec((1, N), lambda i: (0, 0)),
        ],
        out_specs=pl.BlockSpec((tm, N), lambda i: (i, 0)),
        compiler_params=pltpu.CompilerParams(
            dimension_semantics=("parallel",)),
    )(xp, w, b)
    return out if Mp == M else out[:M]


# ------------------------ flash attention (online softmax) -------------------

def _flash_attn_kernel(q_ref, k_ref, v_ref, o_ref, m_scr, l_scr, acc_scr,
                       *, n_valid, tkv, need_mask):
    kv_idx = pl.program_id(2)

    @pl.when(kv_idx == 0)
    def _():
        m_scr[...] = jnp.full_like(m_scr, -1e30)
        l_scr[...] = jnp.zeros_like(l_scr)
        acc_scr[...] = jnp.zeros_like(acc_scr)

    q = q_ref[0]                                  # (tq, D) bf16, scale pre-folded
    k = k_ref[0]                                  # (tkv, D) bf16
    v = v_ref[0]                                  # (tkv, D) bf16
    # Contract on D directly (no transpose materialization), f32 accumulation.
    s = jax.lax.dot_general(q, k, (((1,), (1,)), ((), ())),
                            preferred_element_type=jnp.float32)   # (tq, tkv)

    if need_mask:
        # Only emitted when the sequence was padded (tiles do not divide N).
        col = jax.lax.broadcasted_iota(jnp.int32, s.shape, 1) + kv_idx * tkv
        s = jnp.where(col < n_valid, s, -1e30)

    m_prev = m_scr[...]
    m_new = jnp.maximum(m_prev, jnp.max(s, axis=-1, keepdims=True))
    alpha = jnp.exp(m_prev - m_new)
    p = jnp.exp(s - m_new)
    l_scr[...] = alpha * l_scr[...] + jnp.sum(p, axis=-1, keepdims=True)
    acc_scr[...] = alpha * acc_scr[...] + jnp.dot(
        p.astype(v.dtype), v, preferred_element_type=jnp.float32)
    m_scr[...] = m_new

    @pl.when(kv_idx == pl.num_programs(2) - 1)
    def _():
        inv_l = pl.reciprocal(l_scr[...], approx=True)
        o_ref[0] = (acc_scr[...] * inv_l).astype(o_ref.dtype)


def flash_attention(q, k, v, *, n_valid, tq, tkv):
    """q, k, v: (B, Np, D) bf16 with Np % tq == Np % tkv == 0. Output f32."""
    B, Np, D = q.shape
    kern = functools.partial(_flash_attn_kernel, n_valid=n_valid, tkv=tkv,
                             need_mask=(Np > n_valid))
    return pl.pallas_call(
        kern,
        out_shape=jax.ShapeDtypeStruct((B, Np, D), jnp.float32),
        grid_spec=pltpu.PrefetchScalarGridSpec(
            num_scalar_prefetch=0,
            grid=(B, Np // tq, Np // tkv),
            in_specs=[
                pl.BlockSpec((1, tq, D), lambda bi, qi, ki: (bi, qi, 0)),
                pl.BlockSpec((1, tkv, D), lambda bi, qi, ki: (bi, ki, 0)),
                pl.BlockSpec((1, tkv, D), lambda bi, qi, ki: (bi, ki, 0)),
            ],
            out_specs=pl.BlockSpec((1, tq, D),
                                   lambda bi, qi, ki: (bi, qi, 0)),
            scratch_shapes=[
                pltpu.VMEM((tq, 1), jnp.float32),    # running max
                pltpu.VMEM((tq, 1), jnp.float32),    # running sum
                pltpu.VMEM((tq, D), jnp.float32),    # output accumulator
            ],
        ),
        compiler_params=pltpu.CompilerParams(
            dimension_semantics=("parallel", "parallel", "arbitrary")),
    )(q, k, v)


def _attn_tiles(N):
    """Per-branch (Np, tq, tkv): single block when small, else 256/512 tiles."""
    Np = _round_up(N, 8)
    if Np <= 512:
        return Np, Np, Np
    return _round_up(N, 512), 256, 512


# ---------------- 3x3 conv + LeakyReLU, NHWC, row-tiled with halo ------------

def _conv3x3_leaky_kernel(xh_ref, w_ref, b_ref, o_ref, *, R, W, negative_slope):
    # xh_ref: (1, 1, R+2, W+2, Cin)  haloed row block of the padded image
    # w_ref:  (9, Cin, OP), b_ref: (1, OP), o_ref: (1, R, W, OP)
    OP = o_ref.shape[-1]
    cin = xh_ref.shape[-1]
    acc = jnp.zeros((R * W, OP), jnp.float32)
    for ky in range(3):
        for kx in range(3):
            lhs = xh_ref[0, 0, ky:ky + R, kx:kx + W, :].reshape(R * W, cin)
            acc = acc + jnp.dot(lhs, w_ref[ky * 3 + kx],
                                preferred_element_type=jnp.float32)
    acc = acc + b_ref[...]
    acc = jnp.where(acc >= 0, acc, negative_slope * acc)
    o_ref[0] = acc.reshape(R, W, OP).astype(o_ref.dtype)


def conv3x3_leaky_nhwc(x_nhwc, w_oihw, bias, negative_slope=0.2,
                       rows_per_block=32):
    """3x3 conv, padding=1, NHWC, fused LeakyReLU.  Row-tiled (2-row halo),
    9 taps accumulated as row-batched (R*W, Cin)@(Cin, OP) matmuls in VMEM."""
    bt, H, W, cin = x_nhwc.shape
    cout = w_oihw.shape[0]
    OP = _round_up(cout, 128)                           # lane-dense output
    R = min(rows_per_block, H)
    while H % R:                                        # keep R a divisor of H
        R -= 1
    nrb = H // R

    xp = jnp.pad(x_nhwc, ((0, 0), (1, 1), (1, 1), (0, 0)))
    if nrb == 1:
        xh = xp[:, None]                                # (bt, 1, H+2, W+2, cin)
    else:
        # Haloed row blocks: (bt, nrb, R+2, W+2, cin).
        xh = jnp.stack([xp[:, r * R:r * R + R + 2] for r in range(nrb)], axis=1)

    w9 = jnp.transpose(w_oihw, (2, 3, 1, 0)).reshape(9, cin, cout)
    w9 = jnp.pad(w9, ((0, 0), (0, 0), (0, OP - cout)))
    bp = jnp.pad(bias.reshape(1, cout), ((0, 0), (0, OP - cout)))

    kern = functools.partial(_conv3x3_leaky_kernel, R=R, W=W,
                             negative_slope=negative_slope)
    out = pl.pallas_call(
        kern,
        out_shape=jax.ShapeDtypeStruct((bt, H, W, OP), jnp.float32),
        grid=(bt, nrb),
        in_specs=[
            pl.BlockSpec((1, 1, R + 2, W + 2, cin), lambda i, r: (i, r, 0, 0, 0)),
            pl.BlockSpec((9, cin, OP), lambda i, r: (0, 0, 0)),
            pl.BlockSpec((1, OP), lambda i, r: (0, 0)),
        ],
        out_specs=pl.BlockSpec((1, R, W, OP), lambda i, r: (i, r, 0, 0)),
        compiler_params=pltpu.CompilerParams(
            dimension_semantics=("parallel", "parallel")),
    )(xh, w9, bp)
    return out[..., :cout]


# ------------------------------- forward glue --------------------------------

def multi_headed_attention(params, x, m, b, c, patchsize):
    """Port of MultiHeadedAttention.forward. x: (bt, c, h, w) NCHW float32."""
    bt, _, h, w = x.shape
    t = bt // b
    d_k = c // len(patchsize)

    # ---- fused Q/K/V 1x1 projection; 1/sqrt(D_i) folded into wq / bq ----
    scales = jnp.concatenate([
        jnp.full((d_k,), 1.0 / math.sqrt(d_k * hh * ww), jnp.float32)
        for (ww, hh) in patchsize])
    wq_t = params["wq"].reshape(c, c).T * scales[None, :]
    bq_s = params["bq"] * scales
    w_cat = jnp.concatenate(
        [wq_t, params["wk"].reshape(c, c).T,
         params["wv"].reshape(c, c).T], axis=1)              # (Cin, 3*Cout)
    b_cat = jnp.concatenate(
        [bq_s, params["bk"], params["bv"]]).reshape(1, 3 * c)

    x_flat = jnp.transpose(x, (0, 2, 3, 1)).reshape(bt * h * w, c)
    qkv = matmul_bias(x_flat.astype(jnp.bfloat16),
                      w_cat.astype(jnp.bfloat16),
                      b_cat, out_dtype=jnp.bfloat16)
    qkv = qkv.reshape(bt, h, w, 3 * c)
    _query, _key, _value = qkv[..., :c], qkv[..., c:2 * c], qkv[..., 2 * c:]

    # ---- per-patchsize branches, each with its own right-sized flash call ----
    # TODO(synk): fold the patchify reshape/transposes into BlockSpec index_maps
    # to avoid the intermediate XLA layout copies (pure layout plumbing).
    outs = []
    for i, (width, height) in enumerate(patchsize):
        out_w, out_h = w // width, h // height
        N = t * out_h * out_w
        D = d_k * height * width
        ch = slice(i * d_k, (i + 1) * d_k)

        def to_patches(z):
            zz = z[..., ch].reshape(b, t, out_h, height, out_w, width, d_k)
            zz = zz.transpose(0, 1, 2, 4, 6, 3, 5)   # (b,t,oh,ow,dk,hh,ww)
            return zz.reshape(b, N, D)

        Np, tq, tkv = _attn_tiles(N)
        q_i, k_i, v_i = to_patches(_query), to_patches(_key), to_patches(_value)
        if Np != N:
            pad = ((0, 0), (0, Np - N), (0, 0))
            q_i, k_i, v_i = (jnp.pad(z, pad) for z in (q_i, k_i, v_i))

        y = flash_attention(q_i, k_i, v_i, n_valid=N, tq=tq, tkv=tkv)[:, :N]

        y = y.reshape(b, t, out_h, out_w, d_k, height, width)
        y = y.transpose(0, 1, 2, 5, 3, 6, 4).reshape(bt, h, w, d_k)
        outs.append(y)
    att = jnp.concatenate(outs, axis=-1)                     # (bt, h, w, c) f32

    # ---- 3x3 output conv + LeakyReLU(0.2) ----
    out_nhwc = conv3x3_leaky_nhwc(att, params["wo"], params["bo"], 0.2)
    return jnp.transpose(out_nhwc, (0, 3, 1, 2))


# --------------------------- pure-JAX reference ------------------------------

def _reference_forward(params, x, m, b, c, patchsize):
    bt, _, h, w = x.shape
    t = bt // b
    d_k = c // len(patchsize)
    hp = jax.lax.Precision.HIGHEST

    def conv(z, wgt, bb, pad):
        o = jax.lax.conv_general_dilated(
            z, wgt, (1, 1), [(pad, pad), (pad, pad)],
            dimension_numbers=("NCHW", "OIHW", "NCHW"), precision=hp)
        return o + bb.reshape(1, -1, 1, 1)

    _q = conv(x, params["wq"], params["bq"], 0)
    _k = conv(x, params["wk"], params["bk"], 0)
    _v = conv(x, params["wv"], params["bv"], 0)
    outs = []
    for i, (width, height) in enumerate(patchsize):
        out_w, out_h = w // width, h // height
        sl = slice(i * d_k, (i + 1) * d_k)

        def pat(z):
            zz = z[:, sl].reshape(b, t, d_k, out_h, height, out_w, width)
            zz = zz.transpose(0, 1, 3, 5, 2, 4, 6)
            return zz.reshape(b, t * out_h * out_w, d_k * height * width)

        q, k_, v_ = pat(_q), pat(_k), pat(_v)
        scores = jnp.einsum("bnd,bmd->bnm", q, k_,
                            precision=hp) / math.sqrt(q.shape[-1])
        p = jax.nn.softmax(scores, axis=-1)
        y = jnp.einsum("bnm,bmd->bnd", p, v_, precision=hp)
        y = y.reshape(b, t, out_h, out_w, d_k, height, width)
        y = y.transpose(0, 1, 4, 2, 5, 3, 6).reshape(bt, d_k, h, w)
        outs.append(y)
    cat = jnp.concatenate(outs, axis=1)
    o = conv(cat, params["wo"], params["bo"], 1)
    return jnp.where(o >= 0, o, 0.2 * o)


# ----------------------------------- main ------------------------------------

if __name__ == "__main__":
    patchsize = [(2, 2), (4, 4)]
    b, t, c, h, w = 2, 2, 4, 16, 16
    bt = b * t

    key = jax.random.PRNGKey(0)
    ks = jax.random.split(key, 10)
    params = {
        "wq": 0.1 * jax.random.normal(ks[0], (c, c, 1, 1), jnp.float32),
        "bq": 0.1 * jax.random.normal(ks[1], (c,), jnp.float32),
        "wk": 0.1 * jax.random.normal(ks[2], (c, c, 1, 1), jnp.float32),
        "bk": 0.1 * jax.random.normal(ks[3], (c,), jnp.float32),
        "wv": 0.1 * jax.random.normal(ks[4], (c, c, 1, 1), jnp.float32),
        "bv": 0.1 * jax.random.normal(ks[5], (c,), jnp.float32),
        "wo": 0.1 * jax.random.normal(ks[6], (c, c, 3, 3), jnp.float32),
        "bo": 0.1 * jax.random.normal(ks[7], (c,), jnp.float32),
    }
    x = jax.random.normal(ks[8], (bt, c, h, w), jnp.float32)
    m = (jax.random.uniform(ks[9], (bt, 1, h, w)) > 0.5).astype(jnp.float32)

    fwd = jax.jit(
        lambda p, xx, mm: multi_headed_attention(p, xx, mm, b, c, patchsize))
    out = fwd(params, x, m)
    jax.block_until_ready(out)
    assert out.shape == (bt, c, h, w), out.shape

    ref = _reference_forward(params, x, m, b, c, patchsize)
    err = float(jnp.max(jnp.abs(out - ref)))
    assert err < 2e-2, f"mismatch vs pure-JAX reference: {err}"
    print("KERNEL_OK")
</pallas_src>

<mosaic_0001>
module attributes {stable_mosaic.version = 11 : i64} {
  func.func @_matmul_bias_kernel(%arg0: i32, %arg1: memref<512x4xbf16, #tpu.memory_space<vmem>>, %arg2: memref<4x12xbf16, #tpu.memory_space<vmem>>, %arg3: memref<1x12xf32, #tpu.memory_space<vmem>>, %arg4: memref<512x12xbf16, #tpu.memory_space<vmem>>) attributes {dimension_semantics = [#tpu.dimension_semantics<parallel>], iteration_bounds = array<i64: 2>, scalar_prefetch = 0 : i64, scratch_operands = 0 : i64, tpu.core_type = #tpu.core_type<tc>, window_params = [{transform_indices = @transform_0, window_bounds = array<i64: 512, 4>}, {pipeline_mode = #tpu.pipeline_mode<synchronous>, transform_indices = @transform_1, window_bounds = array<i64: 4, 12>}, {pipeline_mode = #tpu.pipeline_mode<synchronous>, transform_indices = @transform_2, window_bounds = array<i64: 1, 12>}, {transform_indices = @transform_3, window_bounds = array<i64: 512, 12>}]} {
    %c0 = arith.constant 0 : index
    %c0_0 = arith.constant 0 : index
    %0 = vector.load %arg1[%c0, %c0_0] : memref<512x4xbf16, #tpu.memory_space<vmem>>, vector<512x4xbf16>
    %c0_1 = arith.constant 0 : index
    %c0_2 = arith.constant 0 : index
    %1 = vector.load %arg2[%c0_1, %c0_2] : memref<4x12xbf16, #tpu.memory_space<vmem>>, vector<4x12xbf16>
    %cst = arith.constant dense<0.000000e+00> : vector<512x12xf32>
    %2 = tpu.matmul %0, %1, %cst {dimension_numbers = #tpu.dot_dimension_numbers<[1], [0], [0], [1], [0, 0, 1, 1], [], []>} : vector<512x4xbf16>, vector<4x12xbf16>, vector<512x12xf32> -> vector<512x12xf32>
    %c0_3 = arith.constant 0 : index
    %c0_4 = arith.constant 0 : index
    %3 = vector.load %arg3[%c0_3, %c0_4] : memref<1x12xf32, #tpu.memory_space<vmem>>, vector<1x12xf32>
    %4 = vector.broadcast %3 : vector<1x12xf32> to vector<512x12xf32>
    %5 = arith.addf %2, %4 : vector<512x12xf32>
    %6 = arith.truncf %5 : vector<512x12xf32> to vector<512x12xbf16>
    %c0_5 = arith.constant 0 : index
    %c0_6 = arith.constant 0 : index
    %7 = vector.load %arg4[%c0_5, %c0_6] : memref<512x12xbf16, #tpu.memory_space<vmem>>, vector<512x12xbf16>
    tpu.vector_store %arg4[%c0_5, %c0_6], %6 {strides = array<i32>} : memref<512x12xbf16, #tpu.memory_space<vmem>>, vector<512x12xbf16>,
    return
  }
  func.func @transform_0(%arg0: i32) -> (i32, i32) {
    %c0_i32 = arith.constant 0 : i32
    %c0_i32_0 = arith.constant 0 : i32
    return %arg0, %c0_i32 : i32, i32
  }
  func.func @transform_1(%arg0: i32) -> (i32, i32) {
    %c0_i32 = arith.constant 0 : i32
    %c0_i32_0 = arith.constant 0 : i32
    %c0_i32_1 = arith.constant 0 : i32
    return %c0_i32, %c0_i32_0 : i32, i32
  }
  func.func @transform_2(%arg0: i32) -> (i32, i32) {
    %c0_i32 = arith.constant 0 : i32
    %c0_i32_0 = arith.constant 0 : i32
    %c0_i32_1 = arith.constant 0 : i32
    return %c0_i32, %c0_i32_0 : i32, i32
  }
  func.func @transform_3(%arg0: i32) -> (i32, i32) {
    %c0_i32 = arith.constant 0 : i32
    %c0_i32_0 = arith.constant 0 : i32
    return %arg0, %c0_i32 : i32, i32
  }
}

module attributes {stable_mosaic.version = 11 : i64} {
  func.func @_flash_attn_kernel(%arg0: i32, %arg1: i32, %arg2: i32, %arg3: memref<1x128x8xbf16, #tpu.memory_space<vmem>>, %arg4: memref<1x128x8xbf16, #tpu.memory_space<vmem>>, %arg5: memref<1x128x8xbf16, #tpu.memory_space<vmem>>, %arg6: memref<1x128x8xf32, #tpu.memory_space<vmem>>, %arg7: memref<128x1xf32, #tpu.memory_space<vmem>>, %arg8: memref<128x1xf32, #tpu.memory_space<vmem>>, %arg9: memref<128x8xf32, #tpu.memory_space<vmem>>) attributes {dimension_semantics = [#tpu.dimension_semantics<parallel>, #tpu.dimension_semantics<parallel>, #tpu.dimension_semantics<arbitrary>], iteration_bounds = array<i64: 2, 1, 1>, scalar_prefetch = 0 : i64, scratch_operands = 3 : i64, tpu.core_type = #tpu.core_type<tc>, window_params = [{transform_indices = @transform_0, window_bounds = array<i64: 1, 128, 8>}, {transform_indices = @transform_1, window_bounds = array<i64: 1, 128, 8>}, {transform_indices = @transform_2, window_bounds = array<i64: 1, 128, 8>}, {transform_indices = @transform_3, window_bounds = array<i64: 1, 128, 8>}]} {
    %c0_i32 = arith.constant 0 : i32
    %0 = arith.cmpi eq, %arg2, %c0_i32 : i32
    %1 = arith.extui %0 : i1 to i32
    %c0_i32_0 = arith.constant 0 : i32
    %2 = arith.cmpi ne, %1, %c0_i32_0 : i32
    scf.if %2 {
      %cst_26 = arith.constant -1.000000e+30 : f32
      %36 = vector.broadcast %cst_26 : f32 to vector<128x1xf32>
      %c0_27 = arith.constant 0 : index
      %c0_28 = arith.constant 0 : index
      %37 = vector.load %arg7[%c0_27, %c0_28] : memref<128x1xf32, #tpu.memory_space<vmem>>, vector<128x1xf32>
      tpu.vector_store %arg7[%c0_27, %c0_28], %36 {strides = array<i32>} : memref<128x1xf32, #tpu.memory_space<vmem>>, vector<128x1xf32>,
      %cst_29 = arith.constant 0.000000e+00 : f32
      %38 = vector.broadcast %cst_29 : f32 to vector<128x1xf32>
      %c0_30 = arith.constant 0 : index
      %c0_31 = arith.constant 0 : index
      %39 = vector.load %arg8[%c0_30, %c0_31] : memref<128x1xf32, #tpu.memory_space<vmem>>, vector<128x1xf32>
      tpu.vector_store %arg8[%c0_30, %c0_31], %38 {strides = array<i32>} : memref<128x1xf32, #tpu.memory_space<vmem>>, vector<128x1xf32>,
      %cst_32 = arith.constant 0.000000e+00 : f32
      %40 = vector.broadcast %cst_32 : f32 to vector<128x8xf32>
      %c0_33 = arith.constant 0 : index
      %c0_34 = arith.constant 0 : index
      %41 = vector.load %arg9[%c0_33, %c0_34] : memref<128x8xf32, #tpu.memory_space<vmem>>, vector<128x8xf32>
      tpu.vector_store %arg9[%c0_33, %c0_34], %40 {strides = array<i32>} : memref<128x8xf32, #tpu.memory_space<vmem>>, vector<128x8xf32>,
    } else {
    }
    %c0 = arith.constant 0 : index
    %c0_1 = arith.constant 0 : index
    %c0_2 = arith.constant 0 : index
    %3 = vector.load %arg3[%c0, %c0_1, %c0_2] : memref<1x128x8xbf16, #tpu.memory_space<vmem>>, vector<1x128x8xbf16>
    %4 = vector.shape_cast %3 : vector<1x128x8xbf16> to vector<128x8xbf16>
    %c0_3 = arith.constant 0 : index
    %c0_4 = arith.constant 0 : index
    %c0_5 = arith.constant 0 : index
    %5 = vector.load %arg4[%c0_3, %c0_4, %c0_5] : memref<1x128x8xbf16, #tpu.memory_space<vmem>>, vector<1x128x8xbf16>
    %6 = vector.shape_cast %5 : vector<1x128x8xbf16> to vector<128x8xbf16>
    %c0_6 = arith.constant 0 : index
    %c0_7 = arith.constant 0 : index
    %c0_8 = arith.constant 0 : index
    %7 = vector.load %arg5[%c0_6, %c0_7, %c0_8] : memref<1x128x8xbf16, #tpu.memory_space<vmem>>, vector<1x128x8xbf16>
    %8 = vector.shape_cast %7 : vector<1x128x8xbf16> to vector<128x8xbf16>
    %cst = arith.constant dense<0.000000e+00> : vector<128x128xf32>
    %9 = tpu.matmul %4, %6, %cst {dimension_numbers = #tpu.dot_dimension_numbers<[1], [1], [0], [0], [0, 0, 1, 0], [], []>} : vector<128x8xbf16>, vector<128x8xbf16>, vector<128x128xf32> -> vector<128x128xf32>
    %c0_9 = arith.constant 0 : index
    %c0_10 = arith.constant 0 : index
    %10 = vector.load %arg7[%c0_9, %c0_10] : memref<128x1xf32, #tpu.memory_space<vmem>>, vector<128x1xf32>
    %cst_11 = arith.constant dense<0xFF800000> : vector<128xf32>
    %11 = vector.multi_reduction <maximumf>, %9, %cst_11 [1] : vector<128x128xf32> to vector<128xf32>
    %12 = vector.shape_cast %11 : vector<128xf32> to vector<128x1xf32>
    %13 = arith.maximumf %10, %12 : vector<128x1xf32>
    %14 = arith.subf %10, %13 : vector<128x1xf32>
    %15 = math.exp %14 : vector<128x1xf32>
    %16 = vector.broadcast %13 : vector<128x1xf32> to vector<128x128xf32>
    %17 = arith.subf %9, %16 : vector<128x128xf32>
    %18 = math.exp %17 : vector<128x128xf32>
    %c0_12 = arith.constant 0 : index
    %c0_13 = arith.constant 0 : index
    %19 = vector.load %arg8[%c0_12, %c0_13] : memref<128x1xf32, #tpu.memory_space<vmem>>, vector<128x1xf32>
    %20 = arith.mulf %15, %19 : vector<128x1xf32>
    %cst_14 = arith.constant dense<0.000000e+00> : vector<128xf32>
    %21 = vector.multi_reduction <add>, %18, %cst_14 [1] : vector<128x128xf32> to vector<128xf32>
    %22 = vector.shape_cast %21 : vector<128xf32> to vector<128x1xf32>
    %23 = arith.addf %20, %22 : vector<128x1xf32>
    %c0_15 = arith.constant 0 : index
    %c0_16 = arith.constant 0 : index
    %24 = vector.load %arg8[%c0_15, %c0_16] : memref<128x1xf32, #tpu.memory_space<vmem>>, vector<128x1xf32>
    tpu.vector_store %arg8[%c0_15, %c0_16], %23 {strides = array<i32>} : memref<128x1xf32, #tpu.memory_space<vmem>>, vector<128x1xf32>,
    %c0_17 = arith.constant 0 : index
    %c0_18 = arith.constant 0 : index
    %25 = vector.load %arg9[%c0_17, %c0_18] : memref<128x8xf32, #tpu.memory_space<vmem>>, vector<128x8xf32>
    %26 = vector.broadcast %15 : vector<128x1xf32> to vector<128x8xf32>
    %27 = arith.mulf %26, %25 : vector<128x8xf32>
    %28 = arith.truncf %18 : vector<128x128xf32> to vector<128x128xbf16>
    %cst_19 = arith.constant dense<0.000000e+00> : vector<128x8xf32>
    %29 = tpu.matmul %28, %8, %cst_19 {dimension_numbers = #tpu.dot_dimension_numbers<[1], [0], [0], [1], [0, 0, 1, 1], [], []>} : vector<128x128xbf16>, vector<128x8xbf16>, vector<128x8xf32> -> vector<128x8xf32>
    %30 = arith.addf %27, %29 : vector<128x8xf32>
    %c0_20 = arith.constant 0 : index
    %c0_21 = arith.constant 0 : index
    %31 = vector.load %arg9[%c0_20, %c0_21] : memref<128x8xf32, #tpu.memory_space<vmem>>, vector<128x8xf32>
    tpu.vector_store %arg9[%c0_20, %c0_21], %30 {strides = array<i32>} : memref<128x8xf32, #tpu.memory_space<vmem>>, vector<128x8xf32>,
    %c0_22 = arith.constant 0 : index
    %c0_23 = arith.constant 0 : index
    %32 = vector.load %arg7[%c0_22, %c0_23] : memref<128x1xf32, #tpu.memory_space<vmem>>, vector<128x1xf32>
    tpu.vector_store %arg7[%c0_22, %c0_23], %13 {strides = array<i32>} : memref<128x1xf32, #tpu.memory_space<vmem>>, vector<128x1xf32>,
    %c0_i32_24 = arith.constant 0 : i32
    %33 = arith.cmpi eq, %arg2, %c0_i32_24 : i32
    %34 = arith.extui %33 : i1 to i32
    %c0_i32_25 = arith.constant 0 : i32
    %35 = arith.cmpi ne, %34, %c0_i32_25 : i32
    scf.if %35 {
      %c0_26 = arith.constant 0 : index
      %c0_27 = arith.constant 0 : index
      %36 = vector.load %arg8[%c0_26, %c0_27] : memref<128x1xf32, #tpu.memory_space<vmem>>, vector<128x1xf32>
      %37 = tpu.reciprocal %36 {approx = true} : vector<128x1xf32> -> vector<128x1xf32>
      %c0_28 = arith.constant 0 : index
      %c0_29 = arith.constant 0 : index
      %38 = vector.load %arg9[%c0_28, %c0_29] : memref<128x8xf32, #tpu.memory_space<vmem>>, vector<128x8xf32>
      %39 = vector.broadcast %37 : vector<128x1xf32> to vector<128x8xf32>
      %40 = arith.mulf %38, %39 : vector<128x8xf32>
      %c0_30 = arith.constant 0 : index
      %c0_31 = arith.constant 0 : index
      %c0_32 = arith.constant 0 : index
      %41 = vector.load %arg6[%c0_30, %c0_31, %c0_32] : memref<1x128x8xf32, #tpu.memory_space<vmem>>, vector<1x128x8xf32>
      %42 = vector.shape_cast %41 : vector<1x128x8xf32> to vector<128x8xf32>
      %43 = vector.shape_cast %40 : vector<128x8xf32> to vector<1x128x8xf32>
      tpu.vector_store %arg6[%c0_30, %c0_31, %c0_32], %43 {strides = array<i32>} : memref<1x128x8xf32, #tpu.memory_space<vmem>>, vector<1x128x8xf32>,
    } else {
    }
    return
  }
  func.func @transform_0(%arg0: i32, %arg1: i32, %arg2: i32) -> (i32, i32, i32) {
    %c0_i32 = arith.constant 0 : i32
    %c0_i32_0 = arith.constant 0 : i32
    return %arg0, %arg1, %c0_i32 : i32, i32, i32
  }
  func.func @transform_1(%arg0: i32, %arg1: i32, %arg2: i32) -> (i32, i32, i32) {
    %c0_i32 = arith.constant 0 : i32
    %c0_i32_0 = arith.constant 0 : i32
    return %arg0, %arg2, %c0_i32 : i32, i32, i32
  }
  func.func @transform_2(%arg0: i32, %arg1: i32, %arg2: i32) -> (i32, i32, i32) {
    %c0_i32 = arith.constant 0 : i32
    %c0_i32_0 = arith.constant 0 : i32
    return %arg0, %arg2, %c0_i32 : i32, i32, i32
  }
  func.func @transform_3(%arg0: i32, %arg1: i32, %arg2: i32) -> (i32, i32, i32) {
    %c0_i32 = arith.constant 0 : i32
    %c0_i32_0 = arith.constant 0 : i32
    return %arg0, %arg1, %c0_i32 : i32, i32, i32
  }
}

module attributes {stable_mosaic.version = 11 : i64} {
  func.func @_flash_attn_kernel(%arg0: i32, %arg1: i32, %arg2: i32, %arg3: memref<1x32x32xbf16, #tpu.memory_space<vmem>>, %arg4: memref<1x32x32xbf16, #tpu.memory_space<vmem>>, %arg5: memref<1x32x32xbf16, #tpu.memory_space<vmem>>, %arg6: memref<1x32x32xf32, #tpu.memory_space<vmem>>, %arg7: memref<32x1xf32, #tpu.memory_space<vmem>>, %arg8: memref<32x1xf32, #tpu.memory_space<vmem>>, %arg9: memref<32x32xf32, #tpu.memory_space<vmem>>) attributes {dimension_semantics = [#tpu.dimension_semantics<parallel>, #tpu.dimension_semantics<parallel>, #tpu.dimension_semantics<arbitrary>], iteration_bounds = array<i64: 2, 1, 1>, scalar_prefetch = 0 : i64, scratch_operands = 3 : i64, tpu.core_type = #tpu.core_type<tc>, window_params = [{transform_indices = @transform_0, window_bounds = array<i64: 1, 32, 32>}, {transform_indices = @transform_1, window_bounds = array<i64: 1, 32, 32>}, {transform_indices = @transform_2, window_bounds = array<i64: 1, 32, 32>}, {transform_indices = @transform_3, window_bounds = array<i64: 1, 32, 32>}]} {
    %c0_i32 = arith.constant 0 : i32
    %0 = arith.cmpi eq, %arg2, %c0_i32 : i32
    %1 = arith.extui %0 : i1 to i32
    %c0_i32_0 = arith.constant 0 : i32
    %2 = arith.cmpi ne, %1, %c0_i32_0 : i32
    scf.if %2 {
      %cst_26 = arith.constant -1.000000e+30 : f32
      %36 = vector.broadcast %cst_26 : f32 to vector<32x1xf32>
      %c0_27 = arith.constant 0 : index
      %c0_28 = arith.constant 0 : index
      %37 = vector.load %arg7[%c0_27, %c0_28] : memref<32x1xf32, #tpu.memory_space<vmem>>, vector<32x1xf32>
      tpu.vector_store %arg7[%c0_27, %c0_28], %36 {strides = array<i32>} : memref<32x1xf32, #tpu.memory_space<vmem>>, vector<32x1xf32>,
      %cst_29 = arith.constant 0.000000e+00 : f32
      %38 = vector.broadcast %cst_29 : f32 to vector<32x1xf32>
      %c0_30 = arith.constant 0 : index
      %c0_31 = arith.constant 0 : index
      %39 = vector.load %arg8[%c0_30, %c0_31] : memref<32x1xf32, #tpu.memory_space<vmem>>, vector<32x1xf32>
      tpu.vector_store %arg8[%c0_30, %c0_31], %38 {strides = array<i32>} : memref<32x1xf32, #tpu.memory_space<vmem>>, vector<32x1xf32>,
      %cst_32 = arith.constant 0.000000e+00 : f32
      %40 = vector.broadcast %cst_32 : f32 to vector<32x32xf32>
      %c0_33 = arith.constant 0 : index
      %c0_34 = arith.constant 0 : index
      %41 = vector.load %arg9[%c0_33, %c0_34] : memref<32x32xf32, #tpu.memory_space<vmem>>, vector<32x32xf32>
      tpu.vector_store %arg9[%c0_33, %c0_34], %40 {strides = array<i32>} : memref<32x32xf32, #tpu.memory_space<vmem>>, vector<32x32xf32>,
    } else {
    }
    %c0 = arith.constant 0 : index
    %c0_1 = arith.constant 0 : index
    %c0_2 = arith.constant 0 : index
    %3 = vector.load %arg3[%c0, %c0_1, %c0_2] : memref<1x32x32xbf16, #tpu.memory_space<vmem>>, vector<1x32x32xbf16>
    %4 = vector.shape_cast %3 : vector<1x32x32xbf16> to vector<32x32xbf16>
    %c0_3 = arith.constant 0 : index
    %c0_4 = arith.constant 0 : index
    %c0_5 = arith.constant 0 : index
    %5 = vector.load %arg4[%c0_3, %c0_4, %c0_5] : memref<1x32x32xbf16, #tpu.memory_space<vmem>>, vector<1x32x32xbf16>
    %6 = vector.shape_cast %5 : vector<1x32x32xbf16> to vector<32x32xbf16>
    %c0_6 = arith.constant 0 : index
    %c0_7 = arith.constant 0 : index
    %c0_8 = arith.constant 0 : index
    %7 = vector.load %arg5[%c0_6, %c0_7, %c0_8] : memref<1x32x32xbf16, #tpu.memory_space<vmem>>, vector<1x32x32xbf16>
    %8 = vector.shape_cast %7 : vector<1x32x32xbf16> to vector<32x32xbf16>
    %cst = arith.constant dense<0.000000e+00> : vector<32x32xf32>
    %9 = tpu.matmul %4, %6, %cst {dimension_numbers = #tpu.dot_dimension_numbers<[1], [1], [0], [0], [0, 0, 1, 0], [], []>} : vector<32x32xbf16>, vector<32x32xbf16>, vector<32x32xf32> -> vector<32x32xf32>
    %c0_9 = arith.constant 0 : index
    %c0_10 = arith.constant 0 : index
    %10 = vector.load %arg7[%c0_9, %c0_10] : memref<32x1xf32, #tpu.memory_space<vmem>>, vector<32x1xf32>
    %cst_11 = arith.constant dense<0xFF800000> : vector<32xf32>
    %11 = vector.multi_reduction <maximumf>, %9, %cst_11 [1] : vector<32x32xf32> to vector<32xf32>
    %12 = vector.shape_cast %11 : vector<32xf32> to vector<32x1xf32>
    %13 = arith.maximumf %10, %12 : vector<32x1xf32>
    %14 = arith.subf %10, %13 : vector<32x1xf32>
    %15 = math.exp %14 : vector<32x1xf32>
    %16 = vector.broadcast %13 : vector<32x1xf32> to vector<32x32xf32>
    %17 = arith.subf %9, %16 : vector<32x32xf32>
    %18 = math.exp %17 : vector<32x32xf32>
    %c0_12 = arith.constant 0 : index
    %c0_13 = arith.constant 0 : index
    %19 = vector.load %arg8[%c0_12, %c0_13] : memref<32x1xf32, #tpu.memory_space<vmem>>, vector<32x1xf32>
    %20 = arith.mulf %15, %19 : vector<32x1xf32>
    %cst_14 = arith.constant dense<0.000000e+00> : vector<32xf32>
    %21 = vector.multi_reduction <add>, %18, %cst_14 [1] : vector<32x32xf32> to vector<32xf32>
    %22 = vector.shape_cast %21 : vector<32xf32> to vector<32x1xf32>
    %23 = arith.addf %20, %22 : vector<32x1xf32>
    %c0_15 = arith.constant 0 : index
    %c0_16 = arith.constant 0 : index
    %24 = vector.load %arg8[%c0_15, %c0_16] : memref<32x1xf32, #tpu.memory_space<vmem>>, vector<32x1xf32>
    tpu.vector_store %arg8[%c0_15, %c0_16], %23 {strides = array<i32>} : memref<32x1xf32, #tpu.memory_space<vmem>>, vector<32x1xf32>,
    %c0_17 = arith.constant 0 : index
    %c0_18 = arith.constant 0 : index
    %25 = vector.load %arg9[%c0_17, %c0_18] : memref<32x32xf32, #tpu.memory_space<vmem>>, vector<32x32xf32>
    %26 = vector.broadcast %15 : vector<32x1xf32> to vector<32x32xf32>
    %27 = arith.mulf %26, %25 : vector<32x32xf32>
    %28 = arith.truncf %18 : vector<32x32xf32> to vector<32x32xbf16>
    %cst_19 = arith.constant dense<0.000000e+00> : vector<32x32xf32>
    %29 = tpu.matmul %28, %8, %cst_19 {dimension_numbers = #tpu.dot_dimension_numbers<[1], [0], [0], [1], [0, 0, 1, 1], [], []>} : vector<32x32xbf16>, vector<32x32xbf16>, vector<32x32xf32> -> vector<32x32xf32>
    %30 = arith.addf %27, %29 : vector<32x32xf32>
    %c0_20 = arith.constant 0 : index
    %c0_21 = arith.constant 0 : index
    %31 = vector.load %arg9[%c0_20, %c0_21] : memref<32x32xf32, #tpu.memory_space<vmem>>, vector<32x32xf32>
    tpu.vector_store %arg9[%c0_20, %c0_21], %30 {strides = array<i32>} : memref<32x32xf32, #tpu.memory_space<vmem>>, vector<32x32xf32>,
    %c0_22 = arith.constant 0 : index
    %c0_23 = arith.constant 0 : index
    %32 = vector.load %arg7[%c0_22, %c0_23] : memref<32x1xf32, #tpu.memory_space<vmem>>, vector<32x1xf32>
    tpu.vector_store %arg7[%c0_22, %c0_23], %13 {strides = array<i32>} : memref<32x1xf32, #tpu.memory_space<vmem>>, vector<32x1xf32>,
    %c0_i32_24 = arith.constant 0 : i32
    %33 = arith.cmpi eq, %arg2, %c0_i32_24 : i32
    %34 = arith.extui %33 : i1 to i32
    %c0_i32_25 = arith.constant 0 : i32
    %35 = arith.cmpi ne, %34, %c0_i32_25 : i32
    scf.if %35 {
      %c0_26 = arith.constant 0 : index
      %c0_27 = arith.constant 0 : index
      %36 = vector.load %arg8[%c0_26, %c0_27] : memref<32x1xf32, #tpu.memory_space<vmem>>, vector<32x1xf32>
      %37 = tpu.reciprocal %36 {approx = true} : vector<32x1xf32> -> vector<32x1xf32>
      %c0_28 = arith.constant 0 : index
      %c0_29 = arith.constant 0 : index
      %38 = vector.load %arg9[%c0_28, %c0_29] : memref<32x32xf32, #tpu.memory_space<vmem>>, vector<32x32xf32>
      %39 = vector.broadcast %37 : vector<32x1xf32> to vector<32x32xf32>
      %40 = arith.mulf %38, %39 : vector<32x32xf32>
      %c0_30 = arith.constant 0 : index
      %c0_31 = arith.constant 0 : index
      %c0_32 = arith.constant 0 : index
      %41 = vector.load %arg6[%c0_30, %c0_31, %c0_32] : memref<1x32x32xf32, #tpu.memory_space<vmem>>, vector<1x32x32xf32>
      %42 = vector.shape_cast %41 : vector<1x32x32xf32> to vector<32x32xf32>
      %43 = vector.shape_cast %40 : vector<32x32xf32> to vector<1x32x32xf32>
      tpu.vector_store %arg6[%c0_30, %c0_31, %c0_32], %43 {strides = array<i32>} : memref<1x32x32xf32, #tpu.memory_space<vmem>>, vector<1x32x32xf32>,
    } else {
    }
    return
  }
  func.func @transform_0(%arg0: i32, %arg1: i32, %arg2: i32) -> (i32, i32, i32) {
    %c0_i32 = arith.constant 0 : i32
    %c0_i32_0 = arith.constant 0 : i32
    return %arg0, %arg1, %c0_i32 : i32, i32, i32
  }
  func.func @transform_1(%arg0: i32, %arg1: i32, %arg2: i32) -> (i32, i32, i32) {
    %c0_i32 = arith.constant 0 : i32
    %c0_i32_0 = arith.constant 0 : i32
    return %arg0, %arg2, %c0_i32 : i32, i32, i32
  }
  func.func @transform_2(%arg0: i32, %arg1: i32, %arg2: i32) -> (i32, i32, i32) {
    %c0_i32 = arith.constant 0 : i32
    %c0_i32_0 = arith.constant 0 : i32
    return %arg0, %arg2, %c0_i32 : i32, i32, i32
  }
  func.func @transform_3(%arg0: i32, %arg1: i32, %arg2: i32) -> (i32, i32, i32) {
    %c0_i32 = arith.constant 0 : i32
    %c0_i32_0 = arith.constant 0 : i32
    return %arg0, %arg1, %c0_i32 : i32, i32, i32
  }
}

module attributes {stable_mosaic.version = 11 : i64} {
  func.func @_conv3x3_leaky_kernel(%arg0: i32, %arg1: i32, %arg2: memref<1x1x18x18x4xf32, #tpu.memory_space<vmem>>, %arg3: memref<9x4x128xf32, #tpu.memory_space<vmem>>, %arg4: memref<1x128xf32, #tpu.memory_space<vmem>>, %arg5: memref<1x16x16x128xf32, #tpu.memory_space<vmem>>) attributes {dimension_semantics = [#tpu.dimension_semantics<parallel>, #tpu.dimension_semantics<parallel>], iteration_bounds = array<i64: 4, 1>, scalar_prefetch = 0 : i64, scratch_operands = 0 : i64, tpu.core_type = #tpu.core_type<tc>, window_params = [{transform_indices = @transform_0, window_bounds = array<i64: 1, 1, 18, 18, 4>}, {pipeline_mode = #tpu.pipeline_mode<synchronous>, transform_indices = @transform_1, window_bounds = array<i64: 9, 4, 128>}, {pipeline_mode = #tpu.pipeline_mode<synchronous>, transform_indices = @transform_2, window_bounds = array<i64: 1, 128>}, {transform_indices = @transform_3, window_bounds = array<i64: 1, 16, 16, 128>}]} {
    %cst = arith.constant 0.000000e+00 : f32
    %0 = vector.broadcast %cst : f32 to vector<256x128xf32>
    %c0 = arith.constant 0 : index
    %c0_0 = arith.constant 0 : index
    %c0_1 = arith.constant 0 : index
    %c0_2 = arith.constant 0 : index
    %c0_3 = arith.constant 0 : index
    %1 = vector.load %arg2[%c0, %c0_0, %c0_1, %c0_2, %c0_3] : memref<1x1x18x18x4xf32, #tpu.memory_space<vmem>>, vector<1x1x16x16x4xf32>
    %2 = vector.shape_cast %1 : vector<1x1x16x16x4xf32> to vector<16x16x4xf32>
    %3 = vector.shape_cast %2 : vector<16x16x4xf32> to vector<256x4xf32>
    %c0_4 = arith.constant 0 : index
    %c0_5 = arith.constant 0 : index
    %c0_6 = arith.constant 0 : index
    %4 = vector.load %arg3[%c0_4, %c0_5, %c0_6] : memref<9x4x128xf32, #tpu.memory_space<vmem>>, vector<1x4x128xf32>
    %5 = vector.shape_cast %4 : vector<1x4x128xf32> to vector<4x128xf32>
    %cst_7 = arith.constant dense<0.000000e+00> : vector<256x128xf32>
    %6 = tpu.matmul %3, %5, %cst_7 {dimension_numbers = #tpu.dot_dimension_numbers<[1], [0], [0], [1], [0, 0, 1, 1], [], []>} : vector<256x4xf32>, vector<4x128xf32>, vector<256x128xf32> -> vector<256x128xf32>
    %7 = arith.addf %0, %6 : vector<256x128xf32>
    %c0_8 = arith.constant 0 : index
    %c0_9 = arith.constant 0 : index
    %c0_10 = arith.constant 0 : index
    %c1 = arith.constant 1 : index
    %c0_11 = arith.constant 0 : index
    %8 = vector.load %arg2[%c0_8, %c0_9, %c0_10, %c1, %c0_11] : memref<1x1x18x18x4xf32, #tpu.memory_space<vmem>>, vector<1x1x16x16x4xf32>
    %9 = vector.shape_cast %8 : vector<1x1x16x16x4xf32> to vector<16x16x4xf32>
    %10 = vector.shape_cast %9 : vector<16x16x4xf32> to vector<256x4xf32>
    %c1_12 = arith.constant 1 : index
    %c0_13 = arith.constant 0 : index
    %c0_14 = arith.constant 0 : index
    %11 = vector.load %arg3[%c1_12, %c0_13, %c0_14] : memref<9x4x128xf32, #tpu.memory_space<vmem>>, vector<1x4x128xf32>
    %12 = vector.shape_cast %11 : vector<1x4x128xf32> to vector<4x128xf32>
    %cst_15 = arith.constant dense<0.000000e+00> : vector<256x128xf32>
    %13 = tpu.matmul %10, %12, %cst_15 {dimension_numbers = #tpu.dot_dimension_numbers<[1], [0], [0], [1], [0, 0, 1, 1], [], []>} : vector<256x4xf32>, vector<4x128xf32>, vector<256x128xf32> -> vector<256x128xf32>
    %14 = arith.addf %7, %13 : vector<256x128xf32>
    %c0_16 = arith.constant 0 : index
    %c0_17 = arith.constant 0 : index
    %c0_18 = arith.constant 0 : index
    %c2 = arith.constant 2 : index
    %c0_19 = arith.constant 0 : index
    %15 = vector.load %arg2[%c0_16, %c0_17, %c0_18, %c2, %c0_19] : memref<1x1x18x18x4xf32, #tpu.memory_space<vmem>>, vector<1x1x16x16x4xf32>
    %16 = vector.shape_cast %15 : vector<1x1x16x16x4xf32> to vector<16x16x4xf32>
    %17 = vector.shape_cast %16 : vector<16x16x4xf32> to vector<256x4xf32>
    %c2_20 = arith.constant 2 : index
    %c0_21 = arith.constant 0 : index
    %c0_22 = arith.constant 0 : index
    %18 = vector.load %arg3[%c2_20, %c0_21, %c0_22] : memref<9x4x128xf32, #tpu.memory_space<vmem>>, vector<1x4x128xf32>
    %19 = vector.shape_cast %18 : vector<1x4x128xf32> to vector<4x128xf32>
    %cst_23 = arith.constant dense<0.000000e+00> : vector<256x128xf32>
    %20 = tpu.matmul %17, %19, %cst_23 {dimension_numbers = #tpu.dot_dimension_numbers<[1], [0], [0], [1], [0, 0, 1, 1], [], []>} : vector<256x4xf32>, vector<4x128xf32>, vector<256x128xf32> -> vector<256x128xf32>
    %21 = arith.addf %14, %20 : vector<256x128xf32>
    %c0_24 = arith.constant 0 : index
    %c0_25 = arith.constant 0 : index
    %c1_26 = arith.constant 1 : index
    %c0_27 = arith.constant 0 : index
    %c0_28 = arith.constant 0 : index
    %22 = vector.load %arg2[%c0_24, %c0_25, %c1_26, %c0_27, %c0_28] : memref<1x1x18x18x4xf32, #tpu.memory_space<vmem>>, vector<1x1x16x16x4xf32>
    %23 = vector.shape_cast %22 : vector<1x1x16x16x4xf32> to vector<16x16x4xf32>
    %24 = vector.shape_cast %23 : vector<16x16x4xf32> to vector<256x4xf32>
    %c3 = arith.constant 3 : index
    %c0_29 = arith.constant 0 : index
    %c0_30 = arith.constant 0 : index
    %25 = vector.load %arg3[%c3, %c0_29, %c0_30] : memref<9x4x128xf32, #tpu.memory_space<vmem>>, vector<1x4x128xf32>
    %26 = vector.shape_cast %25 : vector<1x4x128xf32> to vector<4x128xf32>
    %cst_31 = arith.constant dense<0.000000e+00> : vector<256x128xf32>
    %27 = tpu.matmul %24, %26, %cst_31 {dimension_numbers = #tpu.dot_dimension_numbers<[1], [0], [0], [1], [0, 0, 1, 1], [], []>} : vector<256x4xf32>, vector<4x128xf32>, vector<256x128xf32> -> vector<256x128xf32>
    %28 = arith.addf %21, %27 : vector<256x128xf32>
    %c0_32 = arith.constant 0 : index
    %c0_33 = arith.constant 0 : index
    %c1_34 = arith.constant 1 : index
    %c1_35 = arith.constant 1 : index
    %c0_36 = arith.constant 0 : index
    %29 = vector.load %arg2[%c0_32, %c0_33, %c1_34, %c1_35, %c0_36] : memref<1x1x18x18x4xf32, #tpu.memory_space<vmem>>, vector<1x1x16x16x4xf32>
    %30 = vector.shape_cast %29 : vector<1x1x16x16x4xf32> to vector<16x16x4xf32>
    %31 = vector.shape_cast %30 : vector<16x16x4xf32> to vector<256x4xf32>
    %c4 = arith.constant 4 : index
    %c0_37 = arith.constant 0 : index
    %c0_38 = arith.constant 0 : index
    %32 = vector.load %arg3[%c4, %c0_37, %c0_38] : memref<9x4x128xf32, #tpu.memory_space<vmem>>, vector<1x4x128xf32>
    %33 = vector.shape_cast %32 : vector<1x4x128xf32> to vector<4x128xf32>
    %cst_39 = arith.constant dense<0.000000e+00> : vector<256x128xf32>
    %34 = tpu.matmul %31, %33, %cst_39 {dimension_numbers = #tpu.dot_dimension_numbers<[1], [0], [0], [1], [0, 0, 1, 1], [], []>} : vector<256x4xf32>, vector<4x128xf32>, vector<256x128xf32> -> vector<256x128xf32>
    %35 = arith.addf %28, %34 : vector<256x128xf32>
    %c0_40 = arith.constant 0 : index
    %c0_41 = arith.constant 0 : index
    %c1_42 = arith.constant 1 : index
    %c2_43 = arith.constant 2 : index
    %c0_44 = arith.constant 0 : index
    %36 = vector.load %arg2[%c0_40, %c0_41, %c1_42, %c2_43, %c0_44] : memref<1x1x18x18x4xf32, #tpu.memory_space<vmem>>, vector<1x1x16x16x4xf32>
    %37 = vector.shape_cast %36 : vector<1x1x16x16x4xf32> to vector<16x16x4xf32>
    %38 = vector.shape_cast %37 : vector<16x16x4xf32> to vector<256x4xf32>
    %c5 = arith.constant 5 : index
    %c0_45 = arith.constant 0 : index
    %c0_46 = arith.constant 0 : index
    %39 = vector.load %arg3[%c5, %c0_45, %c0_46] : memref<9x4x128xf32, #tpu.memory_space<vmem>>, vector<1x4x128xf32>
    %40 = vector.shape_cast %39 : vector<1x4x128xf32> to vector<4x128xf32>
    %cst_47 = arith.constant dense<0.000000e+00> : vector<256x128xf32>
    %41 = tpu.matmul %38, %40, %cst_47 {dimension_numbers = #tpu.dot_dimension_numbers<[1], [0], [0], [1], [0, 0, 1, 1], [], []>} : vector<256x4xf32>, vector<4x128xf32>, vector<256x128xf32> -> vector<256x128xf32>
    %42 = arith.addf %35, %41 : vector<256x128xf32>
    %c0_48 = arith.constant 0 : index
    %c0_49 = arith.constant 0 : index
    %c2_50 = arith.constant 2 : index
    %c0_51 = arith.constant 0 : index
    %c0_52 = arith.constant 0 : index
    %43 = vector.load %arg2[%c0_48, %c0_49, %c2_50, %c0_51, %c0_52] : memref<1x1x18x18x4xf32, #tpu.memory_space<vmem>>, vector<1x1x16x16x4xf32>
    %44 = vector.shape_cast %43 : vector<1x1x16x16x4xf32> to vector<16x16x4xf32>
    %45 = vector.shape_cast %44 : vector<16x16x4xf32> to vector<256x4xf32>
    %c6 = arith.constant 6 : index
    %c0_53 = arith.constant 0 : index
    %c0_54 = arith.constant 0 : index
    %46 = vector.load %arg3[%c6, %c0_53, %c0_54] : memref<9x4x128xf32, #tpu.memory_space<vmem>>, vector<1x4x128xf32>
    %47 = vector.shape_cast %46 : vector<1x4x128xf32> to vector<4x128xf32>
    %cst_55 = arith.constant dense<0.000000e+00> : vector<256x128xf32>
    %48 = tpu.matmul %45, %47, %cst_55 {dimension_numbers = #tpu.dot_dimension_numbers<[1], [0], [0], [1], [0, 0, 1, 1], [], []>} : vector<256x4xf32>, vector<4x128xf32>, vector<256x128xf32> -> vector<256x128xf32>
    %49 = arith.addf %42, %48 : vector<256x128xf32>
    %c0_56 = arith.constant 0 : index
    %c0_57 = arith.constant 0 : index
    %c2_58 = arith.constant 2 : index
    %c1_59 = arith.constant 1 : index
    %c0_60 = arith.constant 0 : index
    %50 = vector.load %arg2[%c0_56, %c0_57, %c2_58, %c1_59, %c0_60] : memref<1x1x18x18x4xf32, #tpu.memory_space<vmem>>, vector<1x1x16x16x4xf32>
    %51 = vector.shape_cast %50 : vector<1x1x16x16x4xf32> to vector<16x16x4xf32>
    %52 = vector.shape_cast %51 : vector<16x16x4xf32> to vector<256x4xf32>
    %c7 = arith.constant 7 : index
    %c0_61 = arith.constant 0 : index
    %c0_62 = arith.constant 0 : index
    %53 = vector.load %arg3[%c7, %c0_61, %c0_62] : memref<9x4x128xf32, #tpu.memory_space<vmem>>, vector<1x4x128xf32>
    %54 = vector.shape_cast %53 : vector<1x4x128xf32> to vector<4x128xf32>
    %cst_63 = arith.constant dense<0.000000e+00> : vector<256x128xf32>
    %55 = tpu.matmul %52, %54, %cst_63 {dimension_numbers = #tpu.dot_dimension_numbers<[1], [0], [0], [1], [0, 0, 1, 1], [], []>} : vector<256x4xf32>, vector<4x128xf32>, vector<256x128xf32> -> vector<256x128xf32>
    %56 = arith.addf %49, %55 : vector<256x128xf32>
    %c0_64 = arith.constant 0 : index
    %c0_65 = arith.constant 0 : index
    %c2_66 = arith.constant 2 : index
    %c2_67 = arith.constant 2 : index
    %c0_68 = arith.constant 0 : index
    %57 = vector.load %arg2[%c0_64, %c0_65, %c2_66, %c2_67, %c0_68] : memref<1x1x18x18x4xf32, #tpu.memory_space<vmem>>, vector<1x1x16x16x4xf32>
    %58 = vector.shape_cast %57 : vector<1x1x16x16x4xf32> to vector<16x16x4xf32>
    %59 = vector.shape_cast %58 : vector<16x16x4xf32> to vector<256x4xf32>
    %c8 = arith.constant 8 : index
    %c0_69 = arith.constant 0 : index
    %c0_70 = arith.constant 0 : index
    %60 = vector.load %arg3[%c8, %c0_69, %c0_70] : memref<9x4x128xf32, #tpu.memory_space<vmem>>, vector<1x4x128xf32>
    %61 = vector.shape_cast %60 : vector<1x4x128xf32> to vector<4x128xf32>
    %cst_71 = arith.constant dense<0.000000e+00> : vector<256x128xf32>
    %62 = tpu.matmul %59, %61, %cst_71 {dimension_numbers = #tpu.dot_dimension_numbers<[1], [0], [0], [1], [0, 0, 1, 1], [], []>} : vector<256x4xf32>, vector<4x128xf32>, vector<256x128xf32> -> vector<256x128xf32>
    %63 = arith.addf %56, %62 : vector<256x128xf32>
    %c0_72 = arith.constant 0 : index
    %c0_73 = arith.constant 0 : index
    %64 = vector.load %arg4[%c0_72, %c0_73] : memref<1x128xf32, #tpu.memory_space<vmem>>, vector<1x128xf32>
    %65 = vector.broadcast %64 : vector<1x128xf32> to vector<256x128xf32>
    %66 = arith.addf %63, %65 : vector<256x128xf32>
    %cst_74 = arith.constant 0.000000e+00 : f32
    %67 = vector.broadcast %cst_74 : f32 to vector<256x128xf32>
    %68 = arith.cmpf oge, %66, %67 : vector<256x128xf32>
    %cst_75 = arith.constant 2.000000e-01 : f32
    %69 = vector.broadcast %cst_75 : f32 to vector<256x128xf32>
    %70 = arith.mulf %69, %66 : vector<256x128xf32>
    %71 = arith.select %68, %66, %70 : vector<256x128xi1>, vector<256x128xf32>
    %72 = vector.shape_cast %71 : vector<256x128xf32> to vector<16x16x128xf32>
    %c0_76 = arith.constant 0 : index
    %c0_77 = arith.constant 0 : index
    %c0_78 = arith.constant 0 : index
    %c0_79 = arith.constant 0 : index
    %73 = vector.load %arg5[%c0_76, %c0_77, %c0_78, %c0_79] : memref<1x16x16x128xf32, #tpu.memory_space<vmem>>, vector<1x16x16x128xf32>
    %74 = vector.shape_cast %73 : vector<1x16x16x128xf32> to vector<16x16x128xf32>
    %75 = vector.shape_cast %72 : vector<16x16x128xf32> to vector<1x16x16x128xf32>
    tpu.vector_store %arg5[%c0_76, %c0_77, %c0_78, %c0_79], %75 {strides = array<i32>} : memref<1x16x16x128xf32, #tpu.memory_space<vmem>>, vector<1x16x16x128xf32>,
    return
  }
  func.func @transform_0(%arg0: i32, %arg1: i32) -> (i32, i32, i32, i32, i32) {
    %c0_i32 = arith.constant 0 : i32
    %c0_i32_0 = arith.constant 0 : i32
    %c0_i32_1 = arith.constant 0 : i32
    %c0_i32_2 = arith.constant 0 : i32
    return %arg0, %arg1, %c0_i32, %c0_i32_0, %c0_i32_1 : i32, i32, i32, i32, i32
  }
  func.func @transform_1(%arg0: i32, %arg1: i32) -> (i32, i32, i32) {
    %c0_i32 = arith.constant 0 : i32
    %c0_i32_0 = arith.constant 0 : i32
    %c0_i32_1 = arith.constant 0 : i32
    %c0_i32_2 = arith.constant 0 : i32
    return %c0_i32, %c0_i32_0, %c0_i32_1 : i32, i32, i32
  }
  func.func @transform_2(%arg0: i32, %arg1: i32) -> (i32, i32) {
    %c0_i32 = arith.constant 0 : i32
    %c0_i32_0 = arith.constant 0 : i32
    %c0_i32_1 = arith.constant 0 : i32
    return %c0_i32, %c0_i32_0 : i32, i32
  }
  func.func @transform_3(%arg0: i32, %arg1: i32) -> (i32, i32, i32, i32) {
    %c0_i32 = arith.constant 0 : i32
    %c0_i32_0 = arith.constant 0 : i32
    %c0_i32_1 = arith.constant 0 : i32
    return %arg0, %arg1, %c0_i32, %c0_i32_0 : i32, i32, i32, i32
  }
}

</mosaic_0001>

<bundles_post_ra>
// kernel: mul.9
= control target key start
LH: loop header
LB: loop body
LE: loop exit
PB: predicated region body
PF: predicated region fallthrough
CT: control target
= control target key end

     0   :  { %s34_s0 = inlined_call_operand.vmem [shape: f32[4], index: 0, kind: input, shape index: {}]   ;;  %s35_s1 = inlined_call_operand.vmem [shape: f32[4], index: 1, kind: input, shape index: {}]   ;;  %s36_s2 = inlined_call_operand.vmem [shape: f32[4], index: 2, kind: output, shape index: {}]  }
   0x1   :  { %v3_v0 = vld [vmem:[%s34_s0] sm:$0x1] }
   0x2   :  { %v4_v1 = vld [vmem:[%s35_s1] sm:$0x1] }
   0x3   :  { %v7_v2 = vmul.f32 %v4_v1, %v3_v0 }
   0x5   :  { %9 = vst [vmem:[%s36_s2] sm:$0x1] %v7_v2 }

// kernel: _lambda_.4
= control target key start
LH: loop header
LB: loop body
LE: loop exit
PB: predicated region body
PF: predicated region fallthrough
CT: control target
= control target key end

     0   :  { %s1549_s12 = smov 0   ;;  %s1841_s0 = inlined_call_operand.vmem [shape: bf16[1024,4], index: 0, kind: input, shape index: {}]   ;;  %s1842_s1 = inlined_call_operand.vmem [shape: bf16[4,12], index: 1, kind: input, shape index: {}]   ;;  %s1843_s2 = inlined_call_operand.vmem [shape: f32[1,12], index: 2, kind: input, shape index: {}]   ;;  %s1844_s3 = inlined_call_operand.vmem [shape: bf16[1024,12], index: 3, kind: output, shape index: {}]  }
   0x1 LB: > { %s1174_s13 = sadd.s32 4294967295, %s1527_s12   ;;  %p1178_p0 = scmp.ge.s32.totalorder %s1527_s12, 1  ;;  %s1527_s12 = sphi %s1549_s12, %s13_s12  }
   0x2   : > { %p138_p1 = scmp.lt.s32.totalorder %s1527_s12, 3 }
   0x4   : > { %p139_p2 = pnand %p1178_p0, %p138_p1 }
   0x5   : > { %v239_v0 = vld [vmem:[%s1842_s1] sm:$0x3] (!%p139_p2)  ;;  %vm504_vm0 = vcmask (!%p139_p2), 1041408   ;;  %s1179_s16 = sshll.u32 (!%p139_p2), %s1174_s13, 6  ;;  %vm407_vm1 = vcmask (!%p139_p2), 31744   ;;  %vm1053_vm2 = vcmask (!%p139_p2), 93184  }
   0x6   : > { %142 = sbr.rel (%p139_p2) target bundleno = 295 (0x127), region = 32  ;;  %1479 = vmatprep.subr.msk.bf16.mxu0 (!%p139_p2), %vm504_vm0, %v239_v0  ;;  %1480 = vmatprep.subr.msk.bf16.mxu1 (!%p139_p2), %vm504_vm0, %v239_v0  ;;  %v506_v1 = vsel (!%p139_p2), %vm504_vm0, %v239_v0, 0  ;;  %p163_p3 = scmp.lt.s32.totalorder (!%p139_p2), %s1179_s16, 127  ;;  %v1637_v34 = vld [vmem:[%s1843_s2] ss:$0 sm:$0xff] (!%p139_p2) }
   0x7   : > { %1412 = vmatpush3.bf16.msra.mxu0 (!%p139_p2), %v506_v1  ;;  %1478 = vmatpush3.bf16.msra.mxu1 (!%p139_p2), %v506_v1 }
   0xd   : > { %s1846_s16 = smov (!%p163_p3, %s1179_s16), 127 }
   0xe   : > { %s1180_s17 = sshll.u32 %s1846_s16, 2 }
   0xf   : > { %s1568_s20 = scalar_lea.vmem %s1841_s0, %s1180_s17  ;;  %s1645_s25 = scalar_lea.vmem %s1844_s3, %s1180_s17 }
  0x10   : > { %v1489_v2 = vld [vmem:[%s1568_s20] sm:$0xff]   ;;  %v1491_v4 = vld [vmem:[%s1568_s20 + $0x8] sm:$0xff]   ;;  %v1493_v6 = vld [vmem:[%s1568_s20 + $0x10] sm:$0xff]  }
  0x11   : > { %v1490_v3 = vld [vmem:[%s1568_s20 + $0x80] sm:$0xff]   ;;  %1413 = vmatprep.mubr.msk.bf16.mxu0 %vm407_vm1, %v1489_v2  ;;  %v1492_v5 = vld [vmem:[%s1568_s20 + $0x88] sm:$0xff]   ;;  %v1494_v7 = vld [vmem:[%s1568_s20 + $0x90] sm:$0xff]  }
  0x12   : > { %1445 = vmatprep.mubr.msk.bf16.mxu1 %vm407_vm1, %v1490_v3  ;;  %1414 = vmatmul.mubr.msk.bf16.vlgmr.msra.gmra.mrb[0].mxu0 %vm407_vm1, %v1491_v4  ;;  %v1495_v8 = vld [vmem:[%s1568_s20 + $0x18] sm:$0xff]   ;;  %v1497_v10 = vld [vmem:[%s1568_s20 + $0x20] sm:$0xff]   ;;  %v1499_v12 = vld [vmem:[%s1568_s20 + $0x28] sm:$0xff]  }
  0x13   : > { %1446 = vmatmul.mubr.msk.bf16.vlgmr.msra.gmra.mrb[0].mxu1 %vm407_vm1, %v1492_v5  ;;  %1417 = vmatprep.mubr.msk.bf16.mxu0 %vm407_vm1, %v1493_v6  ;;  %v1496_v9 = vld [vmem:[%s1568_s20 + $0x98] sm:$0xff]   ;;  %v1498_v11 = vld [vmem:[%s1568_s20 + $0xa0] sm:$0xff]   ;;  %v1500_v13 = vld [vmem:[%s1568_s20 + $0xa8] sm:$0xff]  }
  0x14   : > { %1449 = vmatprep.mubr.msk.bf16.mxu1 %vm407_vm1, %v1494_v7  ;;  %v1501_v14 = vld [vmem:[%s1568_s20 + $0x30] sm:$0xff]   ;;  %v1503_v16 = vld [vmem:[%s1568_s20 + $0x38] sm:$0xff]   ;;  %v1505_v18 = vld [vmem:[%s1568_s20 + $0x40] sm:$0xff]  }
  0x15   : > { %v1502_v15 = vld [vmem:[%s1568_s20 + $0xb0] sm:$0xff]   ;;  %v1504_v17 = vld [vmem:[%s1568_s20 + $0xb8] sm:$0xff]   ;;  %v1506_v19 = vld [vmem:[%s1568_s20 + $0xc0] sm:$0xff]  }
  0x16   : > { %v1507_v20 = vld [vmem:[%s1568_s20 + $0x48] sm:$0xff]   ;;  %v1509_v22 = vld [vmem:[%s1568_s20 + $0x50] sm:$0xff]   ;;  %v1511_v24 = vld [vmem:[%s1568_s20 + $0x58] sm:$0xff]  }
  0x17   : > { %v1508_v21 = vld [vmem:[%s1568_s20 + $0xc8] sm:$0xff]   ;;  %v1510_v23 = vld [vmem:[%s1568_s20 + $0xd0] sm:$0xff]   ;;  %v1512_v25 = vld [vmem:[%s1568_s20 + $0xd8] sm:$0xff]  }
  0x18   : > { %v1513_v26 = vld [vmem:[%s1568_s20 + $0x60] sm:$0xff]   ;;  %v1515_v28 = vld [vmem:[%s1568_s20 + $0x68] sm:$0xff]   ;;  %v1517_v30 = vld [vmem:[%s1568_s20 + $0x70] sm:$0xff]  }
  0x19   : > { %v1514_v27 = vld [vmem:[%s1568_s20 + $0xe0] sm:$0xff]   ;;  %v1516_v29 = vld [vmem:[%s1568_s20 + $0xe8] sm:$0xff]   ;;  %v1518_v31 = vld [vmem:[%s1568_s20 + $0xf0] sm:$0xff]  }
  0x1a   : > { %1418 = vmatmul.mubr.msk.bf16.gmra.mrb[4].mxu0 %vm407_vm1, %v1495_v8  ;;  %v1519_v32 = vld [vmem:[%s1568_s20 + $0x78] sm:$0xff]  }
  0x1b   : > { %1450 = vmatmul.mubr.msk.bf16.gmra.mrb[4].mxu1 %vm407_vm1, %v1496_v9  ;;  %1421 = vmatprep.mubr.msk.bf16.mxu0 %vm407_vm1, %v1497_v10  ;;  %v1520_v33 = vld [vmem:[%s1568_s20 + $0xf8] sm:$0xff]  }
  0x1c   : > { %1453 = vmatprep.mubr.msk.bf16.mxu1 %vm407_vm1, %v1498_v11 }
  0x22   : > { %1422 = vmatmul.mubr.msk.bf16.gmra.mrb[8].mxu0 %vm407_vm1, %v1499_v12 }
  0x23   : > { %1454 = vmatmul.mubr.msk.bf16.gmra.mrb[8].mxu1 %vm407_vm1, %v1500_v13  ;;  %1425 = vmatprep.mubr.msk.bf16.mxu0 %vm407_vm1, %v1501_v14 }
  0x24   : > { %1457 = vmatprep.mubr.msk.bf16.mxu1 %vm407_vm1, %v1502_v15 }
  0x2a   : > { %1426 = vmatmul.mubr.msk.bf16.gmra.mrb[12].mxu0 %vm407_vm1, %v1503_v16 }
  0x2b   : > { %1458 = vmatmul.mubr.msk.bf16.gmra.mrb[12].mxu1 %vm407_vm1, %v1504_v17  ;;  %1429 = vmatprep.mubr.msk.bf16.mxu0 %vm407_vm1, %v1505_v18 }
  0x2c   : > { %1461 = vmatprep.mubr.msk.bf16.mxu1 %vm407_vm1, %v1506_v19 }
  0x32   : > { %1430 = vmatmul.mubr.msk.bf16.gmra.mrb[16].mxu0 %vm407_vm1, %v1507_v20 }
  0x33   : > { %1462 = vmatmul.mubr.msk.bf16.gmra.mrb[16].mxu1 %vm407_vm1, %v1508_v21  ;;  %1433 = vmatprep.mubr.msk.bf16.mxu0 %vm407_vm1, %v1509_v22 }
  0x34   : > { %1465 = vmatprep.mubr.msk.bf16.mxu1 %vm407_vm1, %v1510_v23 }
  0x3a   : > { %1434 = vmatmul.mubr.msk.bf16.gmra.mrb[20].mxu0 %vm407_vm1, %v1511_v24 }
  0x3b   : > { %1466 = vmatmul.mubr.msk.bf16.gmra.mrb[20].mxu1 %vm407_vm1, %v1512_v25  ;;  %1437 = vmatprep.mubr.msk.bf16.mxu0 %vm407_vm1, %v1513_v26 }
  0x3c   : > { %1469 = vmatprep.mubr.msk.bf16.mxu1 %vm407_vm1, %v1514_v27 }
  0x42   : > { %1438 = vmatmul.mubr.msk.bf16.gmra.mrb[24].mxu0 %vm407_vm1, %v1515_v28 }
  0x43   : > { %1470 = vmatmul.mubr.msk.bf16.gmra.mrb[24].mxu1 %vm407_vm1, %v1516_v29  ;;  %1441 = vmatprep.mubr.msk.bf16.mxu0 %vm407_vm1, %v1517_v30 }
  0x44   : > { %1473 = vmatprep.mubr.msk.bf16.mxu1 %vm407_vm1, %v1518_v31 }
  0x4a   : > { %1442 = vmatmul.mubr.msk.bf16.gmra.mrb[28].mxu0 %vm407_vm1, %v1519_v32 }
  0x4b   : > { %1474 = vmatmul.mubr.msk.bf16.gmra.mrb[28].mxu1 %vm407_vm1, %v1520_v33 }
  0xe5   : > { %v1415_v35 = vpop.f32.mrb[0].mxu0 }
  0xe6   : > { %v551_v36 = vadd.f32 %v1415_v35, %v1637_v34  ;;  %v1447_v37 = vpop.f32.mrb[0].mxu1  ;;  %v542_v38 = vpop.f32.mrb[1].mxu0 }
  0xe7   : > { %v679_v39 = vadd.f32 %v1447_v37, %v1637_v34  ;;  %v543_v40 = vadd.f32 %v1637_v34, %v542_v38  ;;  %v670_v41 = vpop.f32.mrb[1].mxu1  ;;  %v1416_v42 = vpop.f32.mrb[2].mxu0 }
  0xe8   : > { %v1316_v43 = vpack.c.bf16 %v551_v36, %v551_v36  ;;  %v671_v44 = vadd.f32 %v1637_v34, %v670_v41  ;;  %v554_v45 = vadd.f32 %v1416_v42, %v1637_v34  ;;  %v1448_v46 = vpop.f32.mrb[2].mxu1  ;;  %v545_v47 = vpop.f32.mrb[3].mxu0 }
  0xe9   : > { %v1348_v48 = vpack.c.bf16 %v679_v39, %v679_v39  ;;  %v1314_v49 = vpack.c.bf16 %v543_v40, %v543_v40  ;;  %v682_v50 = vadd.f32 %v1448_v46, %v1637_v34  ;;  %v546_v51 = vadd.f32 %v1637_v34, %v545_v47  ;;  %v673_v52 = vpop.f32.mrb[3].mxu1 }
  0xea   : > { %1056 = vst.msk [vmem:[%s1645_s25 + $0x8] sm:$0xf] %vm1053_vm2, %v1316_v43  ;;  %v1346_v53 = vpack.c.bf16 %v671_v44, %v671_v44  ;;  %v1317_v54 = vpack.c.bf16 %v554_v45, %v554_v45  ;;  %v674_v55 = vadd.f32 %v1637_v34, %v673_v52 }
  0xeb   : > { %1088 = vst.msk [vmem:[%s1645_s25 + $0x88] sm:$0xf] %vm1053_vm2, %v1348_v48  ;;  %1054 = vst.msk [vmem:[%s1645_s25] sm:$0xf] %vm1053_vm2, %v1314_v49  ;;  %v1349_v56 = vpack.c.bf16 %v682_v50, %v682_v50  ;;  %v1315_v57 = vpack.c.bf16 %v546_v51, %v546_v51 }
  0xec   : > { %1086 = vst.msk [vmem:[%s1645_s25 + $0x80] sm:$0xf] %vm1053_vm2, %v1346_v53  ;;  %1057 = vst.msk [vmem:[%s1645_s25 + $0xc] sm:$0xf] %vm1053_vm2, %v1317_v54  ;;  %v1347_v58 = vpack.c.bf16 %v674_v55, %v674_v55 }
  0xed   : > { %1089 = vst.msk [vmem:[%s1645_s25 + $0x8c] sm:$0xf] %vm1053_vm2, %v1349_v56  ;;  %1055 = vst.msk [vmem:[%s1645_s25 + $0x4] sm:$0xf] %vm1053_vm2, %v1315_v57  ;;  %v1419_v59 = vpop.f32.mrb[4].mxu0 }
  0xee   : > { %1087 = vst.msk [vmem:[%s1645_s25 + $0x84] sm:$0xf] %vm1053_vm2, %v1347_v58  ;;  %v567_v60 = vadd.f32 %v1419_v59, %v1637_v34  ;;  %v1451_v61 = vpop.f32.mrb[4].mxu1  ;;  %v558_v62 = vpop.f32.mrb[5].mxu0 }
  0xef   : > { %v695_v63 = vadd.f32 %v1451_v61, %v1637_v34  ;;  %v559_v0 = vadd.f32 %v1637_v34, %v558_v62  ;;  %v686_v1 = vpop.f32.mrb[5].mxu1  ;;  %v1420_v2 = vpop.f32.mrb[6].mxu0 }
  0xf0   : > { %v1320_v3 = vpack.c.bf16 %v567_v60, %v567_v60  ;;  %v687_v4 = vadd.f32 %v1637_v34, %v686_v1  ;;  %v570_v5 = vadd.f32 %v1420_v2, %v1637_v34  ;;  %v1452_v6 = vpop.f32.mrb[6].mxu1  ;;  %v561_v7 = vpop.f32.mrb[7].mxu0 }
  0xf1   : > { %v1352_v8 = vpack.c.bf16 %v695_v63, %v695_v63  ;;  %v1318_v9 = vpack.c.bf16 %v559_v0, %v559_v0  ;;  %v698_v10 = vadd.f32 %v1452_v6, %v1637_v34  ;;  %v562_v11 = vadd.f32 %v1637_v34, %v561_v7  ;;  %v689_v12 = vpop.f32.mrb[7].mxu1 }
  0xf2   : > { %1060 = vst.msk [vmem:[%s1645_s25 + $0x18] sm:$0xf] %vm1053_vm2, %v1320_v3  ;;  %v1350_v13 = vpack.c.bf16 %v687_v4, %v687_v4  ;;  %v1321_v14 = vpack.c.bf16 %v570_v5, %v570_v5  ;;  %v690_v15 = vadd.f32 %v1637_v34, %v689_v12 }
  0xf3   : > { %1092 = vst.msk [vmem:[%s1645_s25 + $0x98] sm:$0xf] %vm1053_vm2, %v1352_v8  ;;  %1058 = vst.msk [vmem:[%s1645_s25 + $0x10] sm:$0xf] %vm1053_vm2, %v1318_v9  ;;  %v1353_v16 = vpack.c.bf16 %v698_v10, %v698_v10  ;;  %v1319_v17 = vpack.c.bf16 %v562_v11, %v562_v11 }
  0xf4   : > { %1090 = vst.msk [vmem:[%s1645_s25 + $0x90] sm:$0xf] %vm1053_vm2, %v1350_v13  ;;  %1061 = vst.msk [vmem:[%s1645_s25 + $0x1c] sm:$0xf] %vm1053_vm2, %v1321_v14  ;;  %v1351_v18 = vpack.c.bf16 %v690_v15, %v690_v15 }
  0xf5   : > { %1093 = vst.msk [vmem:[%s1645_s25 + $0x9c] sm:$0xf] %vm1053_vm2, %v1353_v16  ;;  %1059 = vst.msk [vmem:[%s1645_s25 + $0x14] sm:$0xf] %vm1053_vm2, %v1319_v17  ;;  %v1423_v19 = vpop.f32.mrb[8].mxu0 }
  0xf6   : > { %1091 = vst.msk [vmem:[%s1645_s25 + $0x94] sm:$0xf] %vm1053_vm2, %v1351_v18  ;;  %v583_v20 = vadd.f32 %v1423_v19, %v1637_v34  ;;  %v1455_v21 = vpop.f32.mrb[8].mxu1  ;;  %v574_v22 = vpop.f32.mrb[9].mxu0 }
  0xf7   : > { %v711_v23 = vadd.f32 %v1455_v21, %v1637_v34  ;;  %v575_v24 = vadd.f32 %v1637_v34, %v574_v22  ;;  %v702_v25 = vpop.f32.mrb[9].mxu1  ;;  %v1424_v26 = vpop.f32.mrb[10].mxu0 }
  0xf8   : > { %v1324_v27 = vpack.c.bf16 %v583_v20, %v583_v20  ;;  %v703_v28 = vadd.f32 %v1637_v34, %v702_v25  ;;  %v586_v29 = vadd.f32 %v1424_v26, %v1637_v34  ;;  %v1456_v30 = vpop.f32.mrb[10].mxu1  ;;  %v577_v31 = vpop.f32.mrb[11].mxu0 }
  0xf9   : > { %v1356_v32 = vpack.c.bf16 %v711_v23, %v711_v23  ;;  %v1322_v33 = vpack.c.bf16 %v575_v24, %v575_v24  ;;  %v714_v35 = vadd.f32 %v1456_v30, %v1637_v34  ;;  %v578_v36 = vadd.f32 %v1637_v34, %v577_v31  ;;  %v705_v37 = vpop.f32.mrb[11].mxu1 }
  0xfa   : > { %1064 = vst.msk [vmem:[%s1645_s25 + $0x28] sm:$0xf] %vm1053_vm2, %v1324_v27  ;;  %v1354_v38 = vpack.c.bf16 %v703_v28, %v703_v28  ;;  %v1325_v39 = vpack.c.bf16 %v586_v29, %v586_v29  ;;  %v706_v40 = vadd.f32 %v1637_v34, %v705_v37 }
  0xfb   : > { %1096 = vst.msk [vmem:[%s1645_s25 + $0xa8] sm:$0xf] %vm1053_vm2, %v1356_v32  ;;  %1062 = vst.msk [vmem:[%s1645_s25 + $0x20] sm:$0xf] %vm1053_vm2, %v1322_v33  ;;  %v1357_v41 = vpack.c.bf16 %v714_v35, %v714_v35  ;;  %v1323_v42 = vpack.c.bf16 %v578_v36, %v578_v36 }
  0xfc   : > { %1094 = vst.msk [vmem:[%s1645_s25 + $0xa0] sm:$0xf] %vm1053_vm2, %v1354_v38  ;;  %1065 = vst.msk [vmem:[%s1645_s25 + $0x2c] sm:$0xf] %vm1053_vm2, %v1325_v39  ;;  %v1355_v43 = vpack.c.bf16 %v706_v40, %v706_v40 }
  0xfd   : > { %1097 = vst.msk [vmem:[%s1645_s25 + $0xac] sm:$0xf] %vm1053_vm2, %v1357_v41  ;;  %1063 = vst.msk [vmem:[%s1645_s25 + $0x24] sm:$0xf] %vm1053_vm2, %v1323_v42  ;;  %v1427_v44 = vpop.f32.mrb[12].mxu0 }
  0xfe   : > { %1095 = vst.msk [vmem:[%s1645_s25 + $0xa4] sm:$0xf] %vm1053_vm2, %v1355_v43  ;;  %v599_v45 = vadd.f32 %v1427_v44, %v1637_v34  ;;  %v1459_v46 = vpop.f32.mrb[12].mxu1  ;;  %v590_v47 = vpop.f32.mrb[13].mxu0 }
  0xff   : > { %v727_v48 = vadd.f32 %v1459_v46, %v1637_v34  ;;  %v591_v49 = vadd.f32 %v1637_v34, %v590_v47  ;;  %v718_v50 = vpop.f32.mrb[13].mxu1  ;;  %v1428_v51 = vpop.f32.mrb[14].mxu0 }
 0x100   : > { %v1328_v52 = vpack.c.bf16 %v599_v45, %v599_v45  ;;  %v719_v53 = vadd.f32 %v1637_v34, %v718_v50  ;;  %v602_v54 = vadd.f32 %v1428_v51, %v1637_v34  ;;  %v1460_v55 = vpop.f32.mrb[14].mxu1  ;;  %v593_v56 = vpop.f32.mrb[15].mxu0 }
 0x101   : > { %v1360_v57 = vpack.c.bf16 %v727_v48, %v727_v48  ;;  %v1326_v58 = vpack.c.bf16 %v591_v49, %v591_v49  ;;  %v730_v59 = vadd.f32 %v1460_v55, %v1637_v34  ;;  %v594_v60 = vadd.f32 %v1637_v34, %v593_v56  ;;  %v721_v61 = vpop.f32.mrb[15].mxu1 }
 0x102   : > { %1068 = vst.msk [vmem:[%s1645_s25 + $0x38] sm:$0xf] %vm1053_vm2, %v1328_v52  ;;  %v1358_v62 = vpack.c.bf16 %v719_v53, %v719_v53  ;;  %v1329_v63 = vpack.c.bf16 %v602_v54, %v602_v54  ;;  %v722_v0 = vadd.f32 %v1637_v34, %v721_v61 }
 0x103   : > { %1100 = vst.msk [vmem:[%s1645_s25 + $0xb8] sm:$0xf] %vm1053_vm2, %v1360_v57  ;;  %1066 = vst.msk [vmem:[%s1645_s25 + $0x30] sm:$0xf] %vm1053_vm2, %v1326_v58  ;;  %v1361_v1 = vpack.c.bf16 %v730_v59, %v730_v59  ;;  %v1327_v2 = vpack.c.bf16 %v594_v60, %v594_v60 }
 0x104   : > { %1098 = vst.msk [vmem:[%s1645_s25 + $0xb0] sm:$0xf] %vm1053_vm2, %v1358_v62  ;;  %1069 = vst.msk [vmem:[%s1645_s25 + $0x3c] sm:$0xf] %vm1053_vm2, %v1329_v63  ;;  %v1359_v3 = vpack.c.bf16 %v722_v0, %v722_v0 }
 0x105   : > { %1101 = vst.msk [vmem:[%s1645_s25 + $0xbc] sm:$0xf] %vm1053_vm2, %v1361_v1  ;;  %1067 = vst.msk [vmem:[%s1645_s25 + $0x34] sm:$0xf] %vm1053_vm2, %v1327_v2  ;;  %v1431_v4 = vpop.f32.mrb[16].mxu0 }
 0x106   : > { %1099 = vst.msk [vmem:[%s1645_s25 + $0xb4] sm:$0xf] %vm1053_vm2, %v1359_v3  ;;  %v615_v5 = vadd.f32 %v1431_v4, %v1637_v34  ;;  %v1463_v6 = vpop.f32.mrb[16].mxu1  ;;  %v606_v7 = vpop.f32.mrb[17].mxu0 }
 0x107   : > { %v743_v8 = vadd.f32 %v1463_v6, %v1637_v34  ;;  %v607_v9 = vadd.f32 %v1637_v34, %v606_v7  ;;  %v734_v10 = vpop.f32.mrb[17].mxu1  ;;  %v1432_v11 = vpop.f32.mrb[18].mxu0 }
 0x108   : > { %v1332_v12 = vpack.c.bf16 %v615_v5, %v615_v5  ;;  %v735_v13 = vadd.f32 %v1637_v34, %v734_v10  ;;  %v618_v14 = vadd.f32 %v1432_v11, %v1637_v34  ;;  %v1464_v15 = vpop.f32.mrb[18].mxu1  ;;  %v609_v16 = vpop.f32.mrb[19].mxu0 }
 0x109   : > { %v1364_v17 = vpack.c.bf16 %v743_v8, %v743_v8  ;;  %v1330_v18 = vpack.c.bf16 %v607_v9, %v607_v9  ;;  %v746_v19 = vadd.f32 %v1464_v15, %v1637_v34  ;;  %v610_v20 = vadd.f32 %v1637_v34, %v609_v16  ;;  %v737_v21 = vpop.f32.mrb[19].mxu1 }
 0x10a   : > { %1072 = vst.msk [vmem:[%s1645_s25 + $0x48] sm:$0xf] %vm1053_vm2, %v1332_v12  ;;  %v1362_v22 = vpack.c.bf16 %v735_v13, %v735_v13  ;;  %v1333_v23 = vpack.c.bf16 %v618_v14, %v618_v14  ;;  %v738_v24 = vadd.f32 %v1637_v34, %v737_v21 }
 0x10b   : > { %1104 = vst.msk [vmem:[%s1645_s25 + $0xc8] sm:$0xf] %vm1053_vm2, %v1364_v17  ;;  %1070 = vst.msk [vmem:[%s1645_s25 + $0x40] sm:$0xf] %vm1053_vm2, %v1330_v18  ;;  %v1365_v25 = vpack.c.bf16 %v746_v19, %v746_v19  ;;  %v1331_v26 = vpack.c.bf16 %v610_v20, %v610_v20 }
 0x10c   : > { %1102 = vst.msk [vmem:[%s1645_s25 + $0xc0] sm:$0xf] %vm1053_vm2, %v1362_v22  ;;  %1073 = vst.msk [vmem:[%s1645_s25 + $0x4c] sm:$0xf] %vm1053_vm2, %v1333_v23  ;;  %v1363_v27 = vpack.c.bf16 %v738_v24, %v738_v24 }
 0x10d   : > { %1105 = vst.msk [vmem:[%s1645_s25 + $0xcc] sm:$0xf] %vm1053_vm2, %v1365_v25  ;;  %1071 = vst.msk [vmem:[%s1645_s25 + $0x44] sm:$0xf] %vm1053_vm2, %v1331_v26  ;;  %v1435_v28 = vpop.f32.mrb[20].mxu0 }
 0x10e   : > { %1103 = vst.msk [vmem:[%s1645_s25 + $0xc4] sm:$0xf] %vm1053_vm2, %v1363_v27  ;;  %v631_v29 = vadd.f32 %v1435_v28, %v1637_v34  ;;  %v1467_v30 = vpop.f32.mrb[20].mxu1  ;;  %v622_v31 = vpop.f32.mrb[21].mxu0 }
 0x10f   : > { %v759_v32 = vadd.f32 %v1467_v30, %v1637_v34  ;;  %v623_v33 = vadd.f32 %v1637_v34, %v622_v31  ;;  %v750_v35 = vpop.f32.mrb[21].mxu1  ;;  %v1436_v36 = vpop.f32.mrb[22].mxu0 }
 0x110   : > { %v1336_v37 = vpack.c.bf16 %v631_v29, %v631_v29  ;;  %v751_v38 = vadd.f32 %v1637_v34, %v750_v35  ;;  %v634_v39 = vadd.f32 %v1436_v36, %v1637_v34  ;;  %v1468_v40 = vpop.f32.mrb[22].mxu1  ;;  %v625_v41 = vpop.f32.mrb[23].mxu0 }
 0x111   : > { %v1368_v42 = vpack.c.bf16 %v759_v32, %v759_v32  ;;  %v1334_v43 = vpack.c.bf16 %v623_v33, %v623_v33  ;;  %v762_v44 = vadd.f32 %v1468_v40, %v1637_v34  ;;  %v626_v45 = vadd.f32 %v1637_v34, %v625_v41  ;;  %v753_v46 = vpop.f32.mrb[23].mxu1 }
 0x112   : > { %1076 = vst.msk [vmem:[%s1645_s25 + $0x58] sm:$0xf] %vm1053_vm2, %v1336_v37  ;;  %v1366_v47 = vpack.c.bf16 %v751_v38, %v751_v38  ;;  %v1337_v48 = vpack.c.bf16 %v634_v39, %v634_v39  ;;  %v754_v49 = vadd.f32 %v1637_v34, %v753_v46 }
 0x113   : > { %1108 = vst.msk [vmem:[%s1645_s25 + $0xd8] sm:$0xf] %vm1053_vm2, %v1368_v42  ;;  %1074 = vst.msk [vmem:[%s1645_s25 + $0x50] sm:$0xf] %vm1053_vm2, %v1334_v43  ;;  %v1369_v50 = vpack.c.bf16 %v762_v44, %v762_v44  ;;  %v1335_v51 = vpack.c.bf16 %v626_v45, %v626_v45 }
 0x114   : > { %1106 = vst.msk [vmem:[%s1645_s25 + $0xd0] sm:$0xf] %vm1053_vm2, %v1366_v47  ;;  %1077 = vst.msk [vmem:[%s1645_s25 + $0x5c] sm:$0xf] %vm1053_vm2, %v1337_v48  ;;  %v1367_v52 = vpack.c.bf16 %v754_v49, %v754_v49 }
 0x115   : > { %1109 = vst.msk [vmem:[%s1645_s25 + $0xdc] sm:$0xf] %vm1053_vm2, %v1369_v50  ;;  %1075 = vst.msk [vmem:[%s1645_s25 + $0x54] sm:$0xf] %vm1053_vm2, %v1335_v51  ;;  %v1439_v53 = vpop.f32.mrb[24].mxu0 }
 0x116   : > { %1107 = vst.msk [vmem:[%s1645_s25 + $0xd4] sm:$0xf] %vm1053_vm2, %v1367_v52  ;;  %v647_v54 = vadd.f32 %v1439_v53, %v1637_v34  ;;  %v1471_v55 = vpop.f32.mrb[24].mxu1  ;;  %v638_v56 = vpop.f32.mrb[25].mxu0 }
 0x117   : > { %v775_v57 = vadd.f32 %v1471_v55, %v1637_v34  ;;  %v639_v58 = vadd.f32 %v1637_v34, %v638_v56  ;;  %v766_v59 = vpop.f32.mrb[25].mxu1  ;;  %v1440_v60 = vpop.f32.mrb[26].mxu0 }
 0x118   : > { %v1340_v61 = vpack.c.bf16 %v647_v54, %v647_v54  ;;  %v767_v62 = vadd.f32 %v1637_v34, %v766_v59  ;;  %v650_v63 = vadd.f32 %v1440_v60, %v1637_v34  ;;  %v1472_v0 = vpop.f32.mrb[26].mxu1  ;;  %v641_v1 = vpop.f32.mrb[27].mxu0 }
 0x119   : > { %v1372_v2 = vpack.c.bf16 %v775_v57, %v775_v57  ;;  %v1338_v3 = vpack.c.bf16 %v639_v58, %v639_v58  ;;  %v778_v4 = vadd.f32 %v1472_v0, %v1637_v34  ;;  %v642_v5 = vadd.f32 %v1637_v34, %v641_v1  ;;  %v769_v6 = vpop.f32.mrb[27].mxu1 }
 0x11a   : > { %1080 = vst.msk [vmem:[%s1645_s25 + $0x68] sm:$0xf] %vm1053_vm2, %v1340_v61  ;;  %v1370_v7 = vpack.c.bf16 %v767_v62, %v767_v62  ;;  %v1341_v8 = vpack.c.bf16 %v650_v63, %v650_v63  ;;  %v770_v9 = vadd.f32 %v1637_v34, %v769_v6 }
 0x11b   : > { %1112 = vst.msk [vmem:[%s1645_s25 + $0xe8] sm:$0xf] %vm1053_vm2, %v1372_v2  ;;  %1078 = vst.msk [vmem:[%s1645_s25 + $0x60] sm:$0xf] %vm1053_vm2, %v1338_v3  ;;  %v1373_v10 = vpack.c.bf16 %v778_v4, %v778_v4  ;;  %v1339_v11 = vpack.c.bf16 %v642_v5, %v642_v5 }
 0x11c   : > { %1110 = vst.msk [vmem:[%s1645_s25 + $0xe0] sm:$0xf] %vm1053_vm2, %v1370_v7  ;;  %1081 = vst.msk [vmem:[%s1645_s25 + $0x6c] sm:$0xf] %vm1053_vm2, %v1341_v8  ;;  %v1371_v12 = vpack.c.bf16 %v770_v9, %v770_v9 }
 0x11d   : > { %1113 = vst.msk [vmem:[%s1645_s25 + $0xec] sm:$0xf] %vm1053_vm2, %v1373_v10  ;;  %1079 = vst.msk [vmem:[%s1645_s25 + $0x64] sm:$0xf] %vm1053_vm2, %v1339_v11  ;;  %v1443_v13 = vpop.f32.mrb[28].mxu0 }
 0x11e   : > { %1111 = vst.msk [vmem:[%s1645_s25 + $0xe4] sm:$0xf] %vm1053_vm2, %v1371_v12  ;;  %v663_v14 = vadd.f32 %v1443_v13, %v1637_v34  ;;  %v1475_v15 = vpop.f32.mrb[28].mxu1  ;;  %v654_v16 = vpop.f32.mrb[29].mxu0 }
 0x11f   : > { %v791_v17 = vadd.f32 %v1475_v15, %v1637_v34  ;;  %v655_v18 = vadd.f32 %v1637_v34, %v654_v16  ;;  %v782_v19 = vpop.f32.mrb[29].mxu1  ;;  %v1444_v20 = vpop.f32.mrb[30].mxu0 }
 0x120   : > { %v1344_v21 = vpack.c.bf16 %v663_v14, %v663_v14  ;;  %v783_v22 = vadd.f32 %v1637_v34, %v782_v19  ;;  %v666_v23 = vadd.f32 %v1444_v20, %v1637_v34  ;;  %v1476_v24 = vpop.f32.mrb[30].mxu1  ;;  %v657_v25 = vpop.f32.mrb[31].mxu0 }
 0x121   : > { %v1376_v26 = vpack.c.bf16 %v791_v17, %v791_v17  ;;  %v1342_v27 = vpack.c.bf16 %v655_v18, %v655_v18  ;;  %v794_v28 = vadd.f32 %v1476_v24, %v1637_v34  ;;  %v658_v29 = vadd.f32 %v1637_v34, %v657_v25  ;;  %v785_v30 = vpop.f32.mrb[31].mxu1 }
 0x122   : > { %1084 = vst.msk [vmem:[%s1645_s25 + $0x78] sm:$0xf] %vm1053_vm2, %v1344_v21  ;;  %v1374_v31 = vpack.c.bf16 %v783_v22, %v783_v22  ;;  %v1345_v32 = vpack.c.bf16 %v666_v23, %v666_v23  ;;  %v786_v33 = vadd.f32 %v1637_v34, %v785_v30 }
 0x123   : > { %1116 = vst.msk [vmem:[%s1645_s25 + $0xf8] sm:$0xf] %vm1053_vm2, %v1376_v26  ;;  %1082 = vst.msk [vmem:[%s1645_s25 + $0x70] sm:$0xf] %vm1053_vm2, %v1342_v27  ;;  %v1377_v35 = vpack.c.bf16 %v794_v28, %v794_v28  ;;  %v1343_v36 = vpack.c.bf16 %v658_v29, %v658_v29 }
 0x124   : > { %1114 = vst.msk [vmem:[%s1645_s25 + $0xf0] sm:$0xf] %vm1053_vm2, %v1374_v31  ;;  %1085 = vst.msk [vmem:[%s1645_s25 + $0x7c] sm:$0xf] %vm1053_vm2, %v1345_v32  ;;  %v1375_v37 = vpack.c.bf16 %v786_v33, %v786_v33 }
 0x125   : > { %1117 = vst.msk [vmem:[%s1645_s25 + $0xfc] sm:$0xf] %vm1053_vm2, %v1377_v35  ;;  %1083 = vst.msk [vmem:[%s1645_s25 + $0x74] sm:$0xf] %vm1053_vm2, %v1343_v36 }
 0x126   : > { %1115 = vst.msk [vmem:[%s1645_s25 + $0xf4] sm:$0xf] %vm1053_vm2, %v1375_v37 }
 0x127 PF: > { %s13_s12 = sadd.s32 1, %s1527_s12  }
 0x128   : > { %p10_p4 = scmp.ge.s32.totalorder %s13_s12, 4  }
 0x12a   :  { %12 = sbr.rel (!%p10_p4) target bundleno = 1 (0x1), region = 62 }

// kernel: _lambda_.5
= control target key start
LH: loop header
LB: loop body
LE: loop exit
PB: predicated region body
PF: predicated region fallthrough
CT: control target
= control target key end

     0   :  { %s1908_s12 = smov 0   ;;  %s1910_s13 = smov 0   ;;  %s2444_s0 = inlined_call_operand.vmem [shape: bf16[2,128,8], index: 0, kind: input, shape index: {}]   ;;  %s2445_s1 = inlined_call_operand.vmem [shape: bf16[2,128,8], index: 1, kind: input, shape index: {}]   ;;  %s2446_s2 = inlined_call_operand.vmem [shape: bf16[2,128,8], index: 2, kind: input, shape index: {}]   ;;  %s2447_s3 = inlined_call_operand.vmem [shape: f32[2,128,8], index: 3, kind: output, shape index: {}]  }
   0x1   :  { %s1912_s14 = smov 0  }
   0x2 LB: > { %s32_s15 = sadd.s32 1, %s1879_s13  ;;  %p1561_p0 = scmp.ge.s32.totalorder %s1883_s14, 1  ;;  %s1883_s14 = sphi %s1912_s14, %s13_s14   ;;  %s1879_s13 = sphi %s1910_s13, %s2463_s13   ;;  %s1875_s12 = sphi %s1908_s12, %s2462_s12  }
   0x3   : > { %p34_p1 = scmp.ge.s32.totalorder %s32_s15, 2  ;;  %p199_p2 = scmp.lt.s32.totalorder %s1883_s14, 3 }
   0x5   : > { %s2465_s15 = smov (%p34_p1, %s32_s15), 0  ;;  %p200_p3 = pnand %p1561_p0, %p199_p2 }
   0x6   : > { %p250_p4 = scmp.lt.s32.totalorder (!%p200_p3), %s1875_s12, 1  ;;  %vm327_vm0 = vcmask (!%p200_p3), 64512   ;;  %vm294_vm1 = vcmask (!%p200_p3), 7168   ;;  %v1885_v24 = vmov (!%p200_p3), -1e+30   ;;  %v1886_v34 = vmov (!%p200_p3), 0  }
   0x7   : > { %203 = sbr.rel (%p200_p3) target bundleno = 925 (0x39d), region = 32  ;;  %297 = vst.msk [vmem:[#allocation2 + $0x10] sm:$0xff] (!%p200_p3), %vm294_vm1, %v1885_v24  ;;  %295 = vst.msk [vmem:[#allocation2] sm:$0xff] (!%p200_p3), %vm294_vm1, %v1885_v24  ;;  %1740 = vset.pattern.permute.xlu1 (!%p200_p3), %v1886_v34  ;;  %1739 = vset.pattern.permute.xlu0 (!%p200_p3), %v1886_v34  ;;  %v1887_v39 = vmov (!%p200_p3), 0.0  }
   0x8   : > { %296 = vst.msk [vmem:[#allocation2 + $0x8] sm:$0xff] (!%p200_p3), %vm294_vm1, %v1885_v24  ;;  %298 = vst.msk [vmem:[#allocation2 + $0x18] sm:$0xff] (!%p200_p3), %vm294_vm1, %v1885_v24 }
   0x9   : > { %299 = vst.msk [vmem:[#allocation2 + $0x20] sm:$0xff] (!%p200_p3), %vm294_vm1, %v1885_v24  ;;  %300 = vst.msk [vmem:[#allocation2 + $0x28] sm:$0xff] (!%p200_p3), %vm294_vm1, %v1885_v24 }
   0xa   : > { %301 = vst.msk [vmem:[#allocation2 + $0x30] sm:$0xff] (!%p200_p3), %vm294_vm1, %v1885_v24  ;;  %302 = vst.msk [vmem:[#allocation2 + $0x38] sm:$0xff] (!%p200_p3), %vm294_vm1, %v1885_v24 }
   0xb   : > { %303 = vst.msk [vmem:[#allocation2 + $0x40] sm:$0xff] (!%p200_p3), %vm294_vm1, %v1885_v24  ;;  %304 = vst.msk [vmem:[#allocation2 + $0x48] sm:$0xff] (!%p200_p3), %vm294_vm1, %v1885_v24 }
   0xc   : > { %305 = vst.msk [vmem:[#allocation2 + $0x50] sm:$0xff] (!%p200_p3), %vm294_vm1, %v1885_v24  ;;  %306 = vst.msk [vmem:[#allocation2 + $0x58] sm:$0xff] (!%p200_p3), %vm294_vm1, %v1885_v24 }
   0xd   : > { %307 = vst.msk [vmem:[#allocation2 + $0x60] sm:$0xff] (!%p200_p3), %vm294_vm1, %v1885_v24  ;;  %308 = vst.msk [vmem:[#allocation2 + $0x68] sm:$0xff] (!%p200_p3), %vm294_vm1, %v1885_v24 }
   0xe   : > { %s2467_s12 = smov (!%p250_p4, %s1875_s12), 1  ;;  %309 = vst.msk [vmem:[#allocation2 + $0x70] sm:$0xff] %vm294_vm1, %v1885_v24  ;;  %310 = vst.msk [vmem:[#allocation2 + $0x78] sm:$0xff] %vm294_vm1, %v1885_v24  ;;  %v2087_v45 = vld [vmem:[#allocation2 + $0x10] sm:$0xff]  ;;  %v2089_v46 = vld [vmem:[#allocation2] sm:$0xff] }
   0xf   : > { %s1929_s16 = sshll.u32 %s2467_s12, 6  ;;  %313 = vst.msk [vmem:[#allocation3 + $0x10] sm:$0xff] %vm294_vm1, %v1887_v39  ;;  %311 = vst.msk [vmem:[#allocation3] sm:$0xff] %vm294_vm1, %v1887_v39  ;;  %v2097_v51 = vld [vmem:[#allocation2 + $0x18] sm:$0xff]  ;;  %v2104_v53 = vld [vmem:[#allocation2 + $0x8] sm:$0xff]  ;;  %s1607_s26 = sshll.u32 %s2467_s12, 7 }
  0x10   : > { %s1935_s19 = scalar_lea.vmem %s2445_s1, %s1929_s16  ;;  %s1946_s22 = scalar_lea.vmem %s2444_s0, %s1929_s16  ;;  %312 = vst.msk [vmem:[#allocation3 + $0x8] sm:$0xff] %vm294_vm1, %v1887_v39  ;;  %314 = vst.msk [vmem:[#allocation3 + $0x18] sm:$0xff] %vm294_vm1, %v1887_v39  ;;  %v2123_v61 = vld [vmem:[#allocation2 + $0x20] sm:$0xff] }
  0x11   : > { %v1741_v0 = vld [vmem:[%s1935_s19] sm:$0xff]   ;;  %v1742_v1 = vld [vmem:[%s1935_s19 + $0x8] sm:$0xff]   ;;  %v1743_v3 = vld [vmem:[%s1935_s19 + $0x10] sm:$0xff]   ;;  %315 = vst.msk [vmem:[#allocation3 + $0x20] sm:$0xff] %vm294_vm1, %v1887_v39  ;;  %s2083_s25 = scalar_lea.vmem %s2446_s2, %s1929_s16  ;;  %s2401_s29 = scalar_lea.vmem %s2447_s3, %s1607_s26 }
  0x12   : > { %1704 = vmatprep.subr.msk.bf16.mxu0 %vm327_vm0, %v1741_v0  ;;  %v498_v2 = vsel %vm327_vm0, %v1741_v0, 0  ;;  %v501_v4 = vsel %vm327_vm0, %v1742_v1, 0  ;;  %v1749_v5 = vld [vmem:[%s1946_s22] sm:$0xff]   ;;  %v504_v6 = vsel %vm327_vm0, %v1743_v3, 0  ;;  %v1744_v7 = vld [vmem:[%s1935_s19 + $0x18] sm:$0xff]   ;;  %v1746_v11 = vld [vmem:[%s1935_s19 + $0x28] sm:$0xff]  }
  0x13   : > { %1641 = vmatpush3.bf16.xpose.msra.mxu0 %v498_v2  ;;  %1656 = vmatprep.mubr.msk.bf16.mxu0 %vm327_vm0, %v1749_v5  ;;  %v507_v8 = vsel %vm327_vm0, %v1744_v7, 0  ;;  %v1745_v9 = vld [vmem:[%s1935_s19 + $0x20] sm:$0xff]   ;;  %v513_v12 = vsel %vm327_vm0, %v1746_v11, 0  ;;  %v1747_v13 = vld [vmem:[%s1935_s19 + $0x30] sm:$0xff]   ;;  %v1748_v15 = vld [vmem:[%s1935_s19 + $0x38] sm:$0xff]   ;;  %316 = vst.msk [vmem:[#allocation3 + $0x28] sm:$0xff] %vm294_vm1, %v1887_v39 }
  0x14   : > { %1705 = vmatprep.subr.msk.bf16.mxu0 %vm327_vm0, %v1742_v1  ;;  %v510_v10 = vsel %vm327_vm0, %v1745_v9, 0  ;;  %v516_v14 = vsel %vm327_vm0, %v1747_v13, 0  ;;  %v519_v16 = vsel %vm327_vm0, %v1748_v15, 0  ;;  %v1750_v17 = vld [vmem:[%s1946_s22 + $0x8] sm:$0xff]   ;;  %v1751_v18 = vld [vmem:[%s1946_s22 + $0x10] sm:$0xff]   ;;  %v1752_v19 = vld [vmem:[%s1946_s22 + $0x18] sm:$0xff]  }
  0x15   : > { %v1753_v20 = vld [vmem:[%s1946_s22 + $0x20] sm:$0xff]   ;;  %v1754_v21 = vld [vmem:[%s1946_s22 + $0x28] sm:$0xff]   ;;  %v1755_v22 = vld [vmem:[%s1946_s22 + $0x30] sm:$0xff]   ;;  %317 = vst.msk [vmem:[#allocation3 + $0x30] sm:$0xff] %vm294_vm1, %v1887_v39 }
  0x16   : > { %v1756_v23 = vld [vmem:[%s1946_s22 + $0x38] sm:$0xff]   ;;  %318 = vst.msk [vmem:[#allocation3 + $0x38] sm:$0xff] %vm294_vm1, %v1887_v39  ;;  %319 = vst.msk [vmem:[#allocation3 + $0x40] sm:$0xff] %vm294_vm1, %v1887_v39  ;;  %v1757_v43 = vld [vmem:[%s2083_s25] sm:$0xff]  }
  0x17   : > { %320 = vst.msk [vmem:[#allocation3 + $0x48] sm:$0xff] %vm294_vm1, %v1887_v39  ;;  %321 = vst.msk [vmem:[#allocation3 + $0x50] sm:$0xff] %vm294_vm1, %v1887_v39  ;;  %v1758_v44 = vld [vmem:[%s2083_s25 + $0x8] sm:$0xff]   ;;  %1672 = vmatprep.subr.bf16.mxu1 %v1757_v43  ;;  %v1759_v54 = vld [vmem:[%s2083_s25 + $0x10] sm:$0xff]  }
  0x18   : > { %322 = vst.msk [vmem:[#allocation3 + $0x58] sm:$0xff] %vm294_vm1, %v1887_v39  ;;  %323 = vst.msk [vmem:[#allocation3 + $0x60] sm:$0xff] %vm294_vm1, %v1887_v39  ;;  %1673 = vmatpush3.bf16.msra.mxu1 %v1757_v43  ;;  %v1760_v62 = vld [vmem:[%s2083_s25 + $0x18] sm:$0xff]   ;;  %v2139_v5 = vld [vmem:[#allocation2 + $0x30] sm:$0xff] }
  0x19   : > { %324 = vst.msk [vmem:[#allocation3 + $0x68] sm:$0xff] %vm294_vm1, %v1887_v39  ;;  %325 = vst.msk [vmem:[#allocation3 + $0x70] sm:$0xff] %vm294_vm1, %v1887_v39  ;;  %1674 = vmatprep.subr.bf16.mxu1 %v1758_v44  ;;  %v2130_v0 = vld [vmem:[#allocation2 + $0x38] sm:$0xff]  ;;  %v1763_v24 = vld [vmem:[%s2083_s25 + $0x30] sm:$0xff]  }
  0x1a   : > { %326 = vst.msk [vmem:[#allocation3 + $0x78] sm:$0xff] %vm294_vm1, %v1887_v39 }
  0x1b   : > { %1643 = vmatpush3.bf16.xpose.msra.mxu0 %v501_v4  ;;  %328 = vst.msk [vmem:[#allocation4] sm:$0xff] %vm327_vm0, %v1887_v39  ;;  %329 = vst.msk [vmem:[#allocation4 + $0x8] sm:$0xff] %vm327_vm0, %v1887_v39 }
  0x1c   : > { %1706 = vmatprep.subr.msk.bf16.mxu0 %vm327_vm0, %v1743_v3  ;;  %330 = vst.msk [vmem:[#allocation4 + $0x10] sm:$0xff] %vm327_vm0, %v1887_v39  ;;  %331 = vst.msk [vmem:[#allocation4 + $0x18] sm:$0xff] %vm327_vm0, %v1887_v39  ;;  %1675 = vmatpush3.bf16.msra.mxu1 %v1758_v44 }
  0x1d   : > { %332 = vst.msk [vmem:[#allocation4 + $0x20] sm:$0xff] %vm327_vm0, %v1887_v39  ;;  %333 = vst.msk [vmem:[#allocation4 + $0x28] sm:$0xff] %vm327_vm0, %v1887_v39  ;;  %1676 = vmatprep.subr.bf16.mxu1 %v1759_v54 }
  0x1e   : > { %334 = vst.msk [vmem:[#allocation4 + $0x30] sm:$0xff] %vm327_vm0, %v1887_v39  ;;  %335 = vst.msk [vmem:[#allocation4 + $0x38] sm:$0xff] %vm327_vm0, %v1887_v39 }
  0x1f   : > { %336 = vst.msk [vmem:[#allocation4 + $0x40] sm:$0xff] %vm327_vm0, %v1887_v39  ;;  %337 = vst.msk [vmem:[#allocation4 + $0x48] sm:$0xff] %vm327_vm0, %v1887_v39 }
  0x20   : > { %338 = vst.msk [vmem:[#allocation4 + $0x50] sm:$0xff] %vm327_vm0, %v1887_v39  ;;  %339 = vst.msk [vmem:[#allocation4 + $0x58] sm:$0xff] %vm327_vm0, %v1887_v39  ;;  %1677 = vmatpush3.bf16.msra.mxu1 %v1759_v54 }
  0x21   : > { %340 = vst.msk [vmem:[#allocation4 + $0x60] sm:$0xff] %vm327_vm0, %v1887_v39  ;;  %341 = vst.msk [vmem:[#allocation4 + $0x68] sm:$0xff] %vm327_vm0, %v1887_v39  ;;  %1678 = vmatprep.subr.bf16.mxu1 %v1760_v62 }
  0x22   : > { %342 = vst.msk [vmem:[#allocation4 + $0x70] sm:$0xff] %vm327_vm0, %v1887_v39  ;;  %343 = vst.msk [vmem:[#allocation4 + $0x78] sm:$0xff] %vm327_vm0, %v1887_v39  ;;  %v2186_v39 = vld [vmem:[#allocation2 + $0x48] sm:$0xff] }
  0x23   : > { %1645 = vmatpush3.bf16.xpose.msra.mxu0 %v504_v6  ;;  %v1761_v6 = vld [vmem:[%s2083_s25 + $0x20] sm:$0xff]  }
  0x24   : > { %1707 = vmatprep.subr.msk.bf16.mxu0 %vm327_vm0, %v1744_v7  ;;  %1679 = vmatpush3.bf16.msra.mxu1 %v1760_v62 }
  0x25   : > { %1680 = vmatprep.subr.bf16.mxu1 %v1761_v6 }
  0x28   : > { %1681 = vmatpush3.bf16.msra.mxu1 %v1761_v6 }
  0x2b   : > { %1647 = vmatpush3.bf16.xpose.msra.mxu0 %v507_v8  ;;  %v2146_v8 = vld [vmem:[#allocation2 + $0x28] sm:$0xff] }
  0x2c   : > { %1708 = vmatprep.subr.msk.bf16.mxu0 %vm327_vm0, %v1745_v9 }
  0x33   : > { %1649 = vmatpush3.bf16.xpose.msra.mxu0 %v510_v10 }
  0x34   : > { %1709 = vmatprep.subr.msk.bf16.mxu0 %vm327_vm0, %v1746_v11 }
  0x3b   : > { %1651 = vmatpush3.bf16.xpose.msra.mxu0 %v513_v12 }
  0x3c   : > { %1710 = vmatprep.subr.msk.bf16.mxu0 %vm327_vm0, %v1747_v13 }
  0x43   : > { %1653 = vmatpush3.bf16.xpose.msra.mxu0 %v516_v14  ;;  %v2158_v14 = vld [vmem:[#allocation2 + $0x40] sm:$0xff] }
  0x44   : > { %1711 = vmatprep.subr.msk.bf16.mxu0 %vm327_vm0, %v1748_v15  ;;  %v1762_v15 = vld [vmem:[%s2083_s25 + $0x28] sm:$0xff]  }
  0x45   : > { %1682 = vmatprep.subr.bf16.mxu1 %v1762_v15 }
  0x46   : > { %1683 = vmatpush3.bf16.msra.mxu1 %v1762_v15 }
  0x47   : > { %1684 = vmatprep.subr.bf16.mxu1 %v1763_v24 }
  0x4a   : > { %1685 = vmatpush3.bf16.msra.mxu1 %v1763_v24  ;;  %v2226_v24 = vld [vmem:[#allocation2 + $0x68] sm:$0xff] }
  0x4b   : > { %1655 = vmatpush3.bf16.xpose.msra.mxu0 %v519_v16 }
  0x52   : > { %1657 = vmatmul.mubr.msk.bf16.vlgmr.msra.gmra.mrb[0].mxu0 %vm327_vm0, %v1750_v17  ;;  %v2166_v17 = vld [vmem:[#allocation2 + $0x58] sm:$0xff] }
  0x53   : > { %1660 = vmatprep.mubr.msk.bf16.mxu0 %vm327_vm0, %v1751_v18 }
  0x5a   : > { %1661 = vmatmul.mubr.msk.bf16.gmra.mrb[4].mxu0 %vm327_vm0, %v1752_v19 }
  0x5b   : > { %1664 = vmatprep.mubr.msk.bf16.mxu0 %vm327_vm0, %v1753_v20 }
  0x62   : > { %1665 = vmatmul.mubr.msk.bf16.gmra.mrb[8].mxu0 %vm327_vm0, %v1754_v21 }
  0x63   : > { %1668 = vmatprep.mubr.msk.bf16.mxu0 %vm327_vm0, %v1755_v22 }
  0x6a   : > { %1669 = vmatmul.mubr.msk.bf16.gmra.mrb[12].mxu0 %vm327_vm0, %v1756_v23  ;;  %v2178_v23 = vld [vmem:[#allocation2 + $0x50] sm:$0xff] }
 0x125   : > { %v1999_v25 = vpop.f32.mrb[0].mxu0 }
 0x126   : > { %638 = vmax.xlane.f32.xlu1 %v1999_v25  ;;  %v2002_v26 = vpop.f32.mrb[1].mxu0 }
 0x127   : > { %634 = vmax.xlane.f32.xlu0 %v2002_v26  ;;  %v2005_v27 = vpop.f32.mrb[2].mxu0 }
 0x128   : > { %v2007_v28 = vpop.f32.mrb[3].mxu0 }
 0x12a   : > { %640 = vmax.xlane.f32.xlu1 %v2005_v27 }
 0x12b   : > { %636 = vmax.xlane.f32.xlu0 %v2007_v28 }
 0x12d   : > { %v2011_v29 = vpop.f32.mrb[4].mxu0 }
 0x12e   : > { %v2013_v30 = vpop.f32.mrb[5].mxu0 }
 0x12f   : > { %642 = vmax.xlane.f32.xlu0 %v2013_v30  ;;  %v2016_v31 = vpop.f32.mrb[6].mxu0 }
 0x130   : > { %648 = vmax.xlane.f32.xlu1 %v2016_v31  ;;  %v2019_v32 = vpop.f32.mrb[7].mxu0 }
 0x133   : > { %646 = vmax.xlane.f32.xlu0 %v2011_v29 }
 0x134   : > { %644 = vmax.xlane.f32.xlu1 %v2019_v32 }
 0x135   : > { %v2023_v33 = vpop.f32.mrb[8].mxu0 }
 0x136   : > { %v2025_v35 = vpop.f32.mrb[9].mxu0 }
 0x137   : > { %v2027_v36 = vpop.f32.mrb[10].mxu0  ;;  %650 = vmax.xlane.f32.xlu0 %v2025_v35 }
 0x138   : > { %656 = vmax.xlane.f32.xlu1 %v2027_v36  ;;  %v2031_v37 = vpop.f32.mrb[11].mxu0 }
 0x13b   : > { %654 = vmax.xlane.f32.xlu0 %v2023_v33 }
 0x13c   : > { %652 = vmax.xlane.f32.xlu1 %v2031_v37 }
 0x13d   : > { %v2035_v38 = vpop.f32.mrb[12].mxu0 }
 0x13e   : > { %v2069_v40 = vpop.f32.mrb[13].mxu0 }
 0x13f   : > { %v2071_v41 = vpop.f32.mrb[14].mxu0  ;;  %658 = vmax.xlane.f32.xlu0 %v2069_v40 }
 0x140   : > { %664 = vmax.xlane.f32.xlu1 %v2071_v41  ;;  %v2075_v42 = vpop.f32.mrb[15].mxu0 }
 0x143   : > { %662 = vmax.xlane.f32.xlu0 %v2035_v38 }
 0x144   : > { %660 = vmax.xlane.f32.xlu1 %v2075_v42 }
 0x1b3   : > { %v639_v47 = vpop.xlane.xlu1 %638 }
 0x1b4   : > { %v2092_v48 = vmax.f32 %v2087_v45, %v639_v47  ;;  %v635_v49 = vpop.xlane.xlu0 %634 }
 0x1b5   : > { %v2095_v50 = vmax.f32 %v2089_v46, %v635_v49 }
 0x1b6   : > { %v684_v52 = vsub.f32 %v2087_v45, %v2092_v48  ;;  %1254 = vst.msk [vmem:[#allocation2 + $0x10] sm:$0xff] %vm294_vm1, %v2092_v48  ;;  %742 = vperm.xlu1 %1740, %v2092_v48  }
 0x1b7   : > { %1252 = vst.msk [vmem:[#allocation2] sm:$0xff] %vm294_vm1, %v2095_v50  ;;  %v641_v56 = vpop.xlane.xlu1 %640  ;;  %732 = vperm.xlu0 %1739, %v2095_v50  }
 0x1b8   : > { %v2113_v57 = vmax.f32 %v2097_v51, %v641_v56  ;;  %v637_v58 = vpop.xlane.xlu0 %636  ;;  %v2198_v56 = vld [vmem:[#allocation2 + $0x60] sm:$0xff] }
 0x1b9   : > { %v2116_v59 = vmax.f32 %v2104_v53, %v637_v58  ;;  %v1764_v58 = vld [vmem:[%s2083_s25 + $0x38] sm:$0xff]  }
 0x1ba   : > { %1255 = vst.msk [vmem:[#allocation2 + $0x18] sm:$0xff] %vm294_vm1, %v2113_v57  ;;  %747 = vperm.xlu1 %1740, %v2113_v57   ;;  %1686 = vmatprep.subr.bf16.mxu1 %v1764_v58 }
 0x1bb   : > { %v683_v63 = vsub.f32 %v2104_v53, %v2116_v59  ;;  %1253 = vst.msk [vmem:[#allocation2 + $0x8] sm:$0xff] %vm294_vm1, %v2116_v59  ;;  %1687 = vmatpush3.bf16.msra.mxu1 %v1764_v58 }
 0x1bc   : > { %v643_v1 = vpop.xlane.xlu0 %642 }
 0x1bd   : > { %v2133_v2 = vmax.f32 %v2123_v61, %v643_v1  ;;  %v649_v3 = vpop.xlane.xlu1 %648  ;;  %v2206_v1 = vld [vmem:[#allocation2 + $0x78] sm:$0xff] }
 0x1be   : > { %v2136_v4 = vmax.f32 %v2130_v0, %v649_v3  ;;  %737 = vperm.xlu1 %1740, %v2116_v59  }
 0x1bf   : > { %1256 = vst.msk [vmem:[#allocation2 + $0x20] sm:$0xff] %vm294_vm1, %v2133_v2 }
 0x1c0   : > { %1259 = vst.msk [vmem:[#allocation2 + $0x38] sm:$0xff] %vm294_vm1, %v2136_v4  ;;  %v647_v10 = vpop.xlane.xlu0 %646 }
 0x1c1   : > { %v2153_v11 = vmax.f32 %v2139_v5, %v647_v10  ;;  %v645_v12 = vpop.xlane.xlu1 %644 }
 0x1c2   : > { %v2156_v13 = vmax.f32 %v2146_v8, %v645_v12 }
 0x1c3   : > { %1258 = vst.msk [vmem:[#allocation2 + $0x30] sm:$0xff] %vm294_vm1, %v2153_v11  ;;  %762 = vperm.xlu1 %1740, %v2153_v11   ;;  %v2451_v45 = vsub.f32 %v2139_v5, %v2153_v11 }
 0x1c4   : > { %1257 = vst.msk [vmem:[#allocation2 + $0x28] sm:$0xff] %vm294_vm1, %v2156_v13  ;;  %v651_v19 = vpop.xlane.xlu0 %650 }
 0x1c5   : > { %v657_v20 = vpop.xlane.xlu1 %656  ;;  %v2173_v21 = vmax.f32 %v2158_v14, %v651_v19  ;;  %v2219_v19 = vld [vmem:[#allocation2 + $0x70] sm:$0xff]  ;;  %v710_v48 = vmul.f32 1.442695, %v2451_v45 }
 0x1c6   : > { %v2176_v22 = vmax.f32 %v2166_v17, %v657_v20 }
 0x1c7   : > { %1260 = vst.msk [vmem:[#allocation2 + $0x40] sm:$0xff] %vm294_vm1, %v2173_v21  ;;  %752 = vperm.xlu1 %1740, %v2133_v2   ;;  %v2453_v59 = vsub.f32 %v2158_v14, %v2173_v21 }
 0x1c8   : > { %1263 = vst.msk [vmem:[#allocation2 + $0x58] sm:$0xff] %vm294_vm1, %v2176_v22  ;;  %v655_v44 = vpop.xlane.xlu0 %654 }
 0x1c9   : > { %v653_v47 = vpop.xlane.xlu1 %652  ;;  %v2193_v49 = vmax.f32 %v2178_v23, %v655_v44 }
 0x1ca   : > { %v2196_v54 = vmax.f32 %v2186_v39, %v653_v47 }
 0x1cb   : > { %1262 = vst.msk [vmem:[#allocation2 + $0x50] sm:$0xff] %vm294_vm1, %v2193_v49  ;;  %757 = vperm.xlu1 %1740, %v2156_v13   ;;  %v2455_v5 = vsub.f32 %v2178_v23, %v2193_v49  ;;  %v2458_v23 = vsub.f32 %v2166_v17, %v2176_v22 }
 0x1cc   : > { %1261 = vst.msk [vmem:[#allocation2 + $0x48] sm:$0xff] %vm294_vm1, %v2196_v54  ;;  %777 = vperm.xlu0 %1739, %v2196_v54   ;;  %v659_v6 = vpop.xlane.xlu0 %658  ;;  %v2456_v11 = vsub.f32 %v2186_v39, %v2196_v54 }
 0x1cd   : > { %v665_v10 = vpop.xlane.xlu1 %664  ;;  %v2214_v12 = vmax.f32 %v2198_v56, %v659_v6 }
 0x1ce   : > { %v2217_v15 = vmax.f32 %v2206_v1, %v665_v10 }
 0x1cf   : > { %1264 = vst.msk [vmem:[#allocation2 + $0x60] sm:$0xff] %vm294_vm1, %v2214_v12  ;;  %767 = vperm.xlu1 %1740, %v2136_v4  }
 0x1d0   : > { %1267 = vst.msk [vmem:[#allocation2 + $0x78] sm:$0xff] %vm294_vm1, %v2217_v15  ;;  %787 = vperm.xlu0 %1739, %v2176_v22   ;;  %v663_v47 = vpop.xlane.xlu0 %662  ;;  %v2461_v22 = vsub.f32 %v2206_v1, %v2217_v15 }
 0x1d1   : > { %v661_v58 = vpop.xlane.xlu1 %660  ;;  %v2234_v6 = vmax.f32 %v2219_v19, %v663_v47 }
 0x1d2   : > { %v2237_v10 = vmax.f32 %v2226_v24, %v661_v58 }
 0x1d3   : > { %1266 = vst.msk [vmem:[#allocation2 + $0x70] sm:$0xff] %vm294_vm1, %v2234_v6  ;;  %772 = vperm.xlu1 %1740, %v2173_v21   ;;  %v2459_v39 = vsub.f32 %v2219_v19, %v2234_v6  ;;  %v728_v19 = vmul.f32 1.442695, %v2461_v22 }
 0x1d4   : > { %1265 = vst.msk [vmem:[#allocation2 + $0x68] sm:$0xff] %vm294_vm1, %v2237_v10  ;;  %797 = vperm.xlu0 %1739, %v2237_v10  }
 0x1d5   : > { %v726_v54 = vmul.f32 1.442695, %v2459_v39  ;;  %v866_v39 = vld [vmem:[#allocation3 + $0x40] sm:$0xff] }
 0x1d7   : > { %782 = vperm.xlu1 %1740, %v2193_v49   ;;  %v720_v49 = vmul.f32 1.442695, %v2458_v23 }
 0x1d8   : > { %807 = vperm.xlu0 %1739, %v2217_v15  }
 0x1db   : > { %792 = vperm.xlu1 %1740, %v2214_v12  }
 0x1df   : > { %802 = vperm.xlu1 %1740, %v2234_v6  }
 0x235   : > { %v743_v47 = vpop.permute.xlu1 %742 }
 0x236   : > { %v812_v58 = vsub.f32 %v1999_v25, %v743_v47  ;;  %v733_v43 = vpop.permute.xlu0 %732 }
 0x237   : > { %v810_v20 = vsub.f32 %v2002_v26, %v733_v43 }
 0x238   : > { %v830_v44 = vmul.f32 1.442695, %v812_v58 }
 0x239   : > { %v826_v3 = vmul.f32 1.442695, %v810_v20  ;;  %v748_v62 = vpop.permute.xlu1 %747 }
 0x23a   : > { %1765 = vpow2.f32 %v830_v44  ;;  %v813_v9 = vsub.f32 %v2005_v27, %v748_v62 }
 0x23b   : > { %1767 = vpow2.f32 %v826_v3 }
 0x23c   : > { %v832_v34 = vmul.f32 1.442695, %v813_v9 }
 0x23d   : > { %v738_v18 = vpop.permute.xlu1 %737 }
 0x23e   : > { %1769 = vpow2.f32 %v832_v34  ;;  %v811_v16 = vsub.f32 %v2007_v28, %v738_v18 }
 0x240   : > { %v828_v60 = vmul.f32 1.442695, %v811_v16 }
 0x242   : > { %1771 = vpow2.f32 %v828_v60  ;;  %v763_v7 = vpop.permute.xlu1 %762 }
 0x243   : > { %v816_v25 = vsub.f32 %v2011_v29, %v763_v7 }
 0x244   : > { %v1766_v47 = vpop.eup %1765 }
 0x245   : > { %v1768_v55 = vpop.eup %1767  ;;  %v838_v26 = vmul.f32 1.442695, %v816_v25  ;;  %894 = vadd.xlane.f32.xlu0 %v1766_v47 }
 0x246   : > { %890 = vadd.xlane.f32.xlu1 %v1768_v55  ;;  %v753_v43 = vpop.permute.xlu1 %752 }
 0x247   : > { %1773 = vpow2.f32 %v838_v26  ;;  %v814_v27 = vsub.f32 %v2013_v30, %v753_v43 }
 0x248   : > { %v1770_v62 = vpop.eup %1769 }
 0x249   : > { %v834_v9 = vmul.f32 1.442695, %v814_v27  ;;  %v1068_v3 = vpack.c.bf16 %v1770_v62, %v1766_v47 }
 0x24a   : > { %896 = vadd.xlane.f32.xlu1 %v1770_v62  ;;  %v758_v34 = vpop.permute.xlu1 %757 }
 0x24b   : > { %1775 = vpow2.f32 %v834_v9  ;;  %v815_v28 = vsub.f32 %v2019_v32, %v758_v34  ;;  %v778_v60 = vpop.permute.xlu0 %777 }
 0x24c   : > { %v1772_v16 = vpop.eup %1771  ;;  %v819_v18 = vsub.f32 %v2031_v37, %v778_v60 }
 0x24d   : > { %v836_v29 = vmul.f32 1.442695, %v815_v28  ;;  %892 = vadd.xlane.f32.xlu0 %v1772_v16  ;;  %v1067_v7 = vpack.c.bf16 %v1772_v16, %v1768_v55 }
 0x24e   : > { %v768_v20 = vpop.permute.xlu1 %767  ;;  %v844_v47 = vmul.f32 1.442695, %v819_v18 }
 0x24f   : > { %1777 = vpow2.f32 %v836_v29  ;;  %v817_v44 = vsub.f32 %v2016_v31, %v768_v20  ;;  %v788_v30 = vpop.permute.xlu0 %787  ;;  %1688 = vmatprep.mubr.bf16.mxu1 %v1067_v7 }
 0x250   : > { %1689 = vmatmul.mubr.bf16.vlgmr.msra.gmra.mrb[0].mxu1 %v1068_v3  ;;  %v821_v26 = vsub.f32 %v2027_v36, %v788_v30 }
 0x251   : > { %v1774_v58 = vpop.eup %1773  ;;  %v840_v25 = vmul.f32 1.442695, %v817_v44 }
 0x252   : > { %902 = vadd.xlane.f32.xlu0 %v1774_v58  ;;  %v773_v32 = vpop.permute.xlu1 %772  ;;  %v848_v62 = vmul.f32 1.442695, %v821_v26 }
 0x253   : > { %1779 = vpow2.f32 %v840_v25  ;;  %v818_v43 = vsub.f32 %v2025_v35, %v773_v32  ;;  %v798_v55 = vpop.permute.xlu0 %797 }
 0x254   : > { %1781 = vpow2.f32 %v844_v47  ;;  %v823_v31 = vsub.f32 %v2075_v42, %v798_v55 }
 0x255   : > { %v1776_v27 = vpop.eup %1775  ;;  %v842_v37 = vmul.f32 1.442695, %v818_v43 }
 0x256   : > { %898 = vadd.xlane.f32.xlu0 %v1776_v27  ;;  %v783_v9 = vpop.permute.xlu1 %782  ;;  %v852_v60 = vmul.f32 1.442695, %v823_v31  ;;  %v700_v31 = vmul.f32 1.442695, %v683_v63 }
 0x257   : > { %1783 = vpow2.f32 %v842_v37  ;;  %v820_v3 = vsub.f32 %v2023_v33, %v783_v9  ;;  %v808_v34 = vpop.permute.xlu0 %807  ;;  %v702_v9 = vmul.f32 1.442695, %v684_v52 }
 0x258   : > { %1785 = vpow2.f32 %v848_v62  ;;  %v825_v16 = vsub.f32 %v2071_v41, %v808_v34 }
 0x259   : > { %v1778_v28 = vpop.eup %1777  ;;  %v846_v36 = vmul.f32 1.442695, %v820_v3  ;;  %v2448_v3 = vsub.f32 %v2089_v46, %v2095_v50  ;;  %v2452_v46 = vsub.f32 %v2146_v8, %v2156_v13  ;;  %v718_v8 = vmul.f32 1.442695, %v2455_v5 }
 0x25a   : > { %v793_v35 = vpop.permute.xlu1 %792  ;;  %v1069_v29 = vpack.c.bf16 %v1778_v28, %v1776_v27  ;;  %v856_v20 = vmul.f32 1.442695, %v825_v16  ;;  %v716_v13 = vmul.f32 1.442695, %v2456_v11 }
 0x25b   : > { %1787 = vpow2.f32 %v846_v36  ;;  %v822_v7 = vsub.f32 %v2069_v40, %v793_v35  ;;  %v698_v34 = vmul.f32 1.442695, %v2448_v3  ;;  %v708_v50 = vmul.f32 1.442695, %v2452_v46 }
 0x25c   : > { %1692 = vmatprep.mubr.bf16.mxu1 %v1069_v29  ;;  %1789 = vpow2.f32 %v852_v60  ;;  %v2450_v60 = vsub.f32 %v2097_v51, %v2113_v57  ;;  %v714_v51 = vmul.f32 1.442695, %v2453_v59  ;;  %v2454_v57 = vsub.f32 %v2130_v0, %v2136_v4 }
 0x25d   : > { %v1780_v18 = vpop.eup %1779  ;;  %v850_v42 = vmul.f32 1.442695, %v822_v7  ;;  %v2457_v0 = vsub.f32 %v2198_v56, %v2214_v12  ;;  %v2460_v56 = vsub.f32 %v2226_v24, %v2237_v10 }
 0x25e   : > { %904 = vadd.xlane.f32.xlu1 %v1780_v18  ;;  %v803_v44 = vpop.permute.xlu1 %802  ;;  %v1070_v33 = vpack.c.bf16 %v1780_v18, %v1774_v58  ;;  %v1782_v25 = vpop.eup %1781  ;;  %v704_v53 = vmul.f32 1.442695, %v2450_v60 }
 0x25f   : > { %1791 = vpow2.f32 %v850_v42  ;;  %v824_v30 = vsub.f32 %v2035_v38, %v803_v44  ;;  %v722_v4 = vmul.f32 1.442695, %v2457_v0  ;;  %v724_v12 = vmul.f32 1.442695, %v2460_v56  ;;  %v860_v42 = vld [vmem:[#allocation3 + $0x10] sm:$0xff] }
 0x260   : > { %1693 = vmatmul.mubr.bf16.gmra.mrb[4].mxu1 %v1070_v33  ;;  %1793 = vpow2.f32 %v856_v20  ;;  %v858_v20 = vld [vmem:[#allocation3] sm:$0xff] }
 0x261   : > { %v1784_v47 = vpop.eup %1783  ;;  %v854_v41 = vmul.f32 1.442695, %v824_v30 }
 0x262   : > { %900 = vadd.xlane.f32.xlu1 %v1778_v28  ;;  %v1071_v26 = vpack.c.bf16 %v1782_v25, %v1784_v47  ;;  %v1786_v40 = vpop.eup %1785  ;;  %v2449_v28 = vsub.f32 %v2123_v61, %v2133_v2  ;;  %v712_v61 = vmul.f32 1.442695, %v2454_v57 }
 0x263   : > { %1795 = vpow2.f32 %v854_v41  ;;  %v861_v41 = vld [vmem:[#allocation3 + $0x18] sm:$0xff] }
 0x264   : > { %1696 = vmatprep.mubr.bf16.mxu1 %v1071_v26  ;;  %1797 = vpow2.f32 %v700_v31  ;;  %v706_v36 = vmul.f32 1.442695, %v2449_v28 }
 0x265   : > { %v1788_v32 = vpop.eup %1787  ;;  %1799 = vpow2.f32 %v702_v9 }
 0x266   : > { %912 = vadd.xlane.f32.xlu1 %v1786_v40  ;;  %910 = vadd.xlane.f32.xlu0 %v1788_v32  ;;  %v1072_v43 = vpack.c.bf16 %v1786_v40, %v1788_v32  ;;  %v1790_v55 = vpop.eup %1789  ;;  %1801 = vpow2.f32 %v698_v34  ;;  %v859_v32 = vld [vmem:[#allocation3 + $0x8] sm:$0xff]  ;;  %v862_v34 = vld [vmem:[#allocation3 + $0x20] sm:$0xff] }
 0x267   : > { %1803 = vpow2.f32 %v706_v36 }
 0x268   : > { %1697 = vmatmul.mubr.bf16.gmra.mrb[8].mxu1 %v1072_v43  ;;  %1805 = vpow2.f32 %v704_v53 }
 0x269   : > { %v1792_v58 = vpop.eup %1791  ;;  %1807 = vpow2.f32 %v710_v48 }
 0x26a   : > { %908 = vadd.xlane.f32.xlu1 %v1782_v25  ;;  %906 = vadd.xlane.f32.xlu0 %v1784_v47  ;;  %v1073_v38 = vpack.c.bf16 %v1790_v55, %v1792_v58  ;;  %v1794_v27 = vpop.eup %1793  ;;  %1809 = vpow2.f32 %v708_v50  ;;  %v865_v50 = vld [vmem:[#allocation3 + $0x38] sm:$0xff] }
 0x26b   : > { %1811 = vpow2.f32 %v714_v51 }
 0x26c   : > { %1700 = vmatprep.mubr.bf16.mxu1 %v1073_v38  ;;  %1813 = vpow2.f32 %v712_v61  ;;  %v863_v61 = vld [vmem:[#allocation3 + $0x28] sm:$0xff] }
 0x26d   : > { %v1796_v37 = vpop.eup %1795  ;;  %1815 = vpow2.f32 %v718_v8 }
 0x26e   : > { %920 = vadd.xlane.f32.xlu1 %v1794_v27  ;;  %914 = vadd.xlane.f32.xlu0 %v1792_v58  ;;  %v1074_v62 = vpack.c.bf16 %v1794_v27, %v1796_v37  ;;  %v2290_v52 = vpop.eup %1797  ;;  %1817 = vpow2.f32 %v716_v13 }
 0x26f   : > { %v1800_v63 = vpop.eup %1799  ;;  %1819 = vpow2.f32 %v722_v4  ;;  %v875_v58 = vmul.f32 %v2290_v52, %v859_v32 }
 0x270   : > { %1701 = vmatmul.mubr.bf16.gmra.mrb[12].mxu1 %v1074_v62  ;;  %v1802_v2 = vpop.eup %1801  ;;  %1821 = vpow2.f32 %v720_v49  ;;  %v876_v44 = vmul.f32 %v1800_v63, %v860_v42  ;;  %v870_v42 = vld [vmem:[#allocation3 + $0x60] sm:$0xff] }
 0x271   : > { %v2305_v14 = vpop.eup %1803  ;;  %1823 = vpow2.f32 %v726_v54  ;;  %v874_v30 = vmul.f32 %v1802_v2, %v858_v20  ;;  %v867_v54 = vld [vmem:[#allocation3 + $0x48] sm:$0xff]  ;;  %v873_v20 = vld [vmem:[#allocation3 + $0x78] sm:$0xff] }
 0x272   : > { %916 = vadd.xlane.f32.xlu1 %v1790_v55  ;;  %918 = vadd.xlane.f32.xlu0 %v1796_v37  ;;  %v1806_v21 = vpop.eup %1805  ;;  %1825 = vpow2.f32 %v724_v12  ;;  %v864_v37 = vld [vmem:[#allocation3 + $0x30] sm:$0xff]  ;;  %v878_v60 = vmul.f32 %v2305_v14, %v862_v34 }
 0x273   : > { %v1808_v16 = vpop.eup %1807  ;;  %1827 = vpow2.f32 %v728_v19  ;;  %v877_v40 = vmul.f32 %v1806_v21, %v861_v41 }
 0x274   : > { %v2314_v35 = vpop.eup %1809  ;;  %v880_v31 = vmul.f32 %v1808_v16, %v864_v37 }
 0x275   : > { %v2323_v29 = vpop.eup %1811  ;;  %v879_v8 = vmul.f32 %v2314_v35, %v863_v61 }
 0x276   : > { %v2325_v17 = vpop.eup %1813  ;;  %v882_v22 = vmul.f32 %v2323_v29, %v866_v39 }
 0x277   : > { %v2332_v6 = vpop.eup %1815  ;;  %v881_v59 = vmul.f32 %v2325_v17, %v865_v50 }
 0x278   : > { %v2334_v7 = vpop.eup %1817 }
 0x279   : > { %v2338_v24 = vpop.eup %1819  ;;  %v883_v19 = vmul.f32 %v2334_v7, %v867_v54 }
 0x27a   : > { %v2340_v10 = vpop.eup %1821 }
 0x27b   : > { %v2344_v1 = vpop.eup %1823 }
 0x27c   : > { %v2346_v15 = vpop.eup %1825 }
 0x27d   : > { %v2350_v18 = vpop.eup %1827 }
 0x283   : > { %978 = vperm.xlu1 %1740, %v2290_v52  }
 0x287   : > { %983 = vperm.xlu1 %1740, %v1800_v63  }
 0x288   : > { %973 = vperm.xlu0 %1739, %v1802_v2  }
 0x28b   : > { %993 = vperm.xlu1 %1740, %v2305_v14   ;;  %v868_v14 = vld [vmem:[#allocation3 + $0x50] sm:$0xff] }
 0x28c   : > { %988 = vperm.xlu0 %1739, %v1806_v21   ;;  %v869_v21 = vld [vmem:[#allocation3 + $0x58] sm:$0xff]  ;;  %v884_v4 = vmul.f32 %v2332_v6, %v868_v14 }
 0x28d   : > { %v885_v23 = vmul.f32 %v2340_v10, %v869_v21 }
 0x28f   : > { %1003 = vperm.xlu1 %1740, %v1808_v16  }
 0x290   : > { %998 = vperm.xlu0 %1739, %v2314_v35  }
 0x293   : > { %1013 = vperm.xlu1 %1740, %v2323_v29   ;;  %v889_v29 = vmul.f32 %v2350_v18, %v873_v20  ;;  %v959_v20 = vld [vmem:[#allocation4 + $0x20] sm:$0xff] }
 0x294   : > { %1008 = vperm.xlu0 %1739, %v2325_v17  }
 0x297   : > { %1023 = vperm.xlu1 %1740, %v2332_v6  }
 0x298   : > { %1018 = vperm.xlu0 %1739, %v2334_v7  }
 0x29b   : > { %1033 = vperm.xlu1 %1740, %v2338_v24  }
 0x29c   : > { %1028 = vperm.xlu0 %1739, %v2340_v10  }
 0x29f   : > { %1043 = vperm.xlu1 %1740, %v2344_v1  }
 0x2a0   : > { %1038 = vperm.xlu0 %1739, %v2346_v15  }
 0x2a4   : > { %1048 = vperm.xlu0 %1739, %v2350_v18  }
 0x2d2   : > { %v895_v33 = vpop.xlane.xlu0 %894 }
 0x2d3   : > { %v924_v25 = vadd.f32 %v895_v33, %v876_v44  ;;  %v891_v47 = vpop.xlane.xlu1 %890 }
 0x2d4   : > { %v922_v26 = vadd.f32 %v891_v47, %v874_v30  ;;  %v886_v47 = vmul.f32 %v2338_v24, %v870_v42 }
 0x2d5   : > { %941 = vst.msk [vmem:[#allocation3 + $0x10] sm:$0xff] %vm294_vm1, %v924_v25 }
 0x2d6   : > { %939 = vst.msk [vmem:[#allocation3] sm:$0xff] %vm294_vm1, %v922_v26  ;;  %v872_v26 = vld [vmem:[#allocation3 + $0x70] sm:$0xff] }
 0x2d7   : > { %v897_v43 = vpop.xlane.xlu1 %896 }
 0x2d8   : > { %v925_v55 = vadd.f32 %v897_v43, %v877_v40  ;;  %v871_v40 = vld [vmem:[#allocation3 + $0x68] sm:$0xff] }
 0x2da   : > { %942 = vst.msk [vmem:[#allocation3 + $0x18] sm:$0xff] %vm294_vm1, %v925_v55  ;;  %v893_v38 = vpop.xlane.xlu0 %892 }
 0x2db   : > { %v923_v27 = vadd.f32 %v893_v38, %v875_v58  ;;  %v888_v38 = vmul.f32 %v2344_v1, %v872_v26 }
 0x2dc   : > { %v1273_v62 = vld [vmem:[#allocation3 + $0x10] sm:$0xff] }
 0x2dd   : > { %940 = vst.msk [vmem:[#allocation3 + $0x8] sm:$0xff] %vm294_vm1, %v923_v27  ;;  %1829 = vrcp.f32 %v1273_v62  ;;  %v1271_v9 = vld [vmem:[#allocation3] sm:$0xff]  ;;  %v887_v27 = vmul.f32 %v2346_v15, %v871_v40 }
 0x2de   : > { %1831 = vrcp.f32 %v1271_v9 }
 0x2df   : > { %v903_v3 = vpop.xlane.xlu0 %902 }
 0x2e0   : > { %v928_v28 = vadd.f32 %v903_v3, %v880_v31 }
 0x2e1   : > { %v1274_v36 = vld [vmem:[#allocation3 + $0x18] sm:$0xff] }
 0x2e2   : > { %945 = vst.msk [vmem:[#allocation3 + $0x30] sm:$0xff] %vm294_vm1, %v928_v28  ;;  %1833 = vrcp.f32 %v1274_v36 }
 0x2e3   : > { %v899_v53 = vpop.xlane.xlu0 %898 }
 0x2e4   : > { %v926_v45 = vadd.f32 %v899_v53, %v878_v60  ;;  %v1272_v48 = vld [vmem:[#allocation3 + $0x8] sm:$0xff] }
 0x2e5   : > { %1835 = vrcp.f32 %v1272_v48 }
 0x2e6   : > { %943 = vst.msk [vmem:[#allocation3 + $0x20] sm:$0xff] %vm294_vm1, %v926_v45 }
 0x2e7   : > { %v1830_v46 = vpop.eup %1829 }
 0x2e8   : > { %1331 = vperm.xlu1 %1740, %v1830_v46   ;;  %v1832_v51 = vpop.eup %1831 }
 0x2e9   : > { %v1277_v52 = vld [vmem:[#allocation3 + $0x30] sm:$0xff] }
 0x2ea   : > { %1837 = vrcp.f32 %v1277_v52 }
 0x2eb   : > { %v905_v57 = vpop.xlane.xlu1 %904 }
 0x2ec   : > { %v1834_v63 = vpop.eup %1833  ;;  %v929_v2 = vadd.f32 %v905_v57, %v881_v59  ;;  %1321 = vperm.xlu1 %1740, %v1832_v51  }
 0x2ed   : > { %1336 = vperm.xlu0 %1739, %v1834_v63   ;;  %v1275_v5 = vld [vmem:[#allocation3 + $0x20] sm:$0xff] }
 0x2ee   : > { %946 = vst.msk [vmem:[#allocation3 + $0x38] sm:$0xff] %vm294_vm1, %v929_v2  ;;  %1839 = vrcp.f32 %v1275_v5  ;;  %v957_v2 = vld [vmem:[#allocation4 + $0x10] sm:$0xff]  ;;  %v955_v5 = vld [vmem:[#allocation4] sm:$0xff] }
 0x2ef   : > { %v1836_v11 = vpop.eup %1835  ;;  %v901_v13 = vpop.xlane.xlu1 %900 }
 0x2f0   : > { %v927_v0 = vadd.f32 %v901_v13, %v879_v8  ;;  %v958_v8 = vld [vmem:[#allocation4 + $0x18] sm:$0xff]  ;;  %v956_v13 = vld [vmem:[#allocation4 + $0x8] sm:$0xff] }
 0x2f1   : > { %1326 = vperm.xlu0 %1739, %v1836_v11  }
 0x2f2   : > { %944 = vst.msk [vmem:[#allocation3 + $0x28] sm:$0xff] %vm294_vm1, %v927_v0 }
 0x2f3   : > { %v911_v49 = vpop.xlane.xlu0 %910  ;;  %v913_v16 = vpop.xlane.xlu1 %912 }
 0x2f4   : > { %v1838_v56 = vpop.eup %1837  ;;  %v932_v12 = vadd.f32 %v911_v49, %v884_v4  ;;  %v933_v35 = vadd.f32 %v913_v16, %v885_v23 }
 0x2f5   : > { %1351 = vperm.xlu1 %1740, %v1838_v56   ;;  %v1278_v17 = vld [vmem:[#allocation3 + $0x38] sm:$0xff] }
 0x2f6   : > { %949 = vst.msk [vmem:[#allocation3 + $0x50] sm:$0xff] %vm294_vm1, %v932_v12  ;;  %950 = vst.msk [vmem:[#allocation3 + $0x58] sm:$0xff] %vm294_vm1, %v933_v35  ;;  %1841 = vrcp.f32 %v1278_v17 }
 0x2f7   : > { %v907_v6 = vpop.xlane.xlu0 %906  ;;  %v909_v10 = vpop.xlane.xlu1 %908 }
 0x2f8   : > { %v1840_v44 = vpop.eup %1839  ;;  %v930_v33 = vadd.f32 %v907_v6, %v882_v22  ;;  %v931_v30 = vadd.f32 %v909_v10, %v883_v19  ;;  %v961_v10 = vld [vmem:[#allocation4 + $0x30] sm:$0xff] }
 0x2f9   : > { %1341 = vperm.xlu1 %1740, %v1840_v44   ;;  %v1276_v25 = vld [vmem:[#allocation3 + $0x28] sm:$0xff]  ;;  %v962_v44 = vld [vmem:[#allocation4 + $0x38] sm:$0xff] }
 0x2fa   : > { %947 = vst.msk [vmem:[#allocation3 + $0x40] sm:$0xff] %vm294_vm1, %v930_v33  ;;  %948 = vst.msk [vmem:[#allocation3 + $0x48] sm:$0xff] %vm294_vm1, %v931_v30  ;;  %1843 = vrcp.f32 %v1276_v25  ;;  %v960_v33 = vld [vmem:[#allocation4 + $0x28] sm:$0xff] }
 0x2fb   : > { %v915_v7 = vpop.xlane.xlu0 %914  ;;  %v921_v41 = vpop.xlane.xlu1 %920 }
 0x2fc   : > { %v934_v32 = vadd.f32 %v915_v7, %v886_v47  ;;  %v937_v43 = vadd.f32 %v921_v41, %v889_v29 }
 0x2fd   : > { %v1281_v55 = vld [vmem:[#allocation3 + $0x50] sm:$0xff]  ;;  %v1282_v58 = vld [vmem:[#allocation3 + $0x58] sm:$0xff] }
 0x2fe   : > { %951 = vst.msk [vmem:[#allocation3 + $0x60] sm:$0xff] %vm294_vm1, %v934_v32  ;;  %954 = vst.msk [vmem:[#allocation3 + $0x78] sm:$0xff] %vm294_vm1, %v937_v43  ;;  %1845 = vrcp.f32 %v1281_v55 }
 0x2ff   : > { %v919_v24 = vpop.xlane.xlu0 %918  ;;  %v917_v18 = vpop.xlane.xlu1 %916  ;;  %1847 = vrcp.f32 %v1282_v58 }
 0x300   : > { %v1842_v37 = vpop.eup %1841  ;;  %v936_v62 = vadd.f32 %v919_v24, %v888_v38  ;;  %v935_v31 = vadd.f32 %v917_v18, %v887_v27  ;;  %v965_v27 = vld [vmem:[#allocation4 + $0x50] sm:$0xff]  ;;  %v963_v18 = vld [vmem:[#allocation4 + $0x40] sm:$0xff] }
 0x301   : > { %1356 = vperm.xlu0 %1739, %v1842_v37   ;;  %v1279_v9 = vld [vmem:[#allocation3 + $0x40] sm:$0xff]  ;;  %v1280_v3 = vld [vmem:[#allocation3 + $0x48] sm:$0xff]  ;;  %v966_v37 = vld [vmem:[#allocation4 + $0x58] sm:$0xff] }
 0x302   : > { %953 = vst.msk [vmem:[#allocation3 + $0x70] sm:$0xff] %vm294_vm1, %v936_v62  ;;  %952 = vst.msk [vmem:[#allocation3 + $0x68] sm:$0xff] %vm294_vm1, %v935_v31  ;;  %1849 = vrcp.f32 %v1279_v9  ;;  %v964_v31 = vld [vmem:[#allocation4 + $0x48] sm:$0xff] }
 0x303   : > { %1851 = vrcp.f32 %v1280_v3  ;;  %v979_v59 = vpop.permute.xlu1 %978 }
 0x304   : > { %v1844_v34 = vpop.eup %1843  ;;  %v1052_v39 = vmul.f32 %v979_v59, %v956_v13 }
 0x305   : > { %1346 = vperm.xlu0 %1739, %v1844_v34   ;;  %v1283_v1 = vld [vmem:[#allocation3 + $0x60] sm:$0xff]  ;;  %v1286_v45 = vld [vmem:[#allocation3 + $0x78] sm:$0xff] }
 0x306   : > { %1853 = vrcp.f32 %v1283_v1 }
 0x307   : > { %v974_v51 = vpop.permute.xlu0 %973  ;;  %v984_v61 = vpop.permute.xlu1 %983 }
 0x308   : > { %v1846_v15 = vpop.eup %1845  ;;  %v1053_v14 = vmul.f32 %v984_v61, %v957_v2  ;;  %v1051_v21 = vmul.f32 %v974_v51, %v955_v5  ;;  %v967_v51 = vld [vmem:[#allocation4 + $0x60] sm:$0xff] }
 0x309   : > { %v1848_v28 = vpop.eup %1847  ;;  %1371 = vperm.xlu1 %1740, %v1846_v15   ;;  %v1285_v36 = vld [vmem:[#allocation3 + $0x70] sm:$0xff]  ;;  %v1284_v60 = vld [vmem:[#allocation3 + $0x68] sm:$0xff] }
 0x30a   : > { %1376 = vperm.xlu0 %1739, %v1848_v28   ;;  %1855 = vrcp.f32 %v1285_v36 }
 0x30b   : > { %1857 = vrcp.f32 %v1284_v60  ;;  %v989_v63 = vpop.permute.xlu0 %988  ;;  %v994_v11 = vpop.permute.xlu1 %993 }
 0x30c   : > { %v1850_v53 = vpop.eup %1849  ;;  %1859 = vrcp.f32 %v1286_v45  ;;  %v1054_v23 = vmul.f32 %v989_v63, %v958_v8  ;;  %v1055_v25 = vmul.f32 %v994_v11, %v959_v20  ;;  %v968_v63 = vld [vmem:[#allocation4 + $0x68] sm:$0xff] }
 0x30d   : > { %v1852_v48 = vpop.eup %1851  ;;  %1361 = vperm.xlu1 %1740, %v1850_v53  }
 0x30e   : > { %1366 = vperm.xlu0 %1739, %v1852_v48  }
 0x30f   : > { %v999_v0 = vpop.permute.xlu0 %998  ;;  %v1004_v17 = vpop.permute.xlu1 %1003 }
 0x310   : > { %v1854_v46 = vpop.eup %1853  ;;  %v1057_v30 = vmul.f32 %v1004_v17, %v961_v10  ;;  %v1056_v40 = vmul.f32 %v999_v0, %v960_v33 }
 0x311   : > { %1381 = vperm.xlu1 %1740, %v1854_v46  }
 0x313   : > { %v1009_v19 = vpop.permute.xlu0 %1008  ;;  %v1014_v6 = vpop.permute.xlu1 %1013 }
 0x314   : > { %v1856_v50 = vpop.eup %1855  ;;  %v1058_v7 = vmul.f32 %v1009_v19, %v962_v44  ;;  %v1059_v3 = vmul.f32 %v1014_v6, %v963_v18 }
 0x315   : > { %v1858_v52 = vpop.eup %1857  ;;  %1391 = vperm.xlu1 %1740, %v1856_v50   ;;  %v969_v50 = vld [vmem:[#allocation4 + $0x70] sm:$0xff] }
 0x316   : > { %1386 = vperm.xlu0 %1739, %v1858_v52   ;;  %v1860_v57 = vpop.eup %1859 }
 0x317   : > { %v1019_v42 = vpop.permute.xlu0 %1018  ;;  %v1024_v47 = vpop.permute.xlu1 %1023 }
 0x318   : > { %v1061_v9 = vmul.f32 %v1024_v47, %v965_v27  ;;  %v1060_v60 = vmul.f32 %v1019_v42, %v964_v31 }
 0x31a   : > { %1396 = vperm.xlu0 %1739, %v1860_v57   ;;  %v970_v57 = vld [vmem:[#allocation4 + $0x78] sm:$0xff] }
 0x31b   : > { %v1029_v32 = vpop.permute.xlu0 %1028  ;;  %v1034_v62 = vpop.permute.xlu1 %1033 }
 0x31c   : > { %v1062_v15 = vmul.f32 %v1029_v32, %v966_v37  ;;  %v1063_v5 = vmul.f32 %v1034_v62, %v967_v51 }
 0x31f   : > { %v1039_v34 = vpop.permute.xlu0 %1038  ;;  %v1044_v52 = vpop.permute.xlu1 %1043 }
 0x320   : > { %v1065_v2 = vmul.f32 %v1044_v52, %v969_v50 }
 0x323   : > { %v1690_v4 = vpop.f32.mrb[0].mxu1  ;;  %v1049_v61 = vpop.permute.xlu0 %1048 }
 0x324   : > { %v1222_v49 = vadd.f32 %v1690_v4, %v1053_v14  ;;  %v1157_v16 = vpop.f32.mrb[1].mxu1  ;;  %v1066_v11 = vmul.f32 %v1049_v61, %v970_v57 }
 0x325   : > { %v1220_v54 = vadd.f32 %v1157_v16, %v1051_v21  ;;  %v1691_v56 = vpop.f32.mrb[2].mxu1  ;;  %v1064_v21 = vmul.f32 %v1039_v34, %v968_v63 }
 0x326   : > { %1238 = vst.msk [vmem:[#allocation4 + $0x10] sm:$0xff] %vm327_vm0, %v1222_v49  ;;  %v1223_v12 = vadd.f32 %v1691_v56, %v1054_v23  ;;  %v1160_v35 = vpop.f32.mrb[3].mxu1 }
 0x327   : > { %1236 = vst.msk [vmem:[#allocation4] sm:$0xff] %vm327_vm0, %v1220_v54  ;;  %v1221_v22 = vadd.f32 %v1160_v35, %v1052_v39 }
 0x328   : > { %1239 = vst.msk [vmem:[#allocation4 + $0x18] sm:$0xff] %vm327_vm0, %v1223_v12 }
 0x329   : > { %1237 = vst.msk [vmem:[#allocation4 + $0x8] sm:$0xff] %vm327_vm0, %v1221_v22 }
 0x32d   : > { %v1305_v39 = vld [vmem:[#allocation4 + $0x10] sm:$0xff] }
 0x32e   : > { %v1303_v12 = vld [vmem:[#allocation4] sm:$0xff] }
 0x32f   : > { %v1306_v22 = vld [vmem:[#allocation4 + $0x18] sm:$0xff] }
 0x330   : > { %v1304_v42 = vld [vmem:[#allocation4 + $0x8] sm:$0xff] }
 0x333   : > { %v1694_v29 = vpop.f32.mrb[4].mxu1 }
 0x334   : > { %v1226_v41 = vadd.f32 %v1694_v29, %v1057_v30  ;;  %v1173_v26 = vpop.f32.mrb[5].mxu1 }
 0x335   : > { %v1224_v43 = vadd.f32 %v1173_v26, %v1055_v25  ;;  %v1695_v55 = vpop.f32.mrb[6].mxu1 }
 0x336   : > { %1242 = vst.msk [vmem:[#allocation4 + $0x30] sm:$0xff] %vm327_vm0, %v1226_v41  ;;  %v1227_v58 = vadd.f32 %v1695_v55, %v1058_v7  ;;  %v1176_v38 = vpop.f32.mrb[7].mxu1 }
 0x337   : > { %1240 = vst.msk [vmem:[#allocation4 + $0x20] sm:$0xff] %vm327_vm0, %v1224_v43  ;;  %v1225_v24 = vadd.f32 %v1176_v38, %v1056_v40 }
 0x338   : > { %1243 = vst.msk [vmem:[#allocation4 + $0x38] sm:$0xff] %vm327_vm0, %v1227_v58 }
 0x339   : > { %1241 = vst.msk [vmem:[#allocation4 + $0x28] sm:$0xff] %vm327_vm0, %v1225_v24 }
 0x33b   : > { %v1698_v1 = vpop.f32.mrb[8].mxu1 }
 0x33c   : > { %v1230_v28 = vadd.f32 %v1698_v1, %v1061_v9  ;;  %v1189_v36 = vpop.f32.mrb[9].mxu1 }
 0x33d   : > { %v1228_v53 = vadd.f32 %v1189_v36, %v1059_v3  ;;  %v1699_v45 = vpop.f32.mrb[10].mxu1  ;;  %v1309_v44 = vld [vmem:[#allocation4 + $0x30] sm:$0xff] }
 0x33e   : > { %1246 = vst.msk [vmem:[#allocation4 + $0x50] sm:$0xff] %vm327_vm0, %v1230_v28  ;;  %v1231_v48 = vadd.f32 %v1699_v45, %v1062_v15  ;;  %v1192_v46 = vpop.f32.mrb[11].mxu1  ;;  %v1307_v25 = vld [vmem:[#allocation4 + $0x20] sm:$0xff] }
 0x33f   : > { %1244 = vst.msk [vmem:[#allocation4 + $0x40] sm:$0xff] %vm327_vm0, %v1228_v53  ;;  %v1229_v59 = vadd.f32 %v1192_v46, %v1060_v60  ;;  %v1310_v7 = vld [vmem:[#allocation4 + $0x38] sm:$0xff] }
 0x340   : > { %1247 = vst.msk [vmem:[#allocation4 + $0x58] sm:$0xff] %vm327_vm0, %v1231_v48  ;;  %v1308_v40 = vld [vmem:[#allocation4 + $0x28] sm:$0xff] }
 0x341   : > { %1245 = vst.msk [vmem:[#allocation4 + $0x48] sm:$0xff] %vm327_vm0, %v1229_v59 }
 0x343   : > { %v1702_v8 = vpop.f32.mrb[12].mxu1 }
 0x344   : > { %v1234_v13 = vadd.f32 %v1702_v8, %v1065_v2  ;;  %v1205_v14 = vpop.f32.mrb[13].mxu1 }
 0x345   : > { %v1232_v0 = vadd.f32 %v1205_v14, %v1063_v5  ;;  %v1703_v4 = vpop.f32.mrb[14].mxu1  ;;  %v1313_v55 = vld [vmem:[#allocation4 + $0x50] sm:$0xff] }
 0x346   : > { %1250 = vst.msk [vmem:[#allocation4 + $0x70] sm:$0xff] %vm327_vm0, %v1234_v13  ;;  %v1235_v23 = vadd.f32 %v1703_v4, %v1066_v11  ;;  %v1208_v49 = vpop.f32.mrb[15].mxu1  ;;  %v1311_v37 = vld [vmem:[#allocation4 + $0x40] sm:$0xff] }
 0x347   : > { %1248 = vst.msk [vmem:[#allocation4 + $0x60] sm:$0xff] %vm327_vm0, %v1232_v0  ;;  %v1233_v16 = vadd.f32 %v1208_v49, %v1064_v21  ;;  %v1314_v38 = vld [vmem:[#allocation4 + $0x58] sm:$0xff] }
 0x348   : > { %1251 = vst.msk [vmem:[#allocation4 + $0x78] sm:$0xff] %vm327_vm0, %v1235_v23  ;;  %v1312_v31 = vld [vmem:[#allocation4 + $0x48] sm:$0xff] }
 0x349   : > { %1249 = vst.msk [vmem:[#allocation4 + $0x68] sm:$0xff] %vm327_vm0, %v1233_v16 }
 0x34d   : > { %v1317_v36 = vld [vmem:[#allocation4 + $0x70] sm:$0xff] }
 0x34e   : > { %v1315_v1 = vld [vmem:[#allocation4 + $0x60] sm:$0xff] }
 0x34f   : > { %v1318_v50 = vld [vmem:[#allocation4 + $0x78] sm:$0xff] }
 0x350   : > { %v1316_v53 = vld [vmem:[#allocation4 + $0x68] sm:$0xff] }
 0x367   : > { %v1332_v54 = vpop.permute.xlu1 %1331 }
 0x368   : > { %v1401_v56 = vmul.f32 %v1332_v54, %v1305_v39 }
 0x36a   : > { %1417 = vst.msk [vmem:[%s2401_s29 + $0x10] sm:$0xff] %vm327_vm0, %v1401_v56 }
 0x36b   : > { %v1322_v35 = vpop.permute.xlu1 %1321 }
 0x36c   : > { %v1399_v17 = vmul.f32 %v1322_v35, %v1303_v12  ;;  %v1337_v19 = vpop.permute.xlu0 %1336 }
 0x36d   : > { %v1402_v6 = vmul.f32 %v1337_v19, %v1306_v22 }
 0x36e   : > { %1415 = vst.msk [vmem:[%s2401_s29] sm:$0xff] %vm327_vm0, %v1399_v17 }
 0x36f   : > { %1418 = vst.msk [vmem:[%s2401_s29 + $0x18] sm:$0xff] %vm327_vm0, %v1402_v6 }
 0x370   : > { %v1327_v10 = vpop.permute.xlu0 %1326 }
 0x371   : > { %v1400_v20 = vmul.f32 %v1327_v10, %v1304_v42 }
 0x373   : > { %1416 = vst.msk [vmem:[%s2401_s29 + $0x8] sm:$0xff] %vm327_vm0, %v1400_v20 }
 0x374   : > { %v1352_v33 = vpop.permute.xlu1 %1351 }
 0x375   : > { %v1405_v30 = vmul.f32 %v1352_v33, %v1309_v44 }
 0x377   : > { %1421 = vst.msk [vmem:[%s2401_s29 + $0x30] sm:$0xff] %vm327_vm0, %v1405_v30 }
 0x378   : > { %v1342_v47 = vpop.permute.xlu1 %1341 }
 0x379   : > { %v1403_v29 = vmul.f32 %v1342_v47, %v1307_v25 }
 0x37b   : > { %1419 = vst.msk [vmem:[%s2401_s29 + $0x20] sm:$0xff] %vm327_vm0, %v1403_v29 }
 0x380   : > { %v1357_v41 = vpop.permute.xlu0 %1356 }
 0x381   : > { %v1406_v26 = vmul.f32 %v1357_v41, %v1310_v7 }
 0x383   : > { %1422 = vst.msk [vmem:[%s2401_s29 + $0x38] sm:$0xff] %vm327_vm0, %v1406_v26 }
 0x384   : > { %v1347_v32 = vpop.permute.xlu0 %1346 }
 0x385   : > { %v1404_v43 = vmul.f32 %v1347_v32, %v1308_v40 }
 0x387   : > { %1420 = vst.msk [vmem:[%s2401_s29 + $0x28] sm:$0xff] %vm327_vm0, %v1404_v43 }
 0x388   : > { %v1372_v58 = vpop.permute.xlu1 %1371 }
 0x389   : > { %v1377_v27 = vpop.permute.xlu0 %1376  ;;  %v1409_v24 = vmul.f32 %v1372_v58, %v1313_v55 }
 0x38a   : > { %v1410_v18 = vmul.f32 %v1377_v27, %v1314_v38 }
 0x38b   : > { %1425 = vst.msk [vmem:[%s2401_s29 + $0x50] sm:$0xff] %vm327_vm0, %v1409_v24 }
 0x38c   : > { %1426 = vst.msk [vmem:[%s2401_s29 + $0x58] sm:$0xff] %vm327_vm0, %v1410_v18  ;;  %v1362_v62 = vpop.permute.xlu1 %1361 }
 0x38d   : > { %v1367_v9 = vpop.permute.xlu0 %1366  ;;  %v1407_v3 = vmul.f32 %v1362_v62, %v1311_v37 }
 0x38e   : > { %v1408_v34 = vmul.f32 %v1367_v9, %v1312_v31 }
 0x38f   : > { %1423 = vst.msk [vmem:[%s2401_s29 + $0x40] sm:$0xff] %vm327_vm0, %v1407_v3 }
 0x390   : > { %1424 = vst.msk [vmem:[%s2401_s29 + $0x48] sm:$0xff] %vm327_vm0, %v1408_v34  ;;  %v1382_v15 = vpop.permute.xlu1 %1381 }
 0x391   : > { %v1411_v28 = vmul.f32 %v1382_v15, %v1315_v1 }
 0x393   : > { %1427 = vst.msk [vmem:[%s2401_s29 + $0x60] sm:$0xff] %vm327_vm0, %v1411_v28 }
 0x394   : > { %v1392_v60 = vpop.permute.xlu1 %1391 }
 0x395   : > { %v1387_v45 = vpop.permute.xlu0 %1386  ;;  %v1413_v48 = vmul.f32 %v1392_v60, %v1317_v36 }
 0x396   : > { %v1412_v46 = vmul.f32 %v1387_v45, %v1316_v53 }
 0x397   : > { %1429 = vst.msk [vmem:[%s2401_s29 + $0x70] sm:$0xff] %vm327_vm0, %v1413_v48 }
 0x398   : > { %1428 = vst.msk [vmem:[%s2401_s29 + $0x68] sm:$0xff] %vm327_vm0, %v1412_v46 }
 0x399   : > { %v1397_v52 = vpop.permute.xlu0 %1396 }
 0x39a   : > { %v1414_v59 = vmul.f32 %v1397_v52, %v1318_v50 }
 0x39c   : > { %1430 = vst.msk [vmem:[%s2401_s29 + $0x78] sm:$0xff] %vm327_vm0, %v1414_v59 }
 0x39d PF: > { %s13_s14 = sadd.s32 1, %s1883_s14   ;;  %s2462_s12 = smov %s1879_s13 }
 0x39e   : > { %p10_p5 = scmp.ge.s32.totalorder %s13_s14, 4   ;;  %s2463_s13 = smov %s2465_s15 }
 0x3a0   :  { %12 = sbr.rel (!%p10_p5) target bundleno = 2 (0x2), region = 76 }

// kernel: _lambda_.6
= control target key start
LH: loop header
LB: loop body
LE: loop exit
PB: predicated region body
PF: predicated region fallthrough
CT: control target
= control target key end

     0   :  { %s934_s12 = smov 0   ;;  %s936_s13 = smov 0   ;;  %s1038_s0 = inlined_call_operand.vmem [shape: bf16[2,32,32], index: 0, kind: input, shape index: {}]   ;;  %s1039_s1 = inlined_call_operand.vmem [shape: bf16[2,32,32], index: 1, kind: input, shape index: {}]   ;;  %s1040_s2 = inlined_call_operand.vmem [shape: bf16[2,32,32], index: 2, kind: input, shape index: {}]   ;;  %s1041_s3 = inlined_call_operand.vmem [shape: f32[2,32,32], index: 3, kind: output, shape index: {}]  }
   0x1   :  { %s938_s14 = smov 0  }
   0x2 LB: > { %s32_s15 = sadd.s32 1, %s905_s13  ;;  %p777_p0 = scmp.ge.s32.totalorder %s909_s14, 1  ;;  %s909_s14 = sphi %s938_s14, %s13_s14   ;;  %s905_s13 = sphi %s936_s13, %s1043_s13   ;;  %s901_s12 = sphi %s934_s12, %s1042_s12  }
   0x3   : > { %p34_p1 = scmp.ge.s32.totalorder %s32_s15, 2  ;;  %p199_p2 = scmp.lt.s32.totalorder %s909_s14, 3 }
   0x5   : > { %s1045_s15 = smov (%p34_p1, %s32_s15), 0  ;;  %p200_p3 = pnand %p777_p0, %p199_p2 }
   0x6   : > { %p250_p4 = scmp.lt.s32.totalorder (!%p200_p3), %s901_s12, 1  ;;  %vm303_vm0 = vcmask (!%p200_p3), 261120   ;;  %vm294_vm1 = vcmask (!%p200_p3), 7168   ;;  %v911_v6 = vmov (!%p200_p3), -1e+30   ;;  %v912_v15 = vmov (!%p200_p3), 0  }
   0x7   : > { %203 = sbr.rel (%p200_p3) target bundleno = 839 (0x347), region = 32  ;;  %297 = vst.msk [vmem:[#allocation2 + $0x10] sm:$0xff] (!%p200_p3), %vm294_vm1, %v911_v6  ;;  %295 = vst.msk [vmem:[#allocation2] sm:$0xff] (!%p200_p3), %vm294_vm1, %v911_v6  ;;  %856 = vset.pattern.permute.xlu1 (!%p200_p3), %v912_v15  ;;  %855 = vset.pattern.permute.xlu0 (!%p200_p3), %v912_v15  ;;  %v913_v16 = vmov (!%p200_p3), 0.0  }
   0x8   : > { %296 = vst.msk [vmem:[#allocation2 + $0x8] sm:$0xff] (!%p200_p3), %vm294_vm1, %v911_v6  ;;  %298 = vst.msk [vmem:[#allocation2 + $0x18] sm:$0xff] (!%p200_p3), %vm294_vm1, %v911_v6 }
   0x9   : > { %299 = vst.msk [vmem:[#allocation3] sm:$0xff] (!%p200_p3), %vm294_vm1, %v913_v16  ;;  %300 = vst.msk [vmem:[#allocation3 + $0x8] sm:$0xff] (!%p200_p3), %vm294_vm1, %v913_v16 }
   0xa   : > { %301 = vst.msk [vmem:[#allocation3 + $0x10] sm:$0xff] (!%p200_p3), %vm294_vm1, %v913_v16  ;;  %302 = vst.msk [vmem:[#allocation3 + $0x18] sm:$0xff] (!%p200_p3), %vm294_vm1, %v913_v16 }
   0xb   : > { %304 = vst.msk [vmem:[#allocation4] sm:$0xff] (!%p200_p3), %vm303_vm0, %v913_v16  ;;  %305 = vst.msk [vmem:[#allocation4 + $0x8] sm:$0xff] (!%p200_p3), %vm303_vm0, %v913_v16 }
   0xc   : > { %306 = vst.msk [vmem:[#allocation4 + $0x10] sm:$0xff] (!%p200_p3), %vm303_vm0, %v913_v16  ;;  %307 = vst.msk [vmem:[#allocation4 + $0x18] sm:$0xff] (!%p200_p3), %vm303_vm0, %v913_v16 }
   0xe   : > { %s1047_s12 = smov (!%p250_p4, %s901_s12), 1  ;;  %v990_v17 = vld [vmem:[#allocation2 + $0x10] sm:$0xff]  ;;  %v402_v18 = vld [vmem:[#allocation2] sm:$0xff] }
   0xf   : > { %s955_s16 = sshll.u32 %s1047_s12, 4  ;;  %v993_v23 = vld [vmem:[#allocation2 + $0x18] sm:$0xff]  ;;  %v403_v25 = vld [vmem:[#allocation2 + $0x8] sm:$0xff]  ;;  %s801_s26 = sshll.u32 %s1047_s12, 5 }
  0x10   : > { %s267_s19 = scalar_lea.vmem %s1039_s1, %s955_s16  ;;  %s257_s22 = scalar_lea.vmem %s1038_s0, %s955_s16 }
  0x11   : > { %v857_v0 = vld [vmem:[%s267_s19] sm:$0xff]   ;;  %v858_v1 = vld [vmem:[%s267_s19 + $0x8] sm:$0xff]   ;;  %s277_s25 = scalar_lea.vmem %s1040_s2, %s955_s16  ;;  %s287_s29 = scalar_lea.vmem %s1041_s3, %s801_s26 }
  0x12   : > { %826 = vmatprep.subr.msk.bf16.mxu0 %vm303_vm0, %v857_v0  ;;  %v348_v2 = vsel %vm303_vm0, %v857_v0, 0  ;;  %v859_v3 = vld [vmem:[%s257_s22] sm:$0xff]   ;;  %v351_v4 = vsel %vm303_vm0, %v858_v1, 0  ;;  %v860_v5 = vld [vmem:[%s257_s22 + $0x8] sm:$0xff]  }
  0x13   : > { %811 = vmatpush3.bf16.xpose.msra.mxu0 %v348_v2  ;;  %814 = vmatprep.mubr.msk.bf16.mxu0 %vm303_vm0, %v859_v3  ;;  %v861_v33 = vld [vmem:[%s277_s25] sm:$0xff]   ;;  %v862_v34 = vld [vmem:[%s277_s25 + $0x8] sm:$0xff]  }
  0x14   : > { %827 = vmatprep.subr.msk.bf16.mxu0 %vm303_vm0, %v858_v1  ;;  %818 = vmatprep.subr.bf16.mxu1 %v861_v33  ;;  %v466_v1 = vld [vmem:[#allocation3] sm:$0xff] }
  0x15   : > { %819 = vmatpush3.bf16.msra.mxu1 %v861_v33 }
  0x16   : > { %820 = vmatprep.subr.bf16.mxu1 %v862_v34 }
  0x19   : > { %821 = vmatpush3.bf16.msra.mxu1 %v862_v34 }
  0x1b   : > { %813 = vmatpush3.bf16.xpose.msra.mxu0 %v351_v4  ;;  %v468_v4 = vld [vmem:[#allocation3 + $0x10] sm:$0xff] }
  0x22   : > { %815 = vmatmul.mubr.msk.bf16.vlgmr.msra.gmra.mrb[0].mxu0 %vm303_vm0, %v860_v5  ;;  %v467_v5 = vld [vmem:[#allocation3 + $0x8] sm:$0xff] }
  0xf5   : > { %v816_v7 = vpop.f32.mrb[0].mxu0 }
  0xf6   : > { %v387_v8 = vpop.f32.mrb[1].mxu0  ;;  %v412_v9 = vsel %vm303_vm0, %v816_v7, -inf }
  0xf7   : > { %413 = vmax.xlane.f32.xlu1 %v412_v9  ;;  %v976_v10 = vpop.f32.mrb[2].mxu0  ;;  %v406_v11 = vsel %vm303_vm0, %v387_v8, -inf }
  0xf8   : > { %407 = vmax.xlane.f32.xlu0 %v406_v11  ;;  %v390_v12 = vpop.f32.mrb[3].mxu0  ;;  %v415_v13 = vsel %vm303_vm0, %v976_v10, -inf  ;;  %v469_v11 = vld [vmem:[#allocation3 + $0x18] sm:$0xff] }
  0xf9   : > { %v409_v14 = vsel %vm303_vm0, %v390_v12, -inf }
  0xfb   : > { %416 = vmax.xlane.f32.xlu1 %v415_v13 }
  0xfc   : > { %410 = vmax.xlane.f32.xlu0 %v409_v14 }
 0x184   : > { %v414_v19 = vpop.xlane.xlu1 %413 }
 0x185   : > { %v420_v20 = vmax.f32 %v990_v17, %v414_v19  ;;  %v408_v21 = vpop.xlane.xlu0 %407 }
 0x186   : > { %v418_v22 = vmax.f32 %v402_v18, %v408_v21 }
 0x187   : > { %v424_v24 = vsub.f32 %v990_v17, %v420_v20  ;;  %602 = vst.msk [vmem:[#allocation2 + $0x10] sm:$0xff] %vm294_vm1, %v420_v20  ;;  %446 = vperm.xlu1 %856, %v420_v20  }
 0x188   : > { %v422_v26 = vsub.f32 %v402_v18, %v418_v22  ;;  %600 = vst.msk [vmem:[#allocation2] sm:$0xff] %vm294_vm1, %v418_v22  ;;  %v417_v27 = vpop.xlane.xlu1 %416  ;;  %436 = vperm.xlu0 %855, %v418_v22  }
 0x189   : > { %v421_v28 = vmax.f32 %v993_v23, %v417_v27  ;;  %v411_v29 = vpop.xlane.xlu0 %410  ;;  %v430_v59 = vmul.f32 1.442695, %v424_v24  ;;  %v497_v27 = vld [vmem:[#allocation4 + $0x10] sm:$0xff] }
 0x18a   : > { %v419_v30 = vmax.f32 %v403_v25, %v411_v29  ;;  %v426_v57 = vmul.f32 1.442695, %v422_v26  ;;  %v498_v29 = vld [vmem:[#allocation4 + $0x18] sm:$0xff] }
 0x18b   : > { %v425_v31 = vsub.f32 %v993_v23, %v421_v28  ;;  %603 = vst.msk [vmem:[#allocation2 + $0x18] sm:$0xff] %vm294_vm1, %v421_v28 }
 0x18c   : > { %v423_v32 = vsub.f32 %v403_v25, %v419_v30  ;;  %601 = vst.msk [vmem:[#allocation2 + $0x8] sm:$0xff] %vm294_vm1, %v419_v30  ;;  %441 = vperm.xlu1 %856, %v419_v30  }
 0x18d   : > { %v432_v60 = vmul.f32 1.442695, %v425_v31  ;;  %v496_v31 = vld [vmem:[#allocation4 + $0x8] sm:$0xff] }
 0x18e   : > { %v428_v58 = vmul.f32 1.442695, %v423_v32 }
 0x190   : > { %451 = vperm.xlu1 %856, %v421_v28   ;;  %v495_v28 = vld [vmem:[#allocation4] sm:$0xff] }
 0x206   : > { %v447_v35 = vpop.permute.xlu1 %446 }
 0x207   : > { %v456_v36 = vsub.f32 %v816_v7, %v447_v35  ;;  %v437_v37 = vpop.permute.xlu0 %436 }
 0x208   : > { %v454_v38 = vsub.f32 %v387_v8, %v437_v37 }
 0x209   : > { %v462_v39 = vmul.f32 1.442695, %v456_v36 }
 0x20a   : > { %v458_v40 = vmul.f32 1.442695, %v454_v38 }
 0x20b   : > { %v442_v41 = vpop.permute.xlu1 %441 }
 0x20c   : > { %863 = vpow2.f32 %v458_v40  ;;  %v455_v42 = vsub.f32 %v390_v12, %v442_v41 }
 0x20d   : > { %865 = vpow2.f32 %v462_v39 }
 0x20e   : > { %v460_v43 = vmul.f32 1.442695, %v455_v42 }
 0x20f   : > { %v452_v44 = vpop.permute.xlu1 %451 }
 0x210   : > { %867 = vpow2.f32 %v460_v43  ;;  %v457_v45 = vsub.f32 %v976_v10, %v452_v44 }
 0x212   : > { %v464_v46 = vmul.f32 1.442695, %v457_v45 }
 0x214   : > { %869 = vpow2.f32 %v464_v46 }
 0x215   : > { %871 = vpow2.f32 %v426_v57 }
 0x216   : > { %v864_v47 = vpop.eup %863  ;;  %873 = vpow2.f32 %v428_v58 }
 0x217   : > { %v474_v48 = vsel %vm303_vm0, %v864_v47, 0.0  ;;  %v866_v49 = vpop.eup %865  ;;  %875 = vpow2.f32 %v430_v59 }
 0x218   : > { %475 = vadd.xlane.f32.xlu1 %v474_v48  ;;  %v480_v52 = vsel %vm303_vm0, %v866_v49, 0.0  ;;  %877 = vpow2.f32 %v432_v60 }
 0x21a   : > { %v868_v50 = vpop.eup %867 }
 0x21b   : > { %v477_v51 = vsel %vm303_vm0, %v868_v50, 0.0  ;;  %v523_v53 = vpack.c.bf16 %v868_v50, %v864_v47 }
 0x21c   : > { %478 = vadd.xlane.f32.xlu0 %v477_v51  ;;  %481 = vadd.xlane.f32.xlu1 %v480_v52 }
 0x21d   : > { %822 = vmatprep.mubr.msk.bf16.mxu1 %vm303_vm0, %v523_v53 }
 0x21e   : > { %v870_v54 = vpop.eup %869 }
 0x21f   : > { %v483_v55 = vsel %vm303_vm0, %v870_v54, 0.0  ;;  %v524_v56 = vpack.c.bf16 %v870_v54, %v866_v49  ;;  %v872_v61 = vpop.eup %871 }
 0x220   : > { %484 = vadd.xlane.f32.xlu1 %v483_v55  ;;  %v874_v62 = vpop.eup %873  ;;  %v470_v2 = vmul.f32 %v872_v61, %v466_v1 }
 0x221   : > { %823 = vmatmul.mubr.msk.bf16.vlgmr.msra.gmra.mrb[0].mxu1 %vm303_vm0, %v524_v56  ;;  %v876_v63 = vpop.eup %875  ;;  %v471_v8 = vmul.f32 %v874_v62, %v467_v5 }
 0x222   : > { %v878_v0 = vpop.eup %877  ;;  %v472_v7 = vmul.f32 %v876_v63, %v468_v4 }
 0x223   : > { %v473_v14 = vmul.f32 %v878_v0, %v469_v11 }
 0x231   : > { %501 = vperm.xlu1 %856, %v872_v61  }
 0x232   : > { %506 = vperm.xlu0 %855, %v874_v62  }
 0x235   : > { %511 = vperm.xlu1 %856, %v876_v63  }
 0x239   : > { %516 = vperm.xlu1 %856, %v878_v0  }
 0x2a5   : > { %v476_v3 = vpop.xlane.xlu1 %475 }
 0x2a6   : > { %v486_v6 = vadd.f32 %v476_v3, %v470_v2 }
 0x2a8   : > { %491 = vst.msk [vmem:[#allocation3] sm:$0xff] %vm294_vm1, %v486_v6 }
 0x2a9   : > { %v482_v9 = vpop.xlane.xlu1 %481  ;;  %v479_v10 = vpop.xlane.xlu0 %478 }
 0x2aa   : > { %v488_v12 = vadd.f32 %v482_v9, %v472_v7  ;;  %v487_v13 = vadd.f32 %v479_v10, %v471_v8 }
 0x2ac   : > { %493 = vst.msk [vmem:[#allocation3 + $0x10] sm:$0xff] %vm294_vm1, %v488_v12  ;;  %492 = vst.msk [vmem:[#allocation3 + $0x8] sm:$0xff] %vm294_vm1, %v487_v13 }
 0x2ad   : > { %v485_v15 = vpop.xlane.xlu1 %484 }
 0x2ae   : > { %v489_v16 = vadd.f32 %v485_v15, %v473_v14 }
 0x2af   : > { %v607_v17 = vld [vmem:[#allocation3] sm:$0xff] }
 0x2b0   : > { %494 = vst.msk [vmem:[#allocation3 + $0x18] sm:$0xff] %vm294_vm1, %v489_v16  ;;  %879 = vrcp.f32 %v607_v17 }
 0x2b1   : > { %v502_v25 = vpop.permute.xlu1 %501  ;;  %v507_v32 = vpop.permute.xlu0 %506 }
 0x2b2   : > { %v519_v34 = vmul.f32 %v502_v25, %v495_v28  ;;  %v520_v39 = vmul.f32 %v507_v32, %v496_v31 }
 0x2b3   : > { %v609_v18 = vld [vmem:[#allocation3 + $0x10] sm:$0xff]  ;;  %v608_v19 = vld [vmem:[#allocation3 + $0x8] sm:$0xff] }
 0x2b4   : > { %881 = vrcp.f32 %v609_v18 }
 0x2b5   : > { %883 = vrcp.f32 %v608_v19  ;;  %v512_v26 = vpop.permute.xlu1 %511 }
 0x2b6   : > { %v521_v33 = vmul.f32 %v512_v26, %v497_v27 }
 0x2b7   : > { %v610_v20 = vld [vmem:[#allocation3 + $0x18] sm:$0xff] }
 0x2b8   : > { %885 = vrcp.f32 %v610_v20 }
 0x2b9   : > { %v517_v30 = vpop.permute.xlu1 %516 }
 0x2ba   : > { %v880_v21 = vpop.eup %879  ;;  %v522_v36 = vmul.f32 %v517_v30, %v498_v29 }
 0x2bb   : > { %621 = vperm.xlu1 %856, %v880_v21  }
 0x2be   : > { %v882_v22 = vpop.eup %881 }
 0x2bf   : > { %v884_v23 = vpop.eup %883  ;;  %631 = vperm.xlu1 %856, %v882_v22  }
 0x2c0   : > { %626 = vperm.xlu0 %855, %v884_v23  }
 0x2c2   : > { %v886_v24 = vpop.eup %885 }
 0x2c4   : > { %636 = vperm.xlu0 %855, %v886_v24  }
 0x2f4   : > { %v824_v35 = vpop.f32.mrb[0].mxu1 }
 0x2f5   : > { %v594_v37 = vadd.f32 %v824_v35, %v521_v33  ;;  %v577_v38 = vpop.f32.mrb[1].mxu1 }
 0x2f6   : > { %v592_v40 = vadd.f32 %v577_v38, %v519_v34  ;;  %v825_v41 = vpop.f32.mrb[2].mxu1 }
 0x2f7   : > { %598 = vst.msk [vmem:[#allocation4 + $0x10] sm:$0xff] %vm303_vm0, %v594_v37  ;;  %v595_v42 = vadd.f32 %v825_v41, %v522_v36  ;;  %v580_v43 = vpop.f32.mrb[3].mxu1 }
 0x2f8   : > { %596 = vst.msk [vmem:[#allocation4] sm:$0xff] %vm303_vm0, %v592_v40  ;;  %v593_v44 = vadd.f32 %v580_v43, %v520_v39 }
 0x2f9   : > { %599 = vst.msk [vmem:[#allocation4 + $0x18] sm:$0xff] %vm303_vm0, %v595_v42 }
 0x2fa   : > { %597 = vst.msk [vmem:[#allocation4 + $0x8] sm:$0xff] %vm303_vm0, %v593_v44 }
 0x2fe   : > { %v617_v48 = vld [vmem:[#allocation4 + $0x10] sm:$0xff] }
 0x2ff   : > { %v615_v45 = vld [vmem:[#allocation4] sm:$0xff] }
 0x300   : > { %v618_v54 = vld [vmem:[#allocation4 + $0x18] sm:$0xff] }
 0x301   : > { %v616_v51 = vld [vmem:[#allocation4 + $0x8] sm:$0xff] }
 0x33a   : > { %v622_v46 = vpop.permute.xlu1 %621 }
 0x33b   : > { %v639_v47 = vmul.f32 %v622_v46, %v615_v45 }
 0x33d   : > { %643 = vst.msk [vmem:[%s287_s29] sm:$0xff] %vm303_vm0, %v639_v47 }
 0x33e   : > { %v632_v49 = vpop.permute.xlu1 %631 }
 0x33f   : > { %v641_v50 = vmul.f32 %v632_v49, %v617_v48  ;;  %v627_v52 = vpop.permute.xlu0 %626 }
 0x340   : > { %v640_v53 = vmul.f32 %v627_v52, %v616_v51 }
 0x341   : > { %645 = vst.msk [vmem:[%s287_s29 + $0x10] sm:$0xff] %vm303_vm0, %v641_v50 }
 0x342   : > { %644 = vst.msk [vmem:[%s287_s29 + $0x8] sm:$0xff] %vm303_vm0, %v640_v53 }
 0x343   : > { %v637_v55 = vpop.permute.xlu0 %636 }
 0x344   : > { %v642_v56 = vmul.f32 %v637_v55, %v618_v54 }
 0x346   : > { %646 = vst.msk [vmem:[%s287_s29 + $0x18] sm:$0xff] %vm303_vm0, %v642_v56 }
 0x347 PF: > { %s13_s14 = sadd.s32 1, %s909_s14   ;;  %s1042_s12 = smov %s905_s13 }
 0x348   : > { %p10_p5 = scmp.ge.s32.totalorder %s13_s14, 4   ;;  %s1043_s13 = smov %s1045_s15 }
 0x34a   :  { %12 = sbr.rel (!%p10_p5) target bundleno = 2 (0x2), region = 76 }

// kernel: _lambda_.7
= control target key start
LH: loop header
LB: loop body
LE: loop exit
PB: predicated region body
PF: predicated region fallthrough
CT: control target
= control target key end

     0   :  { %s5505_s12 = smov 0   ;;  %s5507_s13 = smov 0   ;;  %s6561_s0 = inlined_call_operand.vmem [shape: f32[4,1,18,18,4], index: 0, kind: input, shape index: {}]   ;;  %s6562_s1 = inlined_call_operand.vmem [shape: f32[9,4,128], index: 1, kind: input, shape index: {}]   ;;  %s6563_s2 = inlined_call_operand.vmem [shape: f32[1,128], index: 2, kind: input, shape index: {}]   ;;  %s6564_s3 = inlined_call_operand.vmem [shape: f32[4,16,16,128], index: 3, kind: output, shape index: {}]  }
   0x1   :  { %s5509_s14 = smov 0  }
   0x2 LB: > { %s25_s15 = sadd.s32 1, %s5479_s13  ;;  %p3926_p0 = scmp.ge.s32.totalorder %s5483_s14, 1  ;;  %s5483_s14 = sphi %s5509_s14, %s13_s14   ;;  %s5479_s13 = sphi %s5507_s13, %s6675_s13   ;;  %s5475_s12 = sphi %s5505_s12, %s6674_s12  }
   0x3   : > { %p27_p1 = scmp.ge.s32.totalorder %s25_s15, 4  ;;  %p157_p2 = scmp.lt.s32.totalorder %s5483_s14, 5 }
   0x5   : > { %s6677_s15 = smov (%p27_p1, %s25_s15), 0  ;;  %p158_p3 = pnand %p3926_p0, %p157_p2 }
   0x7   : > { %161 = sbr.rel (%p158_p3) target bundleno = 527 (0x20f), region = 32 }
   0xe   : > { %v3930_v0 = vld [vmem:[%s6562_s1 + $0x4] sm:$0xf]  ;;  %vm374_vm0 = vcmask 1043456   ;;  %v5529_v1 = vld [vmem:[%s6562_s1 + $0x10] sm:$0xf]  ;;  %p190_p4 = scmp.lt.s32.totalorder %s5475_s12, 3 }
   0xf   : > { %4728 = vmatprep.subr.msk.mxu1 %vm374_vm0, %v3930_v0  ;;  %4928 = vmatprep.subr.msk.mxu0 %vm374_vm0, %v5529_v1  ;;  %v242_v2 = vld [vmem:[%s6562_s1] sm:$0xf]  ;;  %v4195_v3 = vld [vmem:[%s6562_s1 + $0x14] sm:$0xf]  ;;  %vm277_vm1 = vcmask 31744  }
  0x10   : > { %4729 = vmatpush3.msk.msra.mxu1 %vm374_vm0, %v3930_v0  ;;  %4929 = vmatpush3.msk.msra.mxu0 %vm374_vm0, %v5529_v1  ;;  %s6679_s12 = smov (!%p190_p4, %s5475_s12), 3  ;;  %v4261_v9 = vld [vmem:[%s6562_s1 + $0x18] sm:$0xf]  ;;  %v5570_v10 = vld [vmem:[%s6562_s1 + $0x8] sm:$0xf] }
  0x11   : > { %4778 = vmatprep.subr.msk.mxu1 %vm374_vm0, %v242_v2  ;;  %4978 = vmatprep.subr.msk.mxu0 %vm374_vm0, %v4195_v3  ;;  %s5436_s24 = smul.u32 432, %s6679_s12  ;;  %v5689_v28 = vld [vmem:[%s6562_s1 + $0x1c] sm:$0xf]  ;;  %v5852_v61 = vld [vmem:[%s6562_s1 + $0xc] sm:$0xf]  ;;  %s4430_s17 = sshll.u32 %s6679_s12, 8 }
  0x12   : > { %s6481_s20 = scalar_lea.vmem %s6564_s3, %s4430_s17 }
  0x13   : > { %s5551_s27 = scalar_lea.vmem %s6561_s0, %s5436_s24 }
  0x14   : > { %v243_v4 = vld [vmem:[%s5551_s27 + $0x1] sm:$0xff]  ;;  %v4097_v5 = vld [vmem:[%s5551_s27 + $0x19] sm:$0xff]  ;;  %v244_v6 = vld [vmem:[%s5551_s27 + $0x9] sm:$0xff] }
  0x15   : > { %4730 = vmatprep.mubr.msk.f32.mxu1 %vm277_vm1, %v243_v4  ;;  %4930 = vmatprep.mubr.msk.f32.mxu0 %vm277_vm1, %v4097_v5  ;;  %v4098_v7 = vld [vmem:[%s5551_s27 + $0x21] sm:$0xff]  ;;  %v5560_v8 = vld [vmem:[%s5551_s27 + $0x31] sm:$0xff]  ;;  %v5575_v11 = vld [vmem:[%s5551_s27 + $0x39] sm:$0xff] }
  0x16   : > { %4731 = vmatmul.mubr.msk.f32.vlgmr.msra.gmra.mrb[0].mxu1 %vm277_vm1, %v244_v6  ;;  %4931 = vmatmul.mubr.msk.f32.vlgmr.msra.gmra.mrb[0].mxu0 %vm277_vm1, %v4098_v7  ;;  %v5581_v12 = vld [vmem:[%s5551_s27 + $0x49] sm:$0xff]  ;;  %v5594_v13 = vld [vmem:[%s5551_s27 + $0x51] sm:$0xff]  ;;  %v5597_v14 = vld [vmem:[%s5551_s27 + $0x61] sm:$0xff] }
  0x17   : > { %4779 = vmatpush3.msk.msra.mxu1 %vm374_vm0, %v242_v2  ;;  %4979 = vmatpush3.msk.msra.mxu0 %vm374_vm0, %v4195_v3  ;;  %v5608_v15 = vld [vmem:[%s5551_s27 + $0x69] sm:$0xff]  ;;  %v5611_v16 = vld [vmem:[%s5551_s27 + $0x79] sm:$0xff]  ;;  %v5622_v17 = vld [vmem:[%s5551_s27 + $0x81] sm:$0xff] }
  0x18   : > { %4733 = vmatprep.mubr.msk.f32.mxu1 %vm277_vm1, %v4097_v5  ;;  %4933 = vmatprep.mubr.msk.f32.mxu0 %vm277_vm1, %v5560_v8  ;;  %v5625_v18 = vld [vmem:[%s5551_s27 + $0x91] sm:$0xff]  ;;  %v5636_v19 = vld [vmem:[%s5551_s27 + $0x99] sm:$0xff]  ;;  %v5639_v20 = vld [vmem:[%s5551_s27 + $0xa9] sm:$0xff] }
  0x19   : > { %5028 = vmatprep.subr.msk.mxu0 %vm374_vm0, %v4261_v9  ;;  %4828 = vmatprep.subr.msk.mxu1 %vm374_vm0, %v5570_v10  ;;  %v5650_v21 = vld [vmem:[%s5551_s27 + $0xb1] sm:$0xff]  ;;  %v5653_v22 = vld [vmem:[%s5551_s27 + $0xc1] sm:$0xff]  ;;  %v5664_v23 = vld [vmem:[%s5551_s27 + $0xc9] sm:$0xff] }
  0x1a   : > { %4734 = vmatmul.mubr.msk.f32.gmra.mrb[2].mxu1 %vm277_vm1, %v4098_v7  ;;  %4934 = vmatmul.mubr.msk.f32.gmra.mrb[2].mxu0 %vm277_vm1, %v5575_v11  ;;  %v5667_v24 = vld [vmem:[%s5551_s27 + $0x1a] sm:$0xff]  ;;  %v5678_v25 = vld [vmem:[%s5551_s27 + $0x22] sm:$0xff]  ;;  %v5684_v27 = vld [vmem:[%s5551_s27 + $0x32] sm:$0xff] }
  0x1b   : > { %4736 = vmatprep.mubr.msk.f32.mxu1 %vm277_vm1, %v5560_v8  ;;  %4936 = vmatprep.mubr.msk.f32.mxu0 %vm277_vm1, %v5581_v12  ;;  %v5681_v26 = vld [vmem:[%s5551_s27 + $0xd9] sm:$0xff]  ;;  %v5699_v29 = vld [vmem:[%s5551_s27 + $0xe1] sm:$0xff]  ;;  %v5707_v31 = vld [vmem:[%s5551_s27 + $0xf1] sm:$0xff] }
  0x1c   : > { %6610 = vst [vmem:[#allocation2_spill] sm:$0xff] %v5699_v29  ;;  %v5702_v30 = vld [vmem:[%s5551_s27 + $0x3a] sm:$0xff]  ;;  %6611 = vst [vmem:[#allocation3_spill] sm:$0xff] %v5707_v31  ;;  %v5710_v32 = vld [vmem:[%s5551_s27 + $0x4a] sm:$0xff] }
  0x1d   : > { %v5723_v33 = vld [vmem:[%s5551_s27 + $0xf9] sm:$0xff]  ;;  %v5729_v35 = vld [vmem:[%s5551_s27 + $0x109] sm:$0xff]  ;;  %v5743_v37 = vld [vmem:[%s5551_s27 + $0x111] sm:$0xff] }
  0x1e   : > { %4737 = vmatmul.mubr.msk.f32.gmra.mrb[4].mxu1 %vm277_vm1, %v5575_v11  ;;  %4937 = vmatmul.mubr.msk.f32.gmra.mrb[4].mxu0 %vm277_vm1, %v5594_v13  ;;  %6612 = vst [vmem:[#allocation4_spill] sm:$0xff] %v5723_v33  ;;  %v5726_v34 = vld [vmem:[%s5551_s27 + $0x52] sm:$0xff]  ;;  %6613 = vst [vmem:[#allocation5_spill] sm:$0xff] %v5729_v35  ;;  %v5732_v36 = vld [vmem:[%s5551_s27 + $0x62] sm:$0xff] }
  0x1f   : > { %4739 = vmatprep.mubr.msk.f32.mxu1 %vm277_vm1, %v5581_v12  ;;  %4939 = vmatprep.mubr.msk.f32.mxu0 %vm277_vm1, %v5597_v14  ;;  %6614 = vst [vmem:[#allocation6_spill] sm:$0xff] %v5743_v37  ;;  %v5746_v38 = vld [vmem:[%s5551_s27 + $0x6a] sm:$0xff]  ;;  %v5749_v39 = vld [vmem:[%s5551_s27 + $0x121] sm:$0xff]  ;;  %v5769_v43 = vld [vmem:[%s5551_s27 + $0x139] sm:$0xff] }
  0x20   : > { %6615 = vst [vmem:[#allocation7_spill] sm:$0xff] %v5749_v39  ;;  %v5752_v40 = vld [vmem:[%s5551_s27 + $0x7a] sm:$0xff]  ;;  %v5763_v41 = vld [vmem:[%s5551_s27 + $0x129] sm:$0xff]  ;;  %6617 = vst [vmem:[#allocation9_spill] sm:$0xff] %v5769_v43 }
  0x21   : > { %6616 = vst [vmem:[#allocation8_spill] sm:$0xff] %v5763_v41  ;;  %v5766_v42 = vld [vmem:[%s5551_s27 + $0x82] sm:$0xff]  ;;  %v5772_v44 = vld [vmem:[%s5551_s27 + $0x92] sm:$0xff]  ;;  %v5786_v46 = vld [vmem:[%s5551_s27 + $0x9a] sm:$0xff] }
  0x22   : > { %4740 = vmatmul.mubr.msk.f32.gmra.mrb[6].mxu1 %vm277_vm1, %v5594_v13  ;;  %4940 = vmatmul.mubr.msk.f32.gmra.mrb[6].mxu0 %vm277_vm1, %v5608_v15  ;;  %v5783_v45 = vld [vmem:[%s5551_s27 + $0x141] sm:$0xff]  ;;  %v5789_v47 = vld [vmem:[%s5551_s27 + $0x151] sm:$0xff]  ;;  %v5803_v49 = vld [vmem:[%s5551_s27 + $0x159] sm:$0xff] }
  0x23   : > { %4742 = vmatprep.mubr.msk.f32.mxu1 %vm277_vm1, %v5597_v14  ;;  %4942 = vmatprep.mubr.msk.f32.mxu0 %vm277_vm1, %v5611_v16  ;;  %6618 = vst [vmem:[#allocation10_spill] sm:$0xff] %v5783_v45  ;;  %6619 = vst [vmem:[#allocation11_spill] sm:$0xff] %v5789_v47  ;;  %v5792_v48 = vld [vmem:[%s5551_s27 + $0xaa] sm:$0xff]  ;;  %v5806_v50 = vld [vmem:[%s5551_s27 + $0xb2] sm:$0xff] }
  0x24   : > { %6620 = vst [vmem:[#allocation12_spill] sm:$0xff] %v5803_v49  ;;  %v5809_v51 = vld [vmem:[%s5551_s27 + $0x169] sm:$0xff]  ;;  %v5823_v53 = vld [vmem:[%s5551_s27 + $0x171] sm:$0xff]  ;;  %v210_v55 = vld [vmem:[%s5551_s27] sm:$0xff] }
  0x25   : > { %6621 = vst [vmem:[#allocation13_spill] sm:$0xff] %v5809_v51  ;;  %v5812_v52 = vld [vmem:[%s5551_s27 + $0xc2] sm:$0xff]  ;;  %6622 = vst [vmem:[#allocation14_spill] sm:$0xff] %v5823_v53  ;;  %v5826_v54 = vld [vmem:[%s5551_s27 + $0xca] sm:$0xff] }
  0x26   : > { %4743 = vmatmul.mubr.msk.f32.gmra.mrb[8].mxu1 %vm277_vm1, %v5608_v15  ;;  %4943 = vmatmul.mubr.msk.f32.gmra.mrb[8].mxu0 %vm277_vm1, %v5622_v17  ;;  %v5830_v56 = vld [vmem:[%s5551_s27 + $0xda] sm:$0xff]  ;;  %v211_v57 = vld [vmem:[%s5551_s27 + $0x8] sm:$0xff]  ;;  %v5847_v60 = vld [vmem:[%s5551_s27 + $0xf2] sm:$0xff] }
  0x27   : > { %4745 = vmatprep.mubr.msk.f32.mxu1 %vm277_vm1, %v5611_v16  ;;  %4945 = vmatprep.mubr.msk.f32.mxu0 %vm277_vm1, %v5625_v18  ;;  %v5841_v58 = vld [vmem:[%s5551_s27 + $0xe2] sm:$0xff]  ;;  %v5844_v59 = vld [vmem:[%s5551_s27 + $0x18] sm:$0xff]  ;;  %v5870_v0 = vld [vmem:[%s5551_s27 + $0x30] sm:$0xff] }
  0x28   : > { %6623 = vst [vmem:[#allocation15_spill] sm:$0xff] %v5844_v59  ;;  %v5862_v62 = vld [vmem:[%s5551_s27 + $0x20] sm:$0xff]  ;;  %6625 = vst [vmem:[#allocation17_spill] sm:$0xff] %v5870_v0  ;;  %v5873_v2 = vld [vmem:[%s5551_s27 + $0x10a] sm:$0xff] }
  0x29   : > { %6624 = vst [vmem:[#allocation16_spill] sm:$0xff] %v5862_v62  ;;  %v5865_v63 = vld [vmem:[%s5551_s27 + $0xfa] sm:$0xff]  ;;  %v5889_v4 = vld [vmem:[%s5551_s27 + $0x112] sm:$0xff]  ;;  %v5892_v5 = vld [vmem:[%s5551_s27 + $0x48] sm:$0xff] }
  0x2a   : > { %4746 = vmatmul.mubr.msk.f32.gmra.mrb[10].mxu1 %vm277_vm1, %v5622_v17  ;;  %4946 = vmatmul.mubr.msk.f32.gmra.mrb[10].mxu0 %vm277_vm1, %v5636_v19  ;;  %v5886_v3 = vld [vmem:[%s5551_s27 + $0x38] sm:$0xff]  ;;  %6627 = vst [vmem:[#allocation19_spill] sm:$0xff] %v5892_v5  ;;  %v5895_v6 = vld [vmem:[%s5551_s27 + $0x122] sm:$0xff]  ;;  %v5906_v7 = vld [vmem:[%s5551_s27 + $0x50] sm:$0xff] }
  0x2b   : > { %4748 = vmatprep.mubr.msk.f32.mxu1 %vm277_vm1, %v5625_v18  ;;  %4948 = vmatprep.mubr.msk.f32.mxu0 %vm277_vm1, %v5639_v20  ;;  %6626 = vst [vmem:[#allocation18_spill] sm:$0xff] %v5886_v3  ;;  %6628 = vst [vmem:[#allocation20_spill] sm:$0xff] %v5906_v7 }
  0x2e   : > { %4749 = vmatmul.mubr.msk.f32.gmra.mrb[12].mxu1 %vm277_vm1, %v5636_v19  ;;  %4949 = vmatmul.mubr.msk.f32.gmra.mrb[12].mxu0 %vm277_vm1, %v5650_v21 }
  0x2f   : > { %4751 = vmatprep.mubr.msk.f32.mxu1 %vm277_vm1, %v5639_v20  ;;  %4951 = vmatprep.mubr.msk.f32.mxu0 %vm277_vm1, %v5653_v22 }
  0x32   : > { %4752 = vmatmul.mubr.msk.f32.gmra.mrb[14].mxu1 %vm277_vm1, %v5650_v21  ;;  %4952 = vmatmul.mubr.msk.f32.gmra.mrb[14].mxu0 %vm277_vm1, %v5664_v23 }
  0x33   : > { %4754 = vmatprep.mubr.msk.f32.mxu1 %vm277_vm1, %v5653_v22  ;;  %4980 = vmatprep.mubr.msk.f32.mxu0 %vm277_vm1, %v5667_v24 }
  0x36   : > { %4755 = vmatmul.mubr.msk.f32.gmra.mrb[16].mxu1 %vm277_vm1, %v5664_v23  ;;  %4981 = vmatmul.mubr.msk.f32.vlgmr.msra.gmra.mrb[0].mxu0 %vm277_vm1, %v5678_v25 }
  0x37   : > { %5029 = vmatpush3.msk.msra.mxu0 %vm374_vm0, %v4261_v9  ;;  %4757 = vmatprep.mubr.msk.f32.mxu1 %vm277_vm1, %v5681_v26  ;;  %v5909_v9 = vld [vmem:[%s5551_s27 + $0x12a] sm:$0xff] }
  0x38   : > { %4983 = vmatprep.mubr.msk.f32.mxu0 %vm277_vm1, %v5684_v27  ;;  %5078 = vmatprep.subr.msk.mxu0 %vm374_vm0, %v5689_v28 }
  0x3a   : > { %4758 = vmatmul.mubr.msk.f32.gmra.mrb[18].mxu1 %vm277_vm1, %v5699_v29  ;;  %4984 = vmatmul.mubr.msk.f32.gmra.mrb[2].mxu0 %vm277_vm1, %v5702_v30  ;;  %v6006_v29 = vld [vmem:[%s5551_s27 + $0xd8] sm:$0xff] }
  0x3b   : > { %4760 = vmatprep.mubr.msk.f32.mxu1 %vm277_vm1, %v5707_v31  ;;  %4986 = vmatprep.mubr.msk.f32.mxu0 %vm277_vm1, %v5710_v32  ;;  %v5989_v31 = vld [vmem:[%s5551_s27 + $0x18a] sm:$0xff] }
  0x3c   : > { %6639 = vst [vmem:[#allocation31_spill] sm:$0xff] %v5989_v31 }
  0x3e   : > { %4761 = vmatmul.mubr.msk.f32.gmra.mrb[20].mxu1 %vm277_vm1, %v5723_v33  ;;  %4987 = vmatmul.mubr.msk.f32.gmra.mrb[4].mxu0 %vm277_vm1, %v5726_v34  ;;  %v5975_v33 = vld [vmem:[%s5551_s27 + $0x182] sm:$0xff] }
  0x3f   : > { %4763 = vmatprep.mubr.msk.f32.mxu1 %vm277_vm1, %v5729_v35  ;;  %4989 = vmatprep.mubr.msk.f32.mxu0 %vm277_vm1, %v5732_v36  ;;  %v5972_v35 = vld [vmem:[%s5551_s27 + $0xa8] sm:$0xff]  ;;  %6637 = vst [vmem:[#allocation29_spill] sm:$0xff] %v5975_v33 }
  0x40   : > { %6636 = vst [vmem:[#allocation28_spill] sm:$0xff] %v5972_v35 }
  0x42   : > { %4764 = vmatmul.mubr.msk.f32.gmra.mrb[22].mxu1 %vm277_vm1, %v5743_v37  ;;  %4990 = vmatmul.mubr.msk.f32.gmra.mrb[6].mxu0 %vm277_vm1, %v5746_v38  ;;  %v5969_v37 = vld [vmem:[%s5551_s27 + $0x172] sm:$0xff] }
  0x43   : > { %4766 = vmatprep.mubr.msk.f32.mxu1 %vm277_vm1, %v5749_v39  ;;  %4992 = vmatprep.mubr.msk.f32.mxu0 %vm277_vm1, %v5752_v40  ;;  %v5966_v39 = vld [vmem:[%s5551_s27 + $0x98] sm:$0xff]  ;;  %6635 = vst [vmem:[#allocation27_spill] sm:$0xff] %v5969_v37 }
  0x44   : > { %6634 = vst [vmem:[#allocation26_spill] sm:$0xff] %v5966_v39 }
  0x46   : > { %4767 = vmatmul.mubr.msk.f32.gmra.mrb[24].mxu1 %vm277_vm1, %v5763_v41  ;;  %4993 = vmatmul.mubr.msk.f32.gmra.mrb[8].mxu0 %vm277_vm1, %v5766_v42  ;;  %v5955_v41 = vld [vmem:[%s5551_s27 + $0x16a] sm:$0xff] }
  0x47   : > { %4769 = vmatprep.mubr.msk.f32.mxu1 %vm277_vm1, %v5769_v43  ;;  %4995 = vmatprep.mubr.msk.f32.mxu0 %vm277_vm1, %v5772_v44  ;;  %v5952_v43 = vld [vmem:[%s5551_s27 + $0x90] sm:$0xff] }
  0x48   : > { %6633 = vst [vmem:[#allocation25_spill] sm:$0xff] %v5952_v43 }
  0x4a   : > { %4770 = vmatmul.mubr.msk.f32.gmra.mrb[26].mxu1 %vm277_vm1, %v5783_v45  ;;  %4996 = vmatmul.mubr.msk.f32.gmra.mrb[10].mxu0 %vm277_vm1, %v5786_v46  ;;  %v5949_v45 = vld [vmem:[%s5551_s27 + $0x15a] sm:$0xff] }
  0x4b   : > { %4772 = vmatprep.mubr.msk.f32.mxu1 %vm277_vm1, %v5789_v47  ;;  %4998 = vmatprep.mubr.msk.f32.mxu0 %vm277_vm1, %v5792_v48  ;;  %v5946_v47 = vld [vmem:[%s5551_s27 + $0x80] sm:$0xff] }
  0x4c   : > { %6632 = vst [vmem:[#allocation24_spill] sm:$0xff] %v5946_v47 }
  0x4e   : > { %4773 = vmatmul.mubr.msk.f32.gmra.mrb[28].mxu1 %vm277_vm1, %v5803_v49  ;;  %4999 = vmatmul.mubr.msk.f32.gmra.mrb[12].mxu0 %vm277_vm1, %v5806_v50  ;;  %v5935_v49 = vld [vmem:[%s5551_s27 + $0x152] sm:$0xff] }
  0x4f   : > { %4775 = vmatprep.mubr.msk.f32.mxu1 %vm277_vm1, %v5809_v51  ;;  %5001 = vmatprep.mubr.msk.f32.mxu0 %vm277_vm1, %v5812_v52  ;;  %v5932_v51 = vld [vmem:[%s5551_s27 + $0x78] sm:$0xff] }
  0x50   : > { %6631 = vst [vmem:[#allocation23_spill] sm:$0xff] %v5932_v51 }
  0x52   : > { %4776 = vmatmul.mubr.msk.f32.gmra.mrb[30].mxu1 %vm277_vm1, %v5823_v53  ;;  %5002 = vmatmul.mubr.msk.f32.gmra.mrb[14].mxu0 %vm277_vm1, %v5826_v54  ;;  %v5929_v53 = vld [vmem:[%s5551_s27 + $0x142] sm:$0xff] }
  0x53   : > { %4780 = vmatprep.mubr.msk.f32.mxu1 %vm277_vm1, %v210_v55  ;;  %5004 = vmatprep.mubr.msk.f32.mxu0 %vm277_vm1, %v5830_v56  ;;  %v5915_v55 = vld [vmem:[%s5551_s27 + $0x13a] sm:$0xff] }
  0x56   : > { %4781 = vmatmul.mubr.msk.f32.vlgmr.msra.gmra.mrb[0].mxu1 %vm277_vm1, %v211_v57  ;;  %5005 = vmatmul.mubr.msk.f32.gmra.mrb[16].mxu0 %vm277_vm1, %v5841_v58  ;;  %v5926_v57 = vld [vmem:[%s5551_s27 + $0x68] sm:$0xff] }
  0x57   : > { %4829 = vmatpush3.msk.msra.mxu1 %vm374_vm0, %v5570_v10  ;;  %4783 = vmatprep.mubr.msk.f32.mxu1 %vm277_vm1, %v5844_v59  ;;  %v5912_v10 = vld [vmem:[%s5551_s27 + $0x60] sm:$0xff]  ;;  %6630 = vst [vmem:[#allocation22_spill] sm:$0xff] %v5926_v57 }
  0x58   : > { %5007 = vmatprep.mubr.msk.f32.mxu0 %vm277_vm1, %v5847_v60  ;;  %4878 = vmatprep.subr.msk.mxu1 %vm374_vm0, %v5852_v61  ;;  %6629 = vst [vmem:[#allocation21_spill] sm:$0xff] %v5912_v10  ;;  %v5992_v59 = vld [vmem:[%s5551_s27 + $0xc0] sm:$0xff] }
  0x5a   : > { %4784 = vmatmul.mubr.msk.f32.gmra.mrb[2].mxu1 %vm277_vm1, %v5862_v62  ;;  %5008 = vmatmul.mubr.msk.f32.gmra.mrb[18].mxu0 %vm277_vm1, %v5865_v63  ;;  %v5986_v62 = vld [vmem:[%s5551_s27 + $0xb0] sm:$0xff] }
  0x5b   : > { %4786 = vmatprep.mubr.msk.f32.mxu1 %vm277_vm1, %v5870_v0  ;;  %5010 = vmatprep.mubr.msk.f32.mxu0 %vm277_vm1, %v5873_v2  ;;  %6638 = vst [vmem:[#allocation30_spill] sm:$0xff] %v5986_v62 }
  0x5e   : > { %4787 = vmatmul.mubr.msk.f32.gmra.mrb[4].mxu1 %vm277_vm1, %v5886_v3  ;;  %5011 = vmatmul.mubr.msk.f32.gmra.mrb[20].mxu0 %vm277_vm1, %v5889_v4 }
  0x5f   : > { %4789 = vmatprep.mubr.msk.f32.mxu1 %vm277_vm1, %v5892_v5  ;;  %5013 = vmatprep.mubr.msk.f32.mxu0 %vm277_vm1, %v5895_v6 }
  0x62   : > { %4790 = vmatmul.mubr.msk.f32.gmra.mrb[6].mxu1 %vm277_vm1, %v5906_v7  ;;  %5014 = vmatmul.mubr.msk.f32.gmra.mrb[22].mxu0 %vm277_vm1, %v5909_v9 }
  0x63   : > { %4792 = vmatprep.mubr.msk.f32.mxu1 %vm277_vm1, %v5912_v10  ;;  %5016 = vmatprep.mubr.msk.f32.mxu0 %vm277_vm1, %v5915_v55 }
  0x66   : > { %4793 = vmatmul.mubr.msk.f32.gmra.mrb[8].mxu1 %vm277_vm1, %v5926_v57  ;;  %5017 = vmatmul.mubr.msk.f32.gmra.mrb[24].mxu0 %vm277_vm1, %v5929_v53 }
  0x67   : > { %4795 = vmatprep.mubr.msk.f32.mxu1 %vm277_vm1, %v5932_v51  ;;  %5019 = vmatprep.mubr.msk.f32.mxu0 %vm277_vm1, %v5935_v49 }
  0x6a   : > { %4796 = vmatmul.mubr.msk.f32.gmra.mrb[10].mxu1 %vm277_vm1, %v5946_v47  ;;  %5020 = vmatmul.mubr.msk.f32.gmra.mrb[26].mxu0 %vm277_vm1, %v5949_v45 }
  0x6b   : > { %4798 = vmatprep.mubr.msk.f32.mxu1 %vm277_vm1, %v5952_v43  ;;  %5022 = vmatprep.mubr.msk.f32.mxu0 %vm277_vm1, %v5955_v41 }
  0x6e   : > { %4799 = vmatmul.mubr.msk.f32.gmra.mrb[12].mxu1 %vm277_vm1, %v5966_v39  ;;  %5023 = vmatmul.mubr.msk.f32.gmra.mrb[28].mxu0 %vm277_vm1, %v5969_v37  ;;  %v6011_v37 = vld [vmem:[%s6562_s1 + $0x20] sm:$0xf] }
  0x6f   : > { %4801 = vmatprep.mubr.msk.f32.mxu1 %vm277_vm1, %v5972_v35  ;;  %5025 = vmatprep.mubr.msk.f32.mxu0 %vm277_vm1, %v5975_v33  ;;  %v6003_v33 = vld [vmem:[%s5551_s27 + $0xc8] sm:$0xff] }
  0x70   : > { %6640 = vst [vmem:[#allocation32_spill] sm:$0xff] %v6003_v33 }
  0x72   : > { %4802 = vmatmul.mubr.msk.f32.gmra.mrb[14].mxu1 %vm277_vm1, %v5986_v62  ;;  %5026 = vmatmul.mubr.msk.f32.gmra.mrb[30].mxu0 %vm277_vm1, %v5989_v31  ;;  %v6022_v31 = vld [vmem:[%s5551_s27 + $0xe0] sm:$0xff] }
  0x73   : > { %4804 = vmatprep.mubr.msk.f32.mxu1 %vm277_vm1, %v5992_v59  ;;  %5030 = vmatprep.mubr.msk.f32.mxu0 %vm277_vm1, %v5870_v0  ;;  %v6027_v0 = vld [vmem:[%s5551_s27 + $0xf0] sm:$0xff] }
  0x76   : > { %4805 = vmatmul.mubr.msk.f32.gmra.mrb[16].mxu1 %vm277_vm1, %v6003_v33  ;;  %5031 = vmatmul.mubr.msk.f32.vlgmr.msra.gmra.mrb[0].mxu0 %vm277_vm1, %v5886_v3  ;;  %v927_v3 = vld [vmem:[%s5551_s27 + $0x2] sm:$0xff] }
  0x77   : > { %5079 = vmatpush3.msk.msra.mxu0 %vm374_vm0, %v5689_v28  ;;  %4807 = vmatprep.mubr.msk.f32.mxu1 %vm277_vm1, %v6006_v29  ;;  %v6040_v28 = vld [vmem:[%s5551_s27 + $0xf8] sm:$0xff] }
  0x78   : > { %5033 = vmatprep.mubr.msk.f32.mxu0 %vm277_vm1, %v5892_v5  ;;  %5128 = vmatprep.subr.msk.mxu0 %vm374_vm0, %v6011_v37  ;;  %v6043_v5 = vld [vmem:[%s5551_s27 + $0x108] sm:$0xff] }
  0x7a   : > { %4808 = vmatmul.mubr.msk.f32.gmra.mrb[18].mxu1 %vm277_vm1, %v6022_v31  ;;  %5034 = vmatmul.mubr.msk.f32.gmra.mrb[2].mxu0 %vm277_vm1, %v5906_v7  ;;  %v6054_v7 = vld [vmem:[%s5551_s27 + $0x110] sm:$0xff] }
  0x7b   : > { %4810 = vmatprep.mubr.msk.f32.mxu1 %vm277_vm1, %v6027_v0  ;;  %5036 = vmatprep.mubr.msk.f32.mxu0 %vm277_vm1, %v5912_v10  ;;  %v6057_v10 = vld [vmem:[%s5551_s27 + $0x120] sm:$0xff] }
  0x7e   : > { %4811 = vmatmul.mubr.msk.f32.gmra.mrb[20].mxu1 %vm277_vm1, %v6040_v28  ;;  %5037 = vmatmul.mubr.msk.f32.gmra.mrb[4].mxu0 %vm277_vm1, %v5926_v57  ;;  %v6068_v57 = vld [vmem:[%s5551_s27 + $0x128] sm:$0xff] }
  0x7f   : > { %4813 = vmatprep.mubr.msk.f32.mxu1 %vm277_vm1, %v6043_v5  ;;  %5039 = vmatprep.mubr.msk.f32.mxu0 %vm277_vm1, %v5932_v51  ;;  %v6071_v51 = vld [vmem:[%s5551_s27 + $0x138] sm:$0xff] }
  0x82   : > { %4814 = vmatmul.mubr.msk.f32.gmra.mrb[22].mxu1 %vm277_vm1, %v6054_v7  ;;  %5040 = vmatmul.mubr.msk.f32.gmra.mrb[6].mxu0 %vm277_vm1, %v5946_v47  ;;  %v6082_v47 = vld [vmem:[%s5551_s27 + $0x140] sm:$0xff] }
  0x83   : > { %4816 = vmatprep.mubr.msk.f32.mxu1 %vm277_vm1, %v6057_v10  ;;  %5042 = vmatprep.mubr.msk.f32.mxu0 %vm277_vm1, %v5952_v43  ;;  %v6085_v43 = vld [vmem:[%s5551_s27 + $0x150] sm:$0xff] }
  0x86   : > { %4817 = vmatmul.mubr.msk.f32.gmra.mrb[24].mxu1 %vm277_vm1, %v6068_v57  ;;  %5043 = vmatmul.mubr.msk.f32.gmra.mrb[8].mxu0 %vm277_vm1, %v5966_v39  ;;  %v6096_v39 = vld [vmem:[%s5551_s27 + $0x158] sm:$0xff] }
  0x87   : > { %4819 = vmatprep.mubr.msk.f32.mxu1 %vm277_vm1, %v6071_v51  ;;  %5045 = vmatprep.mubr.msk.f32.mxu0 %vm277_vm1, %v5972_v35  ;;  %v6099_v35 = vld [vmem:[%s5551_s27 + $0x168] sm:$0xff] }
  0x8a   : > { %4820 = vmatmul.mubr.msk.f32.gmra.mrb[26].mxu1 %vm277_vm1, %v6082_v47  ;;  %5046 = vmatmul.mubr.msk.f32.gmra.mrb[10].mxu0 %vm277_vm1, %v5986_v62  ;;  %v6110_v62 = vld [vmem:[%s5551_s27 + $0x170] sm:$0xff] }
  0x8b   : > { %4822 = vmatprep.mubr.msk.f32.mxu1 %vm277_vm1, %v6085_v43  ;;  %5048 = vmatprep.mubr.msk.f32.mxu0 %vm277_vm1, %v5992_v59 }
  0x8e   : > { %4823 = vmatmul.mubr.msk.f32.gmra.mrb[28].mxu1 %vm277_vm1, %v6096_v39  ;;  %5049 = vmatmul.mubr.msk.f32.gmra.mrb[12].mxu0 %vm277_vm1, %v6003_v33  ;;  %v928_v33 = vld [vmem:[%s5551_s27 + $0xa] sm:$0xff] }
  0x8f   : > { %4825 = vmatprep.mubr.msk.f32.mxu1 %vm277_vm1, %v6099_v35  ;;  %5051 = vmatprep.mubr.msk.f32.mxu0 %vm277_vm1, %v6006_v29 }
  0x92   : > { %4826 = vmatmul.mubr.msk.f32.gmra.mrb[30].mxu1 %vm277_vm1, %v6110_v62  ;;  %5052 = vmatmul.mubr.msk.f32.gmra.mrb[14].mxu0 %vm277_vm1, %v6022_v31 }
  0x93   : > { %4830 = vmatprep.mubr.msk.f32.mxu1 %vm277_vm1, %v927_v3  ;;  %5054 = vmatprep.mubr.msk.f32.mxu0 %vm277_vm1, %v6027_v0  ;;  %v6657_v3 = vld [vmem:[#allocation22_spill] sm:$0xff] }
  0x96   : > { %4831 = vmatmul.mubr.msk.f32.vlgmr.msra.gmra.mrb[0].mxu1 %vm277_vm1, %v928_v33  ;;  %5055 = vmatmul.mubr.msk.f32.gmra.mrb[16].mxu0 %vm277_vm1, %v6040_v28  ;;  %v4259_v33 = vld [vmem:[%s5551_s27 + $0x198] sm:$0xff] }
  0x97   : > { %4879 = vmatpush3.msk.msra.mxu1 %vm374_vm0, %v5852_v61  ;;  %4833 = vmatprep.mubr.msk.f32.mxu1 %vm277_vm1, %v5667_v24  ;;  %v6165_v24 = vld [vmem:[%s5551_s27 + $0x180] sm:$0xff] }
  0x98   : > { %5057 = vmatprep.mubr.msk.f32.mxu0 %vm277_vm1, %v6043_v5  ;;  %5178 = vmatprep.subr.msk.mxu1 %vm374_vm0, %v5529_v1  ;;  %v4260_v61 = vld [vmem:[%s5551_s27 + $0x1a0] sm:$0xff] }
  0x9a   : > { %4834 = vmatmul.mubr.msk.f32.gmra.mrb[2].mxu1 %vm277_vm1, %v5678_v25  ;;  %5058 = vmatmul.mubr.msk.f32.gmra.mrb[18].mxu0 %vm277_vm1, %v6054_v7  ;;  %v6176_v25 = vld [vmem:[%s5551_s27 + $0x188] sm:$0xff] }
  0x9b   : > { %4836 = vmatprep.mubr.msk.f32.mxu1 %vm277_vm1, %v5684_v27  ;;  %5060 = vmatprep.mubr.msk.f32.mxu0 %vm277_vm1, %v6057_v10 }
  0x9e   : > { %4837 = vmatmul.mubr.msk.f32.gmra.mrb[4].mxu1 %vm277_vm1, %v5702_v30  ;;  %5061 = vmatmul.mubr.msk.f32.gmra.mrb[20].mxu0 %vm277_vm1, %v6068_v57 }
  0x9f   : > { %4839 = vmatprep.mubr.msk.f32.mxu1 %vm277_vm1, %v5710_v32  ;;  %5063 = vmatprep.mubr.msk.f32.mxu0 %vm277_vm1, %v6071_v51 }
  0xa2   : > { %4840 = vmatmul.mubr.msk.f32.gmra.mrb[6].mxu1 %vm277_vm1, %v5726_v34  ;;  %5064 = vmatmul.mubr.msk.f32.gmra.mrb[22].mxu0 %vm277_vm1, %v6082_v47 }
  0xa3   : > { %4842 = vmatprep.mubr.msk.f32.mxu1 %vm277_vm1, %v5732_v36  ;;  %5066 = vmatprep.mubr.msk.f32.mxu0 %vm277_vm1, %v6085_v43 }
  0xa6   : > { %4843 = vmatmul.mubr.msk.f32.gmra.mrb[8].mxu1 %vm277_vm1, %v5746_v38  ;;  %5067 = vmatmul.mubr.msk.f32.gmra.mrb[24].mxu0 %vm277_vm1, %v6096_v39 }
  0xa7   : > { %4845 = vmatprep.mubr.msk.f32.mxu1 %vm277_vm1, %v5752_v40  ;;  %5069 = vmatprep.mubr.msk.f32.mxu0 %vm277_vm1, %v6099_v35 }
  0xaa   : > { %4846 = vmatmul.mubr.msk.f32.gmra.mrb[10].mxu1 %vm277_vm1, %v5766_v42  ;;  %5070 = vmatmul.mubr.msk.f32.gmra.mrb[26].mxu0 %vm277_vm1, %v6110_v62 }
  0xab   : > { %4848 = vmatprep.mubr.msk.f32.mxu1 %vm277_vm1, %v5772_v44  ;;  %5072 = vmatprep.mubr.msk.f32.mxu0 %vm277_vm1, %v6165_v24 }
  0xae   : > { %4849 = vmatmul.mubr.msk.f32.gmra.mrb[12].mxu1 %vm277_vm1, %v5786_v46  ;;  %5073 = vmatmul.mubr.msk.f32.gmra.mrb[28].mxu0 %vm277_vm1, %v6176_v25 }
  0xaf   : > { %4851 = vmatprep.mubr.msk.f32.mxu1 %vm277_vm1, %v5792_v48  ;;  %5075 = vmatprep.mubr.msk.f32.mxu0 %vm277_vm1, %v4259_v33  ;;  %v6658_v33 = vld [vmem:[#allocation10_spill] sm:$0xff] }
  0xb2   : > { %4852 = vmatmul.mubr.msk.f32.gmra.mrb[14].mxu1 %vm277_vm1, %v5806_v50  ;;  %5076 = vmatmul.mubr.msk.f32.gmra.mrb[30].mxu0 %vm277_vm1, %v4260_v61  ;;  %v6659_v61 = vld [vmem:[#allocation23_spill] sm:$0xff] }
  0xb3   : > { %4854 = vmatprep.mubr.msk.f32.mxu1 %vm277_vm1, %v5812_v52  ;;  %5080 = vmatprep.mubr.msk.f32.mxu0 %vm277_vm1, %v5560_v8  ;;  %v6641_v8 = vld [vmem:[#allocation27_spill] sm:$0xff] }
  0xb6   : > { %4855 = vmatmul.mubr.msk.f32.gmra.mrb[16].mxu1 %vm277_vm1, %v5826_v54  ;;  %5081 = vmatmul.mubr.msk.f32.vlgmr.msra.gmra.mrb[0].mxu0 %vm277_vm1, %v5575_v11  ;;  %v6642_v11 = vld [vmem:[#allocation2_spill] sm:$0xff] }
  0xb7   : > { %5129 = vmatpush3.msk.msra.mxu0 %vm374_vm0, %v6011_v37  ;;  %4857 = vmatprep.mubr.msk.f32.mxu1 %vm277_vm1, %v5830_v56  ;;  %v6656_v37 = vld [vmem:[#allocation9_spill] sm:$0xff] }
  0xb8   : > { %5083 = vmatprep.mubr.msk.f32.mxu0 %vm277_vm1, %v5581_v12  ;;  %v6643_v12 = vld [vmem:[#allocation15_spill] sm:$0xff] }
  0xba   : > { %4858 = vmatmul.mubr.msk.f32.gmra.mrb[18].mxu1 %vm277_vm1, %v5841_v58  ;;  %5084 = vmatmul.mubr.msk.f32.gmra.mrb[2].mxu0 %vm277_vm1, %v5594_v13  ;;  %v6644_v13 = vld [vmem:[#allocation3_spill] sm:$0xff] }
  0xbb   : > { %4860 = vmatprep.mubr.msk.f32.mxu1 %vm277_vm1, %v5847_v60  ;;  %5086 = vmatprep.mubr.msk.f32.mxu0 %vm277_vm1, %v5597_v14  ;;  %v6645_v14 = vld [vmem:[#allocation16_spill] sm:$0xff] }
  0xbe   : > { %4861 = vmatmul.mubr.msk.f32.gmra.mrb[20].mxu1 %vm277_vm1, %v5865_v63  ;;  %5087 = vmatmul.mubr.msk.f32.gmra.mrb[4].mxu0 %vm277_vm1, %v5608_v15  ;;  %v6646_v15 = vld [vmem:[#allocation4_spill] sm:$0xff] }
  0xbf   : > { %4863 = vmatprep.mubr.msk.f32.mxu1 %vm277_vm1, %v5873_v2  ;;  %5089 = vmatprep.mubr.msk.f32.mxu0 %vm277_vm1, %v5611_v16  ;;  %v6647_v16 = vld [vmem:[#allocation17_spill] sm:$0xff] }
  0xc2   : > { %4864 = vmatmul.mubr.msk.f32.gmra.mrb[22].mxu1 %vm277_vm1, %v5889_v4  ;;  %5090 = vmatmul.mubr.msk.f32.gmra.mrb[6].mxu0 %vm277_vm1, %v5622_v17  ;;  %v6648_v17 = vld [vmem:[#allocation5_spill] sm:$0xff] }
  0xc3   : > { %4866 = vmatprep.mubr.msk.f32.mxu1 %vm277_vm1, %v5895_v6  ;;  %5092 = vmatprep.mubr.msk.f32.mxu0 %vm277_vm1, %v5625_v18  ;;  %v6649_v18 = vld [vmem:[#allocation18_spill] sm:$0xff] }
  0xc6   : > { %4867 = vmatmul.mubr.msk.f32.gmra.mrb[24].mxu1 %vm277_vm1, %v5909_v9  ;;  %5093 = vmatmul.mubr.msk.f32.gmra.mrb[8].mxu0 %vm277_vm1, %v5636_v19  ;;  %v6650_v19 = vld [vmem:[#allocation6_spill] sm:$0xff] }
  0xc7   : > { %4869 = vmatprep.mubr.msk.f32.mxu1 %vm277_vm1, %v5915_v55  ;;  %5095 = vmatprep.mubr.msk.f32.mxu0 %vm277_vm1, %v5639_v20  ;;  %v6651_v20 = vld [vmem:[#allocation19_spill] sm:$0xff] }
  0xca   : > { %4870 = vmatmul.mubr.msk.f32.gmra.mrb[26].mxu1 %vm277_vm1, %v5929_v53  ;;  %5096 = vmatmul.mubr.msk.f32.gmra.mrb[10].mxu0 %vm277_vm1, %v5650_v21  ;;  %v6652_v21 = vld [vmem:[#allocation7_spill] sm:$0xff] }
  0xcb   : > { %4872 = vmatprep.mubr.msk.f32.mxu1 %vm277_vm1, %v5935_v49  ;;  %5098 = vmatprep.mubr.msk.f32.mxu0 %vm277_vm1, %v5653_v22  ;;  %v6654_v22 = vld [vmem:[#allocation8_spill] sm:$0xff] }
  0xce   : > { %4873 = vmatmul.mubr.msk.f32.gmra.mrb[28].mxu1 %vm277_vm1, %v5949_v45  ;;  %5099 = vmatmul.mubr.msk.f32.gmra.mrb[12].mxu0 %vm277_vm1, %v5664_v23  ;;  %v6655_v23 = vld [vmem:[#allocation21_spill] sm:$0xff] }
  0xcf   : > { %4875 = vmatprep.mubr.msk.f32.mxu1 %vm277_vm1, %v5955_v41  ;;  %5101 = vmatprep.mubr.msk.f32.mxu0 %vm277_vm1, %v5681_v26 }
  0xd2   : > { %4876 = vmatmul.mubr.msk.f32.gmra.mrb[30].mxu1 %vm277_vm1, %v6641_v8  ;;  %5102 = vmatmul.mubr.msk.f32.gmra.mrb[14].mxu0 %vm277_vm1, %v6642_v11  ;;  %v6668_v8 = vld [vmem:[#allocation30_spill] sm:$0xff] }
  0xd3   : > { %4880 = vmatprep.mubr.msk.f32.mxu1 %vm277_vm1, %v6643_v12  ;;  %5104 = vmatprep.mubr.msk.f32.mxu0 %vm277_vm1, %v6644_v13  ;;  %v6660_v12 = vld [vmem:[#allocation11_spill] sm:$0xff] }
  0xd6   : > { %4881 = vmatmul.mubr.msk.f32.vlgmr.msra.gmra.mrb[0].mxu1 %vm277_vm1, %v6645_v14  ;;  %5105 = vmatmul.mubr.msk.f32.gmra.mrb[16].mxu0 %vm277_vm1, %v6646_v15  ;;  %v6661_v14 = vld [vmem:[#allocation24_spill] sm:$0xff] }
  0xd7   : > { %5179 = vmatpush3.msk.msra.mxu1 %vm374_vm0, %v5529_v1  ;;  %4883 = vmatprep.mubr.msk.f32.mxu1 %vm277_vm1, %v6647_v16  ;;  %v6653_v1 = vld [vmem:[#allocation20_spill] sm:$0xff] }
  0xd8   : > { %5107 = vmatprep.mubr.msk.f32.mxu0 %vm277_vm1, %v6648_v17  ;;  %v6662_v16 = vld [vmem:[#allocation12_spill] sm:$0xff] }
  0xda   : > { %4884 = vmatmul.mubr.msk.f32.gmra.mrb[2].mxu1 %vm277_vm1, %v6649_v18  ;;  %5108 = vmatmul.mubr.msk.f32.gmra.mrb[18].mxu0 %vm277_vm1, %v6650_v19  ;;  %v6663_v18 = vld [vmem:[#allocation25_spill] sm:$0xff] }
  0xdb   : > { %4886 = vmatprep.mubr.msk.f32.mxu1 %vm277_vm1, %v6651_v20  ;;  %5110 = vmatprep.mubr.msk.f32.mxu0 %vm277_vm1, %v6652_v21  ;;  %v6664_v20 = vld [vmem:[#allocation13_spill] sm:$0xff] }
  0xde   : > { %4887 = vmatmul.mubr.msk.f32.gmra.mrb[4].mxu1 %vm277_vm1, %v6653_v1  ;;  %5111 = vmatmul.mubr.msk.f32.gmra.mrb[20].mxu0 %vm277_vm1, %v6654_v22  ;;  %v6303_v1 = vld [vmem:[%s5551_s27 + $0x181] sm:$0xff] }
  0xdf   : > { %4889 = vmatprep.mubr.msk.f32.mxu1 %vm277_vm1, %v6655_v23  ;;  %5113 = vmatprep.mubr.msk.f32.mxu0 %vm277_vm1, %v6656_v37  ;;  %v6665_v23 = vld [vmem:[#allocation26_spill] sm:$0xff] }
  0xe2   : > { %4890 = vmatmul.mubr.msk.f32.gmra.mrb[6].mxu1 %vm277_vm1, %v6657_v3  ;;  %5114 = vmatmul.mubr.msk.f32.gmra.mrb[22].mxu0 %vm277_vm1, %v6658_v33  ;;  %v6666_v3 = vld [vmem:[#allocation14_spill] sm:$0xff] }
  0xe3   : > { %4892 = vmatprep.mubr.msk.f32.mxu1 %vm277_vm1, %v6659_v61  ;;  %5116 = vmatprep.mubr.msk.f32.mxu0 %vm277_vm1, %v6660_v12  ;;  %v6667_v61 = vld [vmem:[#allocation28_spill] sm:$0xff] }
  0xe6   : > { %4893 = vmatmul.mubr.msk.f32.gmra.mrb[8].mxu1 %vm277_vm1, %v6661_v14  ;;  %5117 = vmatmul.mubr.msk.f32.gmra.mrb[24].mxu0 %vm277_vm1, %v6662_v16  ;;  %v6314_v14 = vld [vmem:[%s5551_s27 + $0x189] sm:$0xff] }
  0xe7   : > { %4895 = vmatprep.mubr.msk.f32.mxu1 %vm277_vm1, %v6663_v18  ;;  %5119 = vmatprep.mubr.msk.f32.mxu0 %vm277_vm1, %v6664_v20  ;;  %v4325_v18 = vld [vmem:[%s5551_s27 + $0x199] sm:$0xff] }
  0xea   : > { %4896 = vmatmul.mubr.msk.f32.gmra.mrb[10].mxu1 %vm277_vm1, %v6665_v23  ;;  %5120 = vmatmul.mubr.msk.f32.gmra.mrb[26].mxu0 %vm277_vm1, %v6666_v3  ;;  %v4326_v23 = vld [vmem:[%s5551_s27 + $0x1a1] sm:$0xff]  ;;  %v6669_v3 = vld [vmem:[#allocation32_spill] sm:$0xff] }
  0xeb   : > { %4898 = vmatprep.mubr.msk.f32.mxu1 %vm277_vm1, %v6667_v61  ;;  %5122 = vmatprep.mubr.msk.f32.mxu0 %vm277_vm1, %v6303_v1 }
  0xee   : > { %4899 = vmatmul.mubr.msk.f32.gmra.mrb[12].mxu1 %vm277_vm1, %v6668_v8  ;;  %5123 = vmatmul.mubr.msk.f32.gmra.mrb[28].mxu0 %vm277_vm1, %v6314_v14 }
  0xef   : > { %4901 = vmatprep.mubr.msk.f32.mxu1 %vm277_vm1, %v5992_v59  ;;  %5125 = vmatprep.mubr.msk.f32.mxu0 %vm277_vm1, %v4325_v18 }
  0xf2   : > { %4902 = vmatmul.mubr.msk.f32.gmra.mrb[14].mxu1 %vm277_vm1, %v6669_v3  ;;  %5126 = vmatmul.mubr.msk.f32.gmra.mrb[30].mxu0 %vm277_vm1, %v4326_v23 }
  0xf3   : > { %4904 = vmatprep.mubr.msk.f32.mxu1 %vm277_vm1, %v6006_v29  ;;  %5130 = vmatprep.mubr.msk.f32.mxu0 %vm277_vm1, %v5684_v27  ;;  %v6671_v27 = vld [vmem:[#allocation29_spill] sm:$0xff] }
  0xf4   : > { %v4391_v29 = vld [vmem:[%s5551_s27 + $0x19a] sm:$0xff] }
  0xf6   : > { %4905 = vmatmul.mubr.msk.f32.gmra.mrb[16].mxu1 %vm277_vm1, %v6022_v31  ;;  %5131 = vmatmul.mubr.msk.f32.vlgmr.msra.gmra.mrb[0].mxu0 %vm277_vm1, %v5702_v30  ;;  %v6672_v30 = vld [vmem:[#allocation14_spill] sm:$0xff]  ;;  %v6673_v31 = vld [vmem:[#allocation31_spill] sm:$0xff] }
  0xf7   : > { %4907 = vmatprep.mubr.msk.f32.mxu1 %vm277_vm1, %v6027_v0  ;;  %5133 = vmatprep.mubr.msk.f32.mxu0 %vm277_vm1, %v5710_v32  ;;  %v4392_v32 = vld [vmem:[%s5551_s27 + $0x1a2] sm:$0xff] }
  0xfa   : > { %4908 = vmatmul.mubr.msk.f32.gmra.mrb[18].mxu1 %vm277_vm1, %v6040_v28  ;;  %5134 = vmatmul.mubr.msk.f32.gmra.mrb[2].mxu0 %vm277_vm1, %v5726_v34 }
  0xfb   : > { %4910 = vmatprep.mubr.msk.f32.mxu1 %vm277_vm1, %v6043_v5  ;;  %5136 = vmatprep.mubr.msk.f32.mxu0 %vm277_vm1, %v5732_v36 }
  0xfe   : > { %4911 = vmatmul.mubr.msk.f32.gmra.mrb[20].mxu1 %vm277_vm1, %v6054_v7  ;;  %5137 = vmatmul.mubr.msk.f32.gmra.mrb[4].mxu0 %vm277_vm1, %v5746_v38 }
  0xff   : > { %4913 = vmatprep.mubr.msk.f32.mxu1 %vm277_vm1, %v6057_v10  ;;  %5139 = vmatprep.mubr.msk.f32.mxu0 %vm277_vm1, %v5752_v40 }
 0x102   : > { %4914 = vmatmul.mubr.msk.f32.gmra.mrb[22].mxu1 %vm277_vm1, %v6068_v57  ;;  %5140 = vmatmul.mubr.msk.f32.gmra.mrb[6].mxu0 %vm277_vm1, %v5766_v42 }
 0x103   : > { %4916 = vmatprep.mubr.msk.f32.mxu1 %vm277_vm1, %v6071_v51  ;;  %5142 = vmatprep.mubr.msk.f32.mxu0 %vm277_vm1, %v5772_v44 }
 0x106   : > { %4917 = vmatmul.mubr.msk.f32.gmra.mrb[24].mxu1 %vm277_vm1, %v6082_v47  ;;  %5143 = vmatmul.mubr.msk.f32.gmra.mrb[8].mxu0 %vm277_vm1, %v5786_v46 }
 0x107   : > { %4919 = vmatprep.mubr.msk.f32.mxu1 %vm277_vm1, %v6085_v43  ;;  %5145 = vmatprep.mubr.msk.f32.mxu0 %vm277_vm1, %v5792_v48 }
 0x10a   : > { %4920 = vmatmul.mubr.msk.f32.gmra.mrb[26].mxu1 %vm277_vm1, %v6096_v39  ;;  %5146 = vmatmul.mubr.msk.f32.gmra.mrb[10].mxu0 %vm277_vm1, %v5806_v50 }
 0x10b   : > { %4922 = vmatprep.mubr.msk.f32.mxu1 %vm277_vm1, %v6099_v35  ;;  %5148 = vmatprep.mubr.msk.f32.mxu0 %vm277_vm1, %v5812_v52  ;;  %v6473_v52 = vld [vmem:[%s6563_s2] ss:$0 sm:$0xff] }
 0x10e   : > { %4923 = vmatmul.mubr.msk.f32.gmra.mrb[28].mxu1 %vm277_vm1, %v6110_v62  ;;  %5149 = vmatmul.mubr.msk.f32.gmra.mrb[12].mxu0 %vm277_vm1, %v5826_v54 }
 0x10f   : > { %4925 = vmatprep.mubr.msk.f32.mxu1 %vm277_vm1, %v6165_v24  ;;  %5151 = vmatprep.mubr.msk.f32.mxu0 %vm277_vm1, %v5830_v56 }
 0x112   : > { %4926 = vmatmul.mubr.msk.f32.gmra.mrb[30].mxu1 %vm277_vm1, %v6176_v25  ;;  %5152 = vmatmul.mubr.msk.f32.gmra.mrb[14].mxu0 %vm277_vm1, %v5841_v58 }
 0x113   : > { %4954 = vmatprep.mubr.msk.f32.mxu1 %vm277_vm1, %v5681_v26  ;;  %5154 = vmatprep.mubr.msk.f32.mxu0 %vm277_vm1, %v5847_v60  ;;  %v6670_v26 = vld [vmem:[#allocation27_spill] sm:$0xff] }
 0x116   : > { %4955 = vmatmul.mubr.msk.f32.vlgmr.msra.gmra.mrb[16].mxu1 %vm277_vm1, %v6642_v11  ;;  %5155 = vmatmul.mubr.msk.f32.gmra.mrb[16].mxu0 %vm277_vm1, %v5865_v63 }
 0x117   : > { %4957 = vmatprep.mubr.msk.f32.mxu1 %vm277_vm1, %v6644_v13  ;;  %5157 = vmatprep.mubr.msk.f32.mxu0 %vm277_vm1, %v5873_v2 }
 0x11a   : > { %4958 = vmatmul.mubr.msk.f32.gmra.mrb[18].mxu1 %vm277_vm1, %v6646_v15  ;;  %5158 = vmatmul.mubr.msk.f32.gmra.mrb[18].mxu0 %vm277_vm1, %v5889_v4 }
 0x11b   : > { %4960 = vmatprep.mubr.msk.f32.mxu1 %vm277_vm1, %v6648_v17  ;;  %5160 = vmatprep.mubr.msk.f32.mxu0 %vm277_vm1, %v5895_v6 }
 0x11e   : > { %4961 = vmatmul.mubr.msk.f32.gmra.mrb[20].mxu1 %vm277_vm1, %v6650_v19  ;;  %5161 = vmatmul.mubr.msk.f32.gmra.mrb[20].mxu0 %vm277_vm1, %v5909_v9 }
 0x11f   : > { %4963 = vmatprep.mubr.msk.f32.mxu1 %vm277_vm1, %v6652_v21  ;;  %5163 = vmatprep.mubr.msk.f32.mxu0 %vm277_vm1, %v5915_v55 }
 0x122   : > { %4964 = vmatmul.mubr.msk.f32.gmra.mrb[22].mxu1 %vm277_vm1, %v6654_v22  ;;  %5164 = vmatmul.mubr.msk.f32.gmra.mrb[22].mxu0 %vm277_vm1, %v5929_v53 }
 0x123   : > { %4966 = vmatprep.mubr.msk.f32.mxu1 %vm277_vm1, %v6656_v37  ;;  %5166 = vmatprep.mubr.msk.f32.mxu0 %vm277_vm1, %v5935_v49 }
 0x126   : > { %4967 = vmatmul.mubr.msk.f32.gmra.mrb[24].mxu1 %vm277_vm1, %v6658_v33  ;;  %5167 = vmatmul.mubr.msk.f32.gmra.mrb[24].mxu0 %vm277_vm1, %v5949_v45 }
 0x127   : > { %4969 = vmatprep.mubr.msk.f32.mxu1 %vm277_vm1, %v6660_v12  ;;  %5169 = vmatprep.mubr.msk.f32.mxu0 %vm277_vm1, %v5955_v41 }
 0x12a   : > { %4970 = vmatmul.mubr.msk.f32.gmra.mrb[26].mxu1 %vm277_vm1, %v6662_v16  ;;  %5170 = vmatmul.mubr.msk.f32.gmra.mrb[26].mxu0 %vm277_vm1, %v6670_v26 }
 0x12b   : > { %4972 = vmatprep.mubr.msk.f32.mxu1 %vm277_vm1, %v6664_v20  ;;  %5172 = vmatprep.mubr.msk.f32.mxu0 %vm277_vm1, %v6671_v27 }
 0x12e   : > { %4973 = vmatmul.mubr.msk.f32.gmra.mrb[28].mxu1 %vm277_vm1, %v6672_v30  ;;  %5173 = vmatmul.mubr.msk.f32.gmra.mrb[28].mxu0 %vm277_vm1, %v6673_v31 }
 0x12f   : > { %4975 = vmatprep.mubr.msk.f32.mxu1 %vm277_vm1, %v6303_v1  ;;  %5175 = vmatprep.mubr.msk.f32.mxu0 %vm277_vm1, %v4391_v29 }
 0x132   : > { %4976 = vmatmul.mubr.msk.f32.gmra.mrb[30].mxu1 %vm277_vm1, %v6314_v14  ;;  %5176 = vmatmul.mubr.msk.f32.gmra.mrb[30].mxu0 %vm277_vm1, %v4392_v32 }
 0x1a9   : > { %v4882_v34 = vpop.f32.mrb[0].mxu1 }
 0x1aa   : > { %v1517_v35 = vpop.f32.mrb[1].mxu1 }
 0x1ad   : > { %v4885_v36 = vpop.f32.mrb[2].mxu1 }
 0x1ae   : > { %v1527_v38 = vpop.f32.mrb[3].mxu1 }
 0x1b1   : > { %v4888_v39 = vpop.f32.mrb[4].mxu1 }
 0x1b2   : > { %v1537_v40 = vpop.f32.mrb[5].mxu1 }
 0x1b5   : > { %v4891_v41 = vpop.f32.mrb[6].mxu1 }
 0x1b6   : > { %v1547_v42 = vpop.f32.mrb[7].mxu1 }
 0x1b9   : > { %v4894_v43 = vpop.f32.mrb[8].mxu1 }
 0x1ba   : > { %v6456_v44 = vpop.f32.mrb[9].mxu1 }
 0x1bd   : > { %v6458_v45 = vpop.f32.mrb[10].mxu1 }
 0x1be   : > { %v6460_v46 = vpop.f32.mrb[11].mxu1 }
 0x1c1   : > { %v6462_v47 = vpop.f32.mrb[12].mxu1 }
 0x1c2   : > { %v6464_v48 = vpop.f32.mrb[13].mxu1 }
 0x1c5   : > { %v6466_v49 = vpop.f32.mrb[14].mxu1 }
 0x1c6   : > { %v6468_v50 = vpop.f32.mrb[15].mxu1 }
 0x1c9   : > { %v5132_v51 = vpop.f32.mrb[0].mxu0 }
 0x1ca   : > { %v5180_v53 = vadd.f32 %v5132_v51, %v4882_v34  ;;  %v3468_v54 = vpop.f32.mrb[1].mxu0 }
 0x1cb   : > { %v5181_v56 = vadd.f32 %v3468_v54, %v1517_v35 }
 0x1cc   : > { %v3667_v58 = vadd.f32 %v5180_v53, %v6473_v52 }
 0x1cd   : > { %v3666_v59 = vadd.f32 %v5181_v56, %v6473_v52  ;;  %v5135_v60 = vpop.f32.mrb[2].mxu0 }
 0x1ce   : > { %vm3699_vm2 = vcmp.ge.f32.partialorder %v3667_v58, 0.0  ;;  %v3731_v62 = vmul.f32 0.2, %v3667_v58  ;;  %v5182_v63 = vadd.f32 %v5135_v60, %v4885_v36  ;;  %v3478_v0 = vpop.f32.mrb[3].mxu0 }
 0x1cf   : > { %vm3698_vm3 = vcmp.ge.f32.partialorder %v3666_v59, 0.0  ;;  %v3730_v2 = vmul.f32 0.2, %v3666_v59  ;;  %v5183_v4 = vadd.f32 %v3478_v0, %v1527_v38 }
 0x1d0   : > { %v3763_v5 = vsel %vm3699_vm2, %v3667_v58, %v3731_v62  ;;  %v3669_v6 = vadd.f32 %v5182_v63, %v6473_v52 }
 0x1d1   : > { %3795 = vst [vmem:[%s6481_s20 + $0x8] sm:$0xff] %v3763_v5  ;;  %v3762_v7 = vsel %vm3698_vm3, %v3666_v59, %v3730_v2  ;;  %v3668_v9 = vadd.f32 %v5183_v4, %v6473_v52  ;;  %v5138_v10 = vpop.f32.mrb[4].mxu0 }
 0x1d2   : > { %3794 = vst [vmem:[%s6481_s20] sm:$0xff] %v3762_v7  ;;  %vm3701_vm4 = vcmp.ge.f32.partialorder %v3669_v6, 0.0  ;;  %v3733_v55 = vmul.f32 0.2, %v3669_v6  ;;  %v5184_v57 = vadd.f32 %v5138_v10, %v4888_v39  ;;  %v3488_v28 = vpop.f32.mrb[5].mxu0 }
 0x1d3   : > { %vm3700_vm5 = vcmp.ge.f32.partialorder %v3668_v9, 0.0  ;;  %v3732_v24 = vmul.f32 0.2, %v3668_v9  ;;  %v5185_v25 = vadd.f32 %v3488_v28, %v1537_v40 }
 0x1d4   : > { %v3765_v8 = vsel %vm3701_vm4, %v3669_v6, %v3733_v55  ;;  %v3671_v11 = vadd.f32 %v5184_v57, %v6473_v52 }
 0x1d5   : > { %3797 = vst [vmem:[%s6481_s20 + $0x18] sm:$0xff] %v3765_v8  ;;  %v3764_v13 = vsel %vm3700_vm5, %v3668_v9, %v3732_v24  ;;  %v3670_v15 = vadd.f32 %v5185_v25, %v6473_v52  ;;  %v5141_v17 = vpop.f32.mrb[6].mxu0 }
 0x1d6   : > { %3796 = vst [vmem:[%s6481_s20 + $0x10] sm:$0xff] %v3764_v13  ;;  %vm3703_vm6 = vcmp.ge.f32.partialorder %v3671_v11, 0.0  ;;  %v3735_v19 = vmul.f32 0.2, %v3671_v11  ;;  %v5186_v21 = vadd.f32 %v5141_v17, %v4891_v41  ;;  %v3498_v22 = vpop.f32.mrb[7].mxu0 }
 0x1d7   : > { %vm3702_vm7 = vcmp.ge.f32.partialorder %v3670_v15, 0.0  ;;  %v3734_v37 = vmul.f32 0.2, %v3670_v15  ;;  %v5187_v33 = vadd.f32 %v3498_v22, %v1547_v42 }
 0x1d8   : > { %v3767_v12 = vsel %vm3703_vm6, %v3671_v11, %v3735_v19  ;;  %v3673_v16 = vadd.f32 %v5186_v21, %v6473_v52 }
 0x1d9   : > { %3799 = vst [vmem:[%s6481_s20 + $0x28] sm:$0xff] %v3767_v12  ;;  %v3766_v20 = vsel %vm3702_vm7, %v3670_v15, %v3734_v37  ;;  %v3672_v1 = vadd.f32 %v5187_v33, %v6473_v52  ;;  %v5144_v3 = vpop.f32.mrb[8].mxu0 }
 0x1da   : > { %3798 = vst [vmem:[%s6481_s20 + $0x20] sm:$0xff] %v3766_v20  ;;  %vm3705_vm8 = vcmp.ge.f32.partialorder %v3673_v16, 0.0  ;;  %v3737_v61 = vmul.f32 0.2, %v3673_v16  ;;  %v5188_v14 = vadd.f32 %v5144_v3, %v4894_v43  ;;  %v3508_v18 = vpop.f32.mrb[9].mxu0 }
 0x1db   : > { %vm3704_vm9 = vcmp.ge.f32.partialorder %v3672_v1, 0.0  ;;  %v3736_v23 = vmul.f32 0.2, %v3672_v1  ;;  %v5189_v26 = vadd.f32 %v3508_v18, %v6456_v44 }
 0x1dc   : > { %v3769_v27 = vsel %vm3705_vm8, %v3673_v16, %v3737_v61  ;;  %v3675_v29 = vadd.f32 %v5188_v14, %v6473_v52 }
 0x1dd   : > { %3801 = vst [vmem:[%s6481_s20 + $0x38] sm:$0xff] %v3769_v27  ;;  %v3768_v30 = vsel %vm3704_vm9, %v3672_v1, %v3736_v23  ;;  %v3674_v31 = vadd.f32 %v5189_v26, %v6473_v52  ;;  %v5147_v32 = vpop.f32.mrb[10].mxu0 }
 0x1de   : > { %3800 = vst [vmem:[%s6481_s20 + $0x30] sm:$0xff] %v3768_v30  ;;  %vm3707_vm10 = vcmp.ge.f32.partialorder %v3675_v29, 0.0  ;;  %v3739_v34 = vmul.f32 0.2, %v3675_v29  ;;  %v5190_v35 = vadd.f32 %v5147_v32, %v6458_v45  ;;  %v3518_v36 = vpop.f32.mrb[11].mxu0 }
 0x1df   : > { %vm3706_vm11 = vcmp.ge.f32.partialorder %v3674_v31, 0.0  ;;  %v3738_v38 = vmul.f32 0.2, %v3674_v31  ;;  %v5191_v39 = vadd.f32 %v3518_v36, %v6460_v46 }
 0x1e0   : > { %v3771_v40 = vsel %vm3707_vm10, %v3675_v29, %v3739_v34  ;;  %v3677_v41 = vadd.f32 %v5190_v35, %v6473_v52 }
 0x1e1   : > { %3803 = vst [vmem:[%s6481_s20 + $0x48] sm:$0xff] %v3771_v40  ;;  %v3770_v42 = vsel %vm3706_vm11, %v3674_v31, %v3738_v38  ;;  %v3676_v43 = vadd.f32 %v5191_v39, %v6473_v52  ;;  %v5150_v44 = vpop.f32.mrb[12].mxu0 }
 0x1e2   : > { %3802 = vst [vmem:[%s6481_s20 + $0x40] sm:$0xff] %v3770_v42  ;;  %vm3709_vm12 = vcmp.ge.f32.partialorder %v3677_v41, 0.0  ;;  %v3741_v51 = vmul.f32 0.2, %v3677_v41  ;;  %v5192_v45 = vadd.f32 %v5150_v44, %v6462_v47  ;;  %v3528_v53 = vpop.f32.mrb[13].mxu0 }
 0x1e3   : > { %vm3708_vm13 = vcmp.ge.f32.partialorder %v3676_v43, 0.0  ;;  %v3740_v54 = vmul.f32 0.2, %v3676_v43  ;;  %v5193_v46 = vadd.f32 %v3528_v53, %v6464_v48 }
 0x1e4   : > { %v3773_v56 = vsel %vm3709_vm12, %v3677_v41, %v3741_v51  ;;  %v3679_v58 = vadd.f32 %v5192_v45, %v6473_v52 }
 0x1e5   : > { %3805 = vst [vmem:[%s6481_s20 + $0x58] sm:$0xff] %v3773_v56  ;;  %v3772_v59 = vsel %vm3708_vm13, %v3676_v43, %v3740_v54  ;;  %v3678_v60 = vadd.f32 %v5193_v46, %v6473_v52  ;;  %v5153_v62 = vpop.f32.mrb[14].mxu0 }
 0x1e6   : > { %3804 = vst [vmem:[%s6481_s20 + $0x50] sm:$0xff] %v3772_v59  ;;  %vm3711_vm14 = vcmp.ge.f32.partialorder %v3679_v58, 0.0  ;;  %v3743_v63 = vmul.f32 0.2, %v3679_v58  ;;  %v5194_v47 = vadd.f32 %v5153_v62, %v6466_v49  ;;  %v3538_v0 = vpop.f32.mrb[15].mxu0 }
 0x1e7   : > { %vm3710_vm15 = vcmp.ge.f32.partialorder %v3678_v60, 0.0  ;;  %v3742_v2 = vmul.f32 0.2, %v3678_v60  ;;  %v5195_v48 = vadd.f32 %v3538_v0, %v6468_v50 }
 0x1e8   : > { %v3775_v4 = vsel %vm3711_vm14, %v3679_v58, %v3743_v63  ;;  %v3681_v5 = vadd.f32 %v5194_v47, %v6473_v52 }
 0x1e9   : > { %3807 = vst [vmem:[%s6481_s20 + $0x68] sm:$0xff] %v3775_v4  ;;  %v3774_v6 = vsel %vm3710_vm15, %v3678_v60, %v3742_v2  ;;  %v3680_v7 = vadd.f32 %v5195_v48, %v6473_v52  ;;  %v4956_v9 = vpop.f32.mrb[16].mxu1  ;;  %v5156_v10 = vpop.f32.mrb[16].mxu0 }
 0x1ea   : > { %3806 = vst [vmem:[%s6481_s20 + $0x60] sm:$0xff] %v3774_v6  ;;  %vm3713_vm0 = vcmp.ge.f32.partialorder %v3681_v5, 0.0  ;;  %v3745_v55 = vmul.f32 0.2, %v3681_v5  ;;  %v5196_v49 = vadd.f32 %v5156_v10, %v4956_v9  ;;  %v1987_v57 = vpop.f32.mrb[17].mxu1  ;;  %v3548_v28 = vpop.f32.mrb[17].mxu0 }
 0x1eb   : > { %vm3712_vm1 = vcmp.ge.f32.partialorder %v3680_v7, 0.0  ;;  %v3744_v24 = vmul.f32 0.2, %v3680_v7  ;;  %v5197_v50 = vadd.f32 %v3548_v28, %v1987_v57 }
 0x1ec   : > { %v3777_v25 = vsel %vm3713_vm0, %v3681_v5, %v3745_v55  ;;  %v3683_v8 = vadd.f32 %v5196_v49, %v6473_v52 }
 0x1ed   : > { %3809 = vst [vmem:[%s6481_s20 + $0x78] sm:$0xff] %v3777_v25  ;;  %v3776_v11 = vsel %vm3712_vm1, %v3680_v7, %v3744_v24  ;;  %v3682_v13 = vadd.f32 %v5197_v50, %v6473_v52  ;;  %v4959_v15 = vpop.f32.mrb[18].mxu1  ;;  %v5159_v17 = vpop.f32.mrb[18].mxu0 }
 0x1ee   : > { %3808 = vst [vmem:[%s6481_s20 + $0x70] sm:$0xff] %v3776_v11  ;;  %vm3715_vm2 = vcmp.ge.f32.partialorder %v3683_v8, 0.0  ;;  %v3747_v19 = vmul.f32 0.2, %v3683_v8  ;;  %v5198_v21 = vadd.f32 %v5159_v17, %v4959_v15  ;;  %v1997_v22 = vpop.f32.mrb[19].mxu1  ;;  %v3558_v37 = vpop.f32.mrb[19].mxu0 }
 0x1ef   : > { %vm3714_vm3 = vcmp.ge.f32.partialorder %v3682_v13, 0.0  ;;  %v3746_v33 = vmul.f32 0.2, %v3682_v13  ;;  %v5199_v12 = vadd.f32 %v3558_v37, %v1997_v22 }
 0x1f0   : > { %v3779_v16 = vsel %vm3715_vm2, %v3683_v8, %v3747_v19  ;;  %v3685_v20 = vadd.f32 %v5198_v21, %v6473_v52 }
 0x1f1   : > { %3811 = vst [vmem:[%s6481_s20 + $0x88] sm:$0xff] %v3779_v16  ;;  %v3778_v1 = vsel %vm3714_vm3, %v3682_v13, %v3746_v33  ;;  %v3684_v3 = vadd.f32 %v5199_v12, %v6473_v52  ;;  %v4962_v61 = vpop.f32.mrb[20].mxu1  ;;  %v5162_v14 = vpop.f32.mrb[20].mxu0 }
 0x1f2   : > { %3810 = vst [vmem:[%s6481_s20 + $0x80] sm:$0xff] %v3778_v1  ;;  %vm3717_vm4 = vcmp.ge.f32.partialorder %v3685_v20, 0.0  ;;  %v3749_v18 = vmul.f32 0.2, %v3685_v20  ;;  %v5200_v23 = vadd.f32 %v5162_v14, %v4962_v61  ;;  %v2007_v26 = vpop.f32.mrb[21].mxu1  ;;  %v3568_v27 = vpop.f32.mrb[21].mxu0 }
 0x1f3   : > { %vm3716_vm5 = vcmp.ge.f32.partialorder %v3684_v3, 0.0  ;;  %v3748_v29 = vmul.f32 0.2, %v3684_v3  ;;  %v5201_v30 = vadd.f32 %v3568_v27, %v2007_v26 }
 0x1f4   : > { %v3781_v31 = vsel %vm3717_vm4, %v3685_v20, %v3749_v18  ;;  %v3687_v32 = vadd.f32 %v5200_v23, %v6473_v52 }
 0x1f5   : > { %3813 = vst [vmem:[%s6481_s20 + $0x98] sm:$0xff] %v3781_v31  ;;  %v3780_v34 = vsel %vm3716_vm5, %v3684_v3, %v3748_v29  ;;  %v3686_v35 = vadd.f32 %v5201_v30, %v6473_v52  ;;  %v4965_v36 = vpop.f32.mrb[22].mxu1  ;;  %v5165_v38 = vpop.f32.mrb[22].mxu0 }
 0x1f6   : > { %3812 = vst [vmem:[%s6481_s20 + $0x90] sm:$0xff] %v3780_v34  ;;  %vm3719_vm6 = vcmp.ge.f32.partialorder %v3687_v32, 0.0  ;;  %v3751_v39 = vmul.f32 0.2, %v3687_v32  ;;  %v5202_v40 = vadd.f32 %v5165_v38, %v4965_v36  ;;  %v2017_v41 = vpop.f32.mrb[23].mxu1  ;;  %v3578_v42 = vpop.f32.mrb[23].mxu0 }
 0x1f7   : > { %vm3718_vm7 = vcmp.ge.f32.partialorder %v3686_v35, 0.0  ;;  %v3750_v43 = vmul.f32 0.2, %v3686_v35  ;;  %v5203_v44 = vadd.f32 %v3578_v42, %v2017_v41 }
 0x1f8   : > { %v3783_v51 = vsel %vm3719_vm6, %v3687_v32, %v3751_v39  ;;  %v3689_v45 = vadd.f32 %v5202_v40, %v6473_v52 }
 0x1f9   : > { %3815 = vst [vmem:[%s6481_s20 + $0xa8] sm:$0xff] %v3783_v51  ;;  %v3782_v53 = vsel %vm3718_vm7, %v3686_v35, %v3750_v43  ;;  %v3688_v54 = vadd.f32 %v5203_v44, %v6473_v52  ;;  %v4968_v46 = vpop.f32.mrb[24].mxu1  ;;  %v5168_v56 = vpop.f32.mrb[24].mxu0 }
 0x1fa   : > { %3814 = vst [vmem:[%s6481_s20 + $0xa0] sm:$0xff] %v3782_v53  ;;  %vm3721_vm8 = vcmp.ge.f32.partialorder %v3689_v45, 0.0  ;;  %v3753_v58 = vmul.f32 0.2, %v3689_v45  ;;  %v5204_v59 = vadd.f32 %v5168_v56, %v4968_v46  ;;  %v2027_v60 = vpop.f32.mrb[25].mxu1  ;;  %v3588_v62 = vpop.f32.mrb[25].mxu0 }
 0x1fb   : > { %vm3720_vm9 = vcmp.ge.f32.partialorder %v3688_v54, 0.0  ;;  %v3752_v63 = vmul.f32 0.2, %v3688_v54  ;;  %v5205_v47 = vadd.f32 %v3588_v62, %v2027_v60 }
 0x1fc   : > { %v3785_v0 = vsel %vm3721_vm8, %v3689_v45, %v3753_v58  ;;  %v3691_v2 = vadd.f32 %v5204_v59, %v6473_v52 }
 0x1fd   : > { %3817 = vst [vmem:[%s6481_s20 + $0xb8] sm:$0xff] %v3785_v0  ;;  %v3784_v48 = vsel %vm3720_vm9, %v3688_v54, %v3752_v63  ;;  %v3690_v4 = vadd.f32 %v5205_v47, %v6473_v52  ;;  %v4971_v5 = vpop.f32.mrb[26].mxu1  ;;  %v5171_v6 = vpop.f32.mrb[26].mxu0 }
 0x1fe   : > { %3816 = vst [vmem:[%s6481_s20 + $0xb0] sm:$0xff] %v3784_v48  ;;  %vm3723_vm10 = vcmp.ge.f32.partialorder %v3691_v2, 0.0  ;;  %v3755_v7 = vmul.f32 0.2, %v3691_v2  ;;  %v5206_v9 = vadd.f32 %v5171_v6, %v4971_v5  ;;  %v2037_v10 = vpop.f32.mrb[27].mxu1  ;;  %v3598_v55 = vpop.f32.mrb[27].mxu0 }
 0x1ff   : > { %vm3722_vm11 = vcmp.ge.f32.partialorder %v3690_v4, 0.0  ;;  %v3754_v49 = vmul.f32 0.2, %v3690_v4  ;;  %v5207_v57 = vadd.f32 %v3598_v55, %v2037_v10 }
 0x200   : > { %v3787_v28 = vsel %vm3723_vm10, %v3691_v2, %v3755_v7  ;;  %v3693_v24 = vadd.f32 %v5206_v9, %v6473_v52 }
 0x201   : > { %3819 = vst [vmem:[%s6481_s20 + $0xc8] sm:$0xff] %v3787_v28  ;;  %v3786_v50 = vsel %vm3722_vm11, %v3690_v4, %v3754_v49  ;;  %v3692_v25 = vadd.f32 %v5207_v57, %v6473_v52  ;;  %v4974_v8 = vpop.f32.mrb[28].mxu1  ;;  %v5174_v11 = vpop.f32.mrb[28].mxu0 }
 0x202   : > { %3818 = vst [vmem:[%s6481_s20 + $0xc0] sm:$0xff] %v3786_v50  ;;  %vm3725_vm12 = vcmp.ge.f32.partialorder %v3693_v24, 0.0  ;;  %v3757_v13 = vmul.f32 0.2, %v3693_v24  ;;  %v5208_v15 = vadd.f32 %v5174_v11, %v4974_v8  ;;  %v2047_v17 = vpop.f32.mrb[29].mxu1  ;;  %v3608_v19 = vpop.f32.mrb[29].mxu0 }
 0x203   : > { %vm3724_vm13 = vcmp.ge.f32.partialorder %v3692_v25, 0.0  ;;  %v3756_v21 = vmul.f32 0.2, %v3692_v25  ;;  %v5209_v22 = vadd.f32 %v3608_v19, %v2047_v17 }
 0x204   : > { %v3789_v37 = vsel %vm3725_vm12, %v3693_v24, %v3757_v13  ;;  %v3695_v33 = vadd.f32 %v5208_v15, %v6473_v52 }
 0x205   : > { %3821 = vst [vmem:[%s6481_s20 + $0xd8] sm:$0xff] %v3789_v37  ;;  %v3788_v12 = vsel %vm3724_vm13, %v3692_v25, %v3756_v21  ;;  %v3694_v16 = vadd.f32 %v5209_v22, %v6473_v52  ;;  %v4977_v20 = vpop.f32.mrb[30].mxu1  ;;  %v5177_v1 = vpop.f32.mrb[30].mxu0 }
 0x206   : > { %3820 = vst [vmem:[%s6481_s20 + $0xd0] sm:$0xff] %v3788_v12  ;;  %vm3727_vm14 = vcmp.ge.f32.partialorder %v3695_v33, 0.0  ;;  %v3759_v3 = vmul.f32 0.2, %v3695_v33  ;;  %v5210_v61 = vadd.f32 %v5177_v1, %v4977_v20  ;;  %v2057_v14 = vpop.f32.mrb[31].mxu1  ;;  %v3618_v18 = vpop.f32.mrb[31].mxu0 }
 0x207   : > { %vm3726_vm15 = vcmp.ge.f32.partialorder %v3694_v16, 0.0  ;;  %v3758_v23 = vmul.f32 0.2, %v3694_v16  ;;  %v5211_v26 = vadd.f32 %v3618_v18, %v2057_v14 }
 0x208   : > { %v3791_v27 = vsel %vm3727_vm14, %v3695_v33, %v3759_v3  ;;  %v3697_v29 = vadd.f32 %v5210_v61, %v6473_v52 }
 0x209   : > { %3823 = vst [vmem:[%s6481_s20 + $0xe8] sm:$0xff] %v3791_v27  ;;  %v3790_v30 = vsel %vm3726_vm15, %v3694_v16, %v3758_v23  ;;  %v3696_v31 = vadd.f32 %v5211_v26, %v6473_v52 }
 0x20a   : > { %3822 = vst [vmem:[%s6481_s20 + $0xe0] sm:$0xff] %v3790_v30  ;;  %vm3729_vm0 = vcmp.ge.f32.partialorder %v3697_v29, 0.0  ;;  %v3761_v32 = vmul.f32 0.2, %v3697_v29 }
 0x20b   : > { %vm3728_vm1 = vcmp.ge.f32.partialorder %v3696_v31, 0.0  ;;  %v3760_v34 = vmul.f32 0.2, %v3696_v31 }
 0x20c   : > { %v3793_v35 = vsel %vm3729_vm0, %v3697_v29, %v3761_v32 }
 0x20d   : > { %3825 = vst [vmem:[%s6481_s20 + $0xf8] sm:$0xff] %v3793_v35  ;;  %v3792_v36 = vsel %vm3728_vm1, %v3696_v31, %v3760_v34 }
 0x20e   : > { %3824 = vst [vmem:[%s6481_s20 + $0xf0] sm:$0xff] %v3792_v36 }
 0x20f PF: > { %s13_s14 = sadd.s32 1, %s5483_s14   ;;  %s6674_s12 = smov %s5479_s13 }
 0x210   : > { %p10_p5 = scmp.ge.s32.totalorder %s13_s14, 6   ;;  %s6675_s13 = smov %s6677_s15 }
 0x212   :  { %12 = sbr.rel (!%p10_p5) target bundleno = 2 (0x2), region = 72 }

</bundles_post_ra>
